<compile_context>
chip_gen: v6e
topology: v6e:2x2x1
jax: 0.10.0
libtpu: 0.0.40
codegen_flags: <defaults>
</compile_context>

<pallas_src>
import functools

import jax
import jax.numpy as jnp
from jax.experimental import pallas as pl
from jax.experimental.pallas import tpu as pltpu


LANES = 128  # TPU lane width; output channels are padded to this so stores
             # are unmasked and lane-dense.


def _round_up(x, m):
    return ((x + m - 1) // m) * m


# ---------------------------------------------------------------------------
# Pallas kernel: fused 3x3x3 conv (stride 1, zero pad 1) for one (n, d) slab.
# ---------------------------------------------------------------------------
def _conv3d_slab_kernel(*refs, n_in, wp, qp, relu):
    """refs = [x_j for j in range(n_in)] + [w_j for j in range(n_in)]
              + [bias] + [out]

    x_j:  (1, 1, P_j, 3*Cin_j) bf16 -- flattened padded (H+2)x(W+2) plane at
          output depth d, with the three padded depth slabs d, d+1, d+2
          stacked along channels (channel index = kd*Cin + c).
    w_j:  (9, 3*Cin_j, 128) bf16 -- in-plane-tap-major conv weights,
          K index = kd*Cin + c, Cout zero-padded to 128.
    bias: (1, 128) f32
    out:  (1, 1, Qp, 128), Qp = H*(W+2); junk columns (w >= W) are sliced off
          by the wrapper.
    """
    xrefs = refs[:n_in]
    wrefs = refs[n_in: 2 * n_in]
    b_ref = refs[2 * n_in]
    o_ref = refs[2 * n_in + 1]
    cp = o_ref.shape[-1]

    # Bias folded into the accumulator init; f32 accumulation throughout.
    acc = jnp.broadcast_to(b_ref[...], (qp, cp)).astype(jnp.float32)

    for j in range(n_in):
        x3 = xrefs[j][0, 0]                       # (P, 3*Cin) bf16, loaded once
        w9 = wrefs[j]
        for kh in range(3):
            for kw in range(3):
                off = kh * wp + kw                # static row offset of the tap
                acc = acc + jnp.dot(x3[off:off + qp, :], w9[kh * 3 + kw],
                                    preferred_element_type=jnp.float32)
    if relu:
        acc = jnp.maximum(acc, 0.0)
    o_ref[0, 0] = acc.astype(o_ref.dtype)


def conv3d_pallas(inputs, bias_p, *, cout, relu, out_dtype=jnp.float32):
    """Fused 3x3x3 Conv3d, stride 1, zero padding 1.

    inputs: list of (x, w) pairs accumulated into ONE output (this is how the
            decoder's skip-concat is fused without materializing the concat):
              x: (N, D, H, W, Cin_j) float32 or bfloat16 (NDHWC)
              w: (9, 3*Cin_j, 128) bfloat16  (in-plane-tap-major, K=kd*Cin+c,
                 Cout zero-padded)
    bias_p: (1, 128) float32 (Cout zero-padded)
    cout:   number of real output channels to return
    returns (N, D, H, W, cout) with dtype out_dtype
    """
    N, D, H, W, _ = inputs[0][0].shape
    for x, _w in inputs:
        assert x.shape[:4] == (N, D, H, W)
    hp, wp = H + 2, W + 2
    qp = H * wp                            # output rows per slab (incl. junk)
    p_rows = _round_up(hp * wp + 2, 8)     # flat plane rows + halo overrun

    operands, in_specs = [], []
    for x, _w in inputs:
        cin = x.shape[-1]
        xp = jnp.pad(x.astype(jnp.bfloat16),
                     ((0, 0), (1, 1), (1, 1), (1, 1), (0, 0)))
        xf = xp.reshape(N, D + 2, hp * wp, cin)
        xf = jnp.pad(xf, ((0, 0), (0, 0), (0, p_rows - hp * wp), (0, 0)))
        # Depth-only unroll (3x): stack padded depths d, d+1, d+2 on channels.
        xcat = jnp.concatenate(
            [xf[:, 0:D], xf[:, 1:D + 1], xf[:, 2:D + 2]], axis=-1)
        operands.append(xcat)
        in_specs.append(
            pl.BlockSpec((1, 1, p_rows, 3 * cin), lambda n, d: (n, d, 0, 0)))
    for _x, w in inputs:                   # weights: resident, full block
        operands.append(w)
        in_specs.append(pl.BlockSpec(w.shape, lambda n, d: (0, 0, 0)))
    operands.append(bias_p)
    in_specs.append(pl.BlockSpec(bias_p.shape, lambda n, d: (0, 0)))

    kern = functools.partial(_conv3d_slab_kernel, n_in=len(inputs),
                             wp=wp, qp=qp, relu=relu)
    out = pl.pallas_call(
        kern,
        out_shape=jax.ShapeDtypeStruct((N, D, qp, LANES), out_dtype),
        grid=(N, D),
        in_specs=in_specs,
        out_specs=pl.BlockSpec((1, 1, qp, LANES), lambda n, d: (n, d, 0, 0)),
        compiler_params=pltpu.CompilerParams(
            dimension_semantics=("parallel", "parallel"),
            vmem_limit_bytes=32 * 1024 * 1024),
    )(*operands)

    # (N, D, H*(W+2), 128) -> (N, D, H, W+2, 128) -> drop junk cols & pad chans
    out = out.reshape(N, D, H, wp, LANES)[:, :, :, :W, :cout]
    return out


# ---------------------------------------------------------------------------
# Deterministic parameters (PyTorch Conv3d layout (Cout, Cin, kD, kH, kW)).
# ---------------------------------------------------------------------------
def _make_conv_params(key, cin, cout):
    k_w, k_b = jax.random.split(key)
    fan_in = cin * 27
    w = jax.random.normal(k_w, (cout, cin, 3, 3, 3), jnp.float32) / jnp.sqrt(fan_in)
    b = 0.01 * jax.random.normal(k_b, (cout,), jnp.float32)
    return w, b


def _pack_conv_weight(w):
    """(Cout, Cin, kd, kh, kw) f32 -> (9, 3*Cin, 128) bf16, tap-major in-plane,
    K index = kd*Cin + c (matches the wrapper's depth-stacked activations)."""
    cout, cin = w.shape[0], w.shape[1]
    wt = jnp.transpose(w, (3, 4, 2, 1, 0)).reshape(9, 3 * cin, cout)
    w_p = jnp.zeros((9, 3 * cin, LANES), jnp.bfloat16)
    return w_p.at[:, :, :cout].set(wt.astype(jnp.bfloat16))


def _pack_bias(b):
    cout = b.shape[0]
    return jnp.zeros((1, LANES), jnp.float32).at[0, :cout].set(b)


class UNet3DPallas:
    """Encoder -> middle -> decoder(+skip) UNet3D; every conv runs in Pallas."""

    def __init__(self, in_channels, out_channels, key, c_enc=8, c_mid=16):
        # TODO(synk): the reference module's encoder/middle/decoder are None
        # and its forward() is `pass` (returns None); this is a deterministic
        # stand-in architecture since the original defines no computation.
        self.out_channels = out_channels
        self.c_enc, self.c_mid = c_enc, c_mid
        k1, k2, k3 = jax.random.split(key, 3)
        w_enc, b_enc = _make_conv_params(k1, in_channels, c_enc)
        w_mid, b_mid = _make_conv_params(k2, c_enc, c_mid)
        # Decoder conv consumes concat([upsampled_middle, encoder_skip]);
        # split its Cin rows so the concat never has to be materialized.
        w_dec, b_dec = _make_conv_params(k3, c_mid + c_enc, out_channels)
        self.w_enc, self.b_enc = _pack_conv_weight(w_enc), _pack_bias(b_enc)
        self.w_mid, self.b_mid = _pack_conv_weight(w_mid), _pack_bias(b_mid)
        self.w_dec_u = _pack_conv_weight(w_dec[:, :c_mid])   # upsampled middle
        self.w_dec_e = _pack_conv_weight(w_dec[:, c_mid:])   # encoder skip
        self.b_dec = _pack_bias(b_dec)

    def __call__(self, x_ncdhw):
        x = jnp.transpose(x_ncdhw, (0, 2, 3, 4, 1)).astype(jnp.float32)  # NDHWC
        N, D, H, W, _ = x.shape
        assert D % 2 == 0 and H % 2 == 0 and W % 2 == 0

        # encoder: fused conv3d + bias + ReLU (Pallas), bf16 intermediate out
        e = conv3d_pallas([(x, self.w_enc)], self.b_enc,
                          cout=self.c_enc, relu=True, out_dtype=jnp.bfloat16)
        # 2x2x2 max-pool (cheap glue; e is materialized anyway for the skip)
        p = e.reshape(N, D // 2, 2, H // 2, 2, W // 2, 2, self.c_enc)
        p = p.max(axis=(2, 4, 6))

        # middle: fused conv3d + bias + ReLU (Pallas), bf16 intermediate out
        m = conv3d_pallas([(p, self.w_mid)], self.b_mid,
                          cout=self.c_mid, relu=True, out_dtype=jnp.bfloat16)

        # decoder: nearest-neighbor 2x upsample (glue), then a two-input
        # Pallas conv that fuses the skip concat: W_u @ u + W_e @ e + bias.
        # TODO(synk): the upsample could also be folded into the decoder
        # kernel; kept as XLA glue for lowering robustness.
        u = jnp.repeat(jnp.repeat(jnp.repeat(m, 2, axis=1), 2, axis=2), 2, axis=3)
        o = conv3d_pallas([(u, self.w_dec_u), (e, self.w_dec_e)], self.b_dec,
                          cout=self.out_channels, relu=False,
                          out_dtype=jnp.float32)

        return jnp.transpose(o, (0, 4, 1, 2, 3))  # back to NCDHW


if __name__ == "__main__":
    key = jax.random.PRNGKey(0)
    kx, kp = jax.random.split(key)

    in_channels, out_channels = 4, 4
    N, D, H, W = 2, 8, 8, 8  # small NCDHW input
    x = jax.random.normal(kx, (N, in_channels, D, H, W), jnp.float32)

    model = UNet3DPallas(in_channels, out_channels, kp)
    fwd = jax.jit(model.__call__)
    y = jax.block_until_ready(fwd(x))

    assert y.shape == (N, out_channels, D, H, W), y.shape
    assert y.dtype == jnp.float32
    assert bool(jnp.isfinite(y).all())
    print("KERNEL_OK")
</pallas_src>

<mosaic_0001>
module attributes {stable_mosaic.version = 11 : i64} {
  func.func @_conv3d_slab_kernel(%arg0: i32, %arg1: i32, %arg2: memref<1x1x104x12xbf16, #tpu.memory_space<vmem>>, %arg3: memref<9x12x128xbf16, #tpu.memory_space<vmem>>, %arg4: memref<1x128xf32, #tpu.memory_space<vmem>>, %arg5: memref<1x1x80x128xbf16, #tpu.memory_space<vmem>>) attributes {dimension_semantics = [#tpu.dimension_semantics<parallel>, #tpu.dimension_semantics<parallel>], iteration_bounds = array<i64: 2, 8>, scalar_prefetch = 0 : i64, scratch_operands = 0 : i64, tpu.core_type = #tpu.core_type<tc>, window_params = [{transform_indices = @transform_0, window_bounds = array<i64: 1, 1, 104, 12>}, {pipeline_mode = #tpu.pipeline_mode<synchronous>, transform_indices = @transform_1, window_bounds = array<i64: 9, 12, 128>}, {pipeline_mode = #tpu.pipeline_mode<synchronous>, transform_indices = @transform_2, window_bounds = array<i64: 1, 128>}, {transform_indices = @transform_3, window_bounds = array<i64: 1, 1, 80, 128>}]} {
    %c0 = arith.constant 0 : index
    %c0_0 = arith.constant 0 : index
    %0 = vector.load %arg4[%c0, %c0_0] : memref<1x128xf32, #tpu.memory_space<vmem>>, vector<1x128xf32>
    %1 = vector.shape_cast %0 : vector<1x128xf32> to vector<1x128xf32>
    %2 = vector.broadcast %1 : vector<1x128xf32> to vector<80x128xf32>
    %c0_1 = arith.constant 0 : index
    %c0_2 = arith.constant 0 : index
    %c0_3 = arith.constant 0 : index
    %c0_4 = arith.constant 0 : index
    %3 = vector.load %arg2[%c0_1, %c0_2, %c0_3, %c0_4] : memref<1x1x104x12xbf16, #tpu.memory_space<vmem>>, vector<1x1x104x12xbf16>
    %4 = vector.shape_cast %3 : vector<1x1x104x12xbf16> to vector<104x12xbf16>
    %5 = vector.extract_strided_slice %4 {offsets = [0, 0], sizes = [80, 12], strides = [1, 1]} : vector<104x12xbf16> to vector<80x12xbf16>
    %c0_5 = arith.constant 0 : index
    %c0_6 = arith.constant 0 : index
    %c0_7 = arith.constant 0 : index
    %6 = vector.load %arg3[%c0_5, %c0_6, %c0_7] : memref<9x12x128xbf16, #tpu.memory_space<vmem>>, vector<1x12x128xbf16>
    %7 = vector.shape_cast %6 : vector<1x12x128xbf16> to vector<12x128xbf16>
    %cst = arith.constant dense<0.000000e+00> : vector<80x128xf32>
    %8 = tpu.matmul %5, %7, %cst {dimension_numbers = #tpu.dot_dimension_numbers<[1], [0], [0], [1], [0, 0, 1, 1], [], []>} : vector<80x12xbf16>, vector<12x128xbf16>, vector<80x128xf32> -> vector<80x128xf32>
    %9 = arith.addf %2, %8 : vector<80x128xf32>
    %10 = vector.extract_strided_slice %4 {offsets = [1, 0], sizes = [80, 12], strides = [1, 1]} : vector<104x12xbf16> to vector<80x12xbf16>
    %c1 = arith.constant 1 : index
    %c0_8 = arith.constant 0 : index
    %c0_9 = arith.constant 0 : index
    %11 = vector.load %arg3[%c1, %c0_8, %c0_9] : memref<9x12x128xbf16, #tpu.memory_space<vmem>>, vector<1x12x128xbf16>
    %12 = vector.shape_cast %11 : vector<1x12x128xbf16> to vector<12x128xbf16>
    %cst_10 = arith.constant dense<0.000000e+00> : vector<80x128xf32>
    %13 = tpu.matmul %10, %12, %cst_10 {dimension_numbers = #tpu.dot_dimension_numbers<[1], [0], [0], [1], [0, 0, 1, 1], [], []>} : vector<80x12xbf16>, vector<12x128xbf16>, vector<80x128xf32> -> vector<80x128xf32>
    %14 = arith.addf %9, %13 : vector<80x128xf32>
    %15 = vector.extract_strided_slice %4 {offsets = [2, 0], sizes = [80, 12], strides = [1, 1]} : vector<104x12xbf16> to vector<80x12xbf16>
    %c2 = arith.constant 2 : index
    %c0_11 = arith.constant 0 : index
    %c0_12 = arith.constant 0 : index
    %16 = vector.load %arg3[%c2, %c0_11, %c0_12] : memref<9x12x128xbf16, #tpu.memory_space<vmem>>, vector<1x12x128xbf16>
    %17 = vector.shape_cast %16 : vector<1x12x128xbf16> to vector<12x128xbf16>
    %cst_13 = arith.constant dense<0.000000e+00> : vector<80x128xf32>
    %18 = tpu.matmul %15, %17, %cst_13 {dimension_numbers = #tpu.dot_dimension_numbers<[1], [0], [0], [1], [0, 0, 1, 1], [], []>} : vector<80x12xbf16>, vector<12x128xbf16>, vector<80x128xf32> -> vector<80x128xf32>
    %19 = arith.addf %14, %18 : vector<80x128xf32>
    %20 = vector.extract_strided_slice %4 {offsets = [10, 0], sizes = [80, 12], strides = [1, 1]} : vector<104x12xbf16> to vector<80x12xbf16>
    %c3 = arith.constant 3 : index
    %c0_14 = arith.constant 0 : index
    %c0_15 = arith.constant 0 : index
    %21 = vector.load %arg3[%c3, %c0_14, %c0_15] : memref<9x12x128xbf16, #tpu.memory_space<vmem>>, vector<1x12x128xbf16>
    %22 = vector.shape_cast %21 : vector<1x12x128xbf16> to vector<12x128xbf16>
    %cst_16 = arith.constant dense<0.000000e+00> : vector<80x128xf32>
    %23 = tpu.matmul %20, %22, %cst_16 {dimension_numbers = #tpu.dot_dimension_numbers<[1], [0], [0], [1], [0, 0, 1, 1], [], []>} : vector<80x12xbf16>, vector<12x128xbf16>, vector<80x128xf32> -> vector<80x128xf32>
    %24 = arith.addf %19, %23 : vector<80x128xf32>
    %25 = vector.extract_strided_slice %4 {offsets = [11, 0], sizes = [80, 12], strides = [1, 1]} : vector<104x12xbf16> to vector<80x12xbf16>
    %c4 = arith.constant 4 : index
    %c0_17 = arith.constant 0 : index
    %c0_18 = arith.constant 0 : index
    %26 = vector.load %arg3[%c4, %c0_17, %c0_18] : memref<9x12x128xbf16, #tpu.memory_space<vmem>>, vector<1x12x128xbf16>
    %27 = vector.shape_cast %26 : vector<1x12x128xbf16> to vector<12x128xbf16>
    %cst_19 = arith.constant dense<0.000000e+00> : vector<80x128xf32>
    %28 = tpu.matmul %25, %27, %cst_19 {dimension_numbers = #tpu.dot_dimension_numbers<[1], [0], [0], [1], [0, 0, 1, 1], [], []>} : vector<80x12xbf16>, vector<12x128xbf16>, vector<80x128xf32> -> vector<80x128xf32>
    %29 = arith.addf %24, %28 : vector<80x128xf32>
    %30 = vector.extract_strided_slice %4 {offsets = [12, 0], sizes = [80, 12], strides = [1, 1]} : vector<104x12xbf16> to vector<80x12xbf16>
    %c5 = arith.constant 5 : index
    %c0_20 = arith.constant 0 : index
    %c0_21 = arith.constant 0 : index
    %31 = vector.load %arg3[%c5, %c0_20, %c0_21] : memref<9x12x128xbf16, #tpu.memory_space<vmem>>, vector<1x12x128xbf16>
    %32 = vector.shape_cast %31 : vector<1x12x128xbf16> to vector<12x128xbf16>
    %cst_22 = arith.constant dense<0.000000e+00> : vector<80x128xf32>
    %33 = tpu.matmul %30, %32, %cst_22 {dimension_numbers = #tpu.dot_dimension_numbers<[1], [0], [0], [1], [0, 0, 1, 1], [], []>} : vector<80x12xbf16>, vector<12x128xbf16>, vector<80x128xf32> -> vector<80x128xf32>
    %34 = arith.addf %29, %33 : vector<80x128xf32>
    %35 = vector.extract_strided_slice %4 {offsets = [20, 0], sizes = [80, 12], strides = [1, 1]} : vector<104x12xbf16> to vector<80x12xbf16>
    %c6 = arith.constant 6 : index
    %c0_23 = arith.constant 0 : index
    %c0_24 = arith.constant 0 : index
    %36 = vector.load %arg3[%c6, %c0_23, %c0_24] : memref<9x12x128xbf16, #tpu.memory_space<vmem>>, vector<1x12x128xbf16>
    %37 = vector.shape_cast %36 : vector<1x12x128xbf16> to vector<12x128xbf16>
    %cst_25 = arith.constant dense<0.000000e+00> : vector<80x128xf32>
    %38 = tpu.matmul %35, %37, %cst_25 {dimension_numbers = #tpu.dot_dimension_numbers<[1], [0], [0], [1], [0, 0, 1, 1], [], []>} : vector<80x12xbf16>, vector<12x128xbf16>, vector<80x128xf32> -> vector<80x128xf32>
    %39 = arith.addf %34, %38 : vector<80x128xf32>
    %40 = vector.extract_strided_slice %4 {offsets = [21, 0], sizes = [80, 12], strides = [1, 1]} : vector<104x12xbf16> to vector<80x12xbf16>
    %c7 = arith.constant 7 : index
    %c0_26 = arith.constant 0 : index
    %c0_27 = arith.constant 0 : index
    %41 = vector.load %arg3[%c7, %c0_26, %c0_27] : memref<9x12x128xbf16, #tpu.memory_space<vmem>>, vector<1x12x128xbf16>
    %42 = vector.shape_cast %41 : vector<1x12x128xbf16> to vector<12x128xbf16>
    %cst_28 = arith.constant dense<0.000000e+00> : vector<80x128xf32>
    %43 = tpu.matmul %40, %42, %cst_28 {dimension_numbers = #tpu.dot_dimension_numbers<[1], [0], [0], [1], [0, 0, 1, 1], [], []>} : vector<80x12xbf16>, vector<12x128xbf16>, vector<80x128xf32> -> vector<80x128xf32>
    %44 = arith.addf %39, %43 : vector<80x128xf32>
    %45 = vector.extract_strided_slice %4 {offsets = [22, 0], sizes = [80, 12], strides = [1, 1]} : vector<104x12xbf16> to vector<80x12xbf16>
    %c8 = arith.constant 8 : index
    %c0_29 = arith.constant 0 : index
    %c0_30 = arith.constant 0 : index
    %46 = vector.load %arg3[%c8, %c0_29, %c0_30] : memref<9x12x128xbf16, #tpu.memory_space<vmem>>, vector<1x12x128xbf16>
    %47 = vector.shape_cast %46 : vector<1x12x128xbf16> to vector<12x128xbf16>
    %cst_31 = arith.constant dense<0.000000e+00> : vector<80x128xf32>
    %48 = tpu.matmul %45, %47, %cst_31 {dimension_numbers = #tpu.dot_dimension_numbers<[1], [0], [0], [1], [0, 0, 1, 1], [], []>} : vector<80x12xbf16>, vector<12x128xbf16>, vector<80x128xf32> -> vector<80x128xf32>
    %49 = arith.addf %44, %48 : vector<80x128xf32>
    %cst_32 = arith.constant 0.000000e+00 : f32
    %50 = vector.broadcast %cst_32 : f32 to vector<80x128xf32>
    %51 = arith.maximumf %49, %50 : vector<80x128xf32>
    %52 = arith.truncf %51 : vector<80x128xf32> to vector<80x128xbf16>
    %c0_33 = arith.constant 0 : index
    %c0_34 = arith.constant 0 : index
    %c0_35 = arith.constant 0 : index
    %c0_36 = arith.constant 0 : index
    %53 = vector.load %arg5[%c0_33, %c0_34, %c0_35, %c0_36] : memref<1x1x80x128xbf16, #tpu.memory_space<vmem>>, vector<1x1x80x128xbf16>
    %54 = vector.shape_cast %53 : vector<1x1x80x128xbf16> to vector<80x128xbf16>
    %55 = vector.shape_cast %52 : vector<80x128xbf16> to vector<1x1x80x128xbf16>
    tpu.vector_store %arg5[%c0_33, %c0_34, %c0_35, %c0_36], %55 {strides = array<i32>} : memref<1x1x80x128xbf16, #tpu.memory_space<vmem>>, vector<1x1x80x128xbf16>,
    return
  }
  func.func @transform_0(%arg0: i32, %arg1: i32) -> (i32, i32, i32, i32) {
    %c0_i32 = arith.constant 0 : i32
    %c0_i32_0 = arith.constant 0 : i32
    %c0_i32_1 = arith.constant 0 : i32
    return %arg0, %arg1, %c0_i32, %c0_i32_0 : i32, i32, i32, i32
  }
  func.func @transform_1(%arg0: i32, %arg1: i32) -> (i32, i32, i32) {
    %c0_i32 = arith.constant 0 : i32
    %c0_i32_0 = arith.constant 0 : i32
    %c0_i32_1 = arith.constant 0 : i32
    %c0_i32_2 = arith.constant 0 : i32
    return %c0_i32, %c0_i32_0, %c0_i32_1 : i32, i32, i32
  }
  func.func @transform_2(%arg0: i32, %arg1: i32) -> (i32, i32) {
    %c0_i32 = arith.constant 0 : i32
    %c0_i32_0 = arith.constant 0 : i32
    %c0_i32_1 = arith.constant 0 : i32
    return %c0_i32, %c0_i32_0 : i32, i32
  }
  func.func @transform_3(%arg0: i32, %arg1: i32) -> (i32, i32, i32, i32) {
    %c0_i32 = arith.constant 0 : i32
    %c0_i32_0 = arith.constant 0 : i32
    %c0_i32_1 = arith.constant 0 : i32
    return %arg0, %arg1, %c0_i32, %c0_i32_0 : i32, i32, i32, i32
  }
}

module attributes {stable_mosaic.version = 11 : i64} {
  func.func @_conv3d_slab_kernel(%arg0: i32, %arg1: i32, %arg2: memref<1x1x40x24xbf16, #tpu.memory_space<vmem>>, %arg3: memref<9x24x128xbf16, #tpu.memory_space<vmem>>, %arg4: memref<1x128xf32, #tpu.memory_space<vmem>>, %arg5: memref<1x1x24x128xbf16, #tpu.memory_space<vmem>>) attributes {dimension_semantics = [#tpu.dimension_semantics<parallel>, #tpu.dimension_semantics<parallel>], iteration_bounds = array<i64: 2, 4>, scalar_prefetch = 0 : i64, scratch_operands = 0 : i64, tpu.core_type = #tpu.core_type<tc>, window_params = [{transform_indices = @transform_0, window_bounds = array<i64: 1, 1, 40, 24>}, {pipeline_mode = #tpu.pipeline_mode<synchronous>, transform_indices = @transform_1, window_bounds = array<i64: 9, 24, 128>}, {pipeline_mode = #tpu.pipeline_mode<synchronous>, transform_indices = @transform_2, window_bounds = array<i64: 1, 128>}, {transform_indices = @transform_3, window_bounds = array<i64: 1, 1, 24, 128>}]} {
    %c0 = arith.constant 0 : index
    %c0_0 = arith.constant 0 : index
    %0 = vector.load %arg4[%c0, %c0_0] : memref<1x128xf32, #tpu.memory_space<vmem>>, vector<1x128xf32>
    %1 = vector.shape_cast %0 : vector<1x128xf32> to vector<1x128xf32>
    %2 = vector.broadcast %1 : vector<1x128xf32> to vector<24x128xf32>
    %c0_1 = arith.constant 0 : index
    %c0_2 = arith.constant 0 : index
    %c0_3 = arith.constant 0 : index
    %c0_4 = arith.constant 0 : index
    %3 = vector.load %arg2[%c0_1, %c0_2, %c0_3, %c0_4] : memref<1x1x40x24xbf16, #tpu.memory_space<vmem>>, vector<1x1x40x24xbf16>
    %4 = vector.shape_cast %3 : vector<1x1x40x24xbf16> to vector<40x24xbf16>
    %5 = vector.extract_strided_slice %4 {offsets = [0, 0], sizes = [24, 24], strides = [1, 1]} : vector<40x24xbf16> to vector<24x24xbf16>
    %c0_5 = arith.constant 0 : index
    %c0_6 = arith.constant 0 : index
    %c0_7 = arith.constant 0 : index
    %6 = vector.load %arg3[%c0_5, %c0_6, %c0_7] : memref<9x24x128xbf16, #tpu.memory_space<vmem>>, vector<1x24x128xbf16>
    %7 = vector.shape_cast %6 : vector<1x24x128xbf16> to vector<24x128xbf16>
    %cst = arith.constant dense<0.000000e+00> : vector<24x128xf32>
    %8 = tpu.matmul %5, %7, %cst {dimension_numbers = #tpu.dot_dimension_numbers<[1], [0], [0], [1], [0, 0, 1, 1], [], []>} : vector<24x24xbf16>, vector<24x128xbf16>, vector<24x128xf32> -> vector<24x128xf32>
    %9 = arith.addf %2, %8 : vector<24x128xf32>
    %10 = vector.extract_strided_slice %4 {offsets = [1, 0], sizes = [24, 24], strides = [1, 1]} : vector<40x24xbf16> to vector<24x24xbf16>
    %c1 = arith.constant 1 : index
    %c0_8 = arith.constant 0 : index
    %c0_9 = arith.constant 0 : index
    %11 = vector.load %arg3[%c1, %c0_8, %c0_9] : memref<9x24x128xbf16, #tpu.memory_space<vmem>>, vector<1x24x128xbf16>
    %12 = vector.shape_cast %11 : vector<1x24x128xbf16> to vector<24x128xbf16>
    %cst_10 = arith.constant dense<0.000000e+00> : vector<24x128xf32>
    %13 = tpu.matmul %10, %12, %cst_10 {dimension_numbers = #tpu.dot_dimension_numbers<[1], [0], [0], [1], [0, 0, 1, 1], [], []>} : vector<24x24xbf16>, vector<24x128xbf16>, vector<24x128xf32> -> vector<24x128xf32>
    %14 = arith.addf %9, %13 : vector<24x128xf32>
    %15 = vector.extract_strided_slice %4 {offsets = [2, 0], sizes = [24, 24], strides = [1, 1]} : vector<40x24xbf16> to vector<24x24xbf16>
    %c2 = arith.constant 2 : index
    %c0_11 = arith.constant 0 : index
    %c0_12 = arith.constant 0 : index
    %16 = vector.load %arg3[%c2, %c0_11, %c0_12] : memref<9x24x128xbf16, #tpu.memory_space<vmem>>, vector<1x24x128xbf16>
    %17 = vector.shape_cast %16 : vector<1x24x128xbf16> to vector<24x128xbf16>
    %cst_13 = arith.constant dense<0.000000e+00> : vector<24x128xf32>
    %18 = tpu.matmul %15, %17, %cst_13 {dimension_numbers = #tpu.dot_dimension_numbers<[1], [0], [0], [1], [0, 0, 1, 1], [], []>} : vector<24x24xbf16>, vector<24x128xbf16>, vector<24x128xf32> -> vector<24x128xf32>
    %19 = arith.addf %14, %18 : vector<24x128xf32>
    %20 = vector.extract_strided_slice %4 {offsets = [6, 0], sizes = [24, 24], strides = [1, 1]} : vector<40x24xbf16> to vector<24x24xbf16>
    %c3 = arith.constant 3 : index
    %c0_14 = arith.constant 0 : index
    %c0_15 = arith.constant 0 : index
    %21 = vector.load %arg3[%c3, %c0_14, %c0_15] : memref<9x24x128xbf16, #tpu.memory_space<vmem>>, vector<1x24x128xbf16>
    %22 = vector.shape_cast %21 : vector<1x24x128xbf16> to vector<24x128xbf16>
    %cst_16 = arith.constant dense<0.000000e+00> : vector<24x128xf32>
    %23 = tpu.matmul %20, %22, %cst_16 {dimension_numbers = #tpu.dot_dimension_numbers<[1], [0], [0], [1], [0, 0, 1, 1], [], []>} : vector<24x24xbf16>, vector<24x128xbf16>, vector<24x128xf32> -> vector<24x128xf32>
    %24 = arith.addf %19, %23 : vector<24x128xf32>
    %25 = vector.extract_strided_slice %4 {offsets = [7, 0], sizes = [24, 24], strides = [1, 1]} : vector<40x24xbf16> to vector<24x24xbf16>
    %c4 = arith.constant 4 : index
    %c0_17 = arith.constant 0 : index
    %c0_18 = arith.constant 0 : index
    %26 = vector.load %arg3[%c4, %c0_17, %c0_18] : memref<9x24x128xbf16, #tpu.memory_space<vmem>>, vector<1x24x128xbf16>
    %27 = vector.shape_cast %26 : vector<1x24x128xbf16> to vector<24x128xbf16>
    %cst_19 = arith.constant dense<0.000000e+00> : vector<24x128xf32>
    %28 = tpu.matmul %25, %27, %cst_19 {dimension_numbers = #tpu.dot_dimension_numbers<[1], [0], [0], [1], [0, 0, 1, 1], [], []>} : vector<24x24xbf16>, vector<24x128xbf16>, vector<24x128xf32> -> vector<24x128xf32>
    %29 = arith.addf %24, %28 : vector<24x128xf32>
    %30 = vector.extract_strided_slice %4 {offsets = [8, 0], sizes = [24, 24], strides = [1, 1]} : vector<40x24xbf16> to vector<24x24xbf16>
    %c5 = arith.constant 5 : index
    %c0_20 = arith.constant 0 : index
    %c0_21 = arith.constant 0 : index
    %31 = vector.load %arg3[%c5, %c0_20, %c0_21] : memref<9x24x128xbf16, #tpu.memory_space<vmem>>, vector<1x24x128xbf16>
    %32 = vector.shape_cast %31 : vector<1x24x128xbf16> to vector<24x128xbf16>
    %cst_22 = arith.constant dense<0.000000e+00> : vector<24x128xf32>
    %33 = tpu.matmul %30, %32, %cst_22 {dimension_numbers = #tpu.dot_dimension_numbers<[1], [0], [0], [1], [0, 0, 1, 1], [], []>} : vector<24x24xbf16>, vector<24x128xbf16>, vector<24x128xf32> -> vector<24x128xf32>
    %34 = arith.addf %29, %33 : vector<24x128xf32>
    %35 = vector.extract_strided_slice %4 {offsets = [12, 0], sizes = [24, 24], strides = [1, 1]} : vector<40x24xbf16> to vector<24x24xbf16>
    %c6 = arith.constant 6 : index
    %c0_23 = arith.constant 0 : index
    %c0_24 = arith.constant 0 : index
    %36 = vector.load %arg3[%c6, %c0_23, %c0_24] : memref<9x24x128xbf16, #tpu.memory_space<vmem>>, vector<1x24x128xbf16>
    %37 = vector.shape_cast %36 : vector<1x24x128xbf16> to vector<24x128xbf16>
    %cst_25 = arith.constant dense<0.000000e+00> : vector<24x128xf32>
    %38 = tpu.matmul %35, %37, %cst_25 {dimension_numbers = #tpu.dot_dimension_numbers<[1], [0], [0], [1], [0, 0, 1, 1], [], []>} : vector<24x24xbf16>, vector<24x128xbf16>, vector<24x128xf32> -> vector<24x128xf32>
    %39 = arith.addf %34, %38 : vector<24x128xf32>
    %40 = vector.extract_strided_slice %4 {offsets = [13, 0], sizes = [24, 24], strides = [1, 1]} : vector<40x24xbf16> to vector<24x24xbf16>
    %c7 = arith.constant 7 : index
    %c0_26 = arith.constant 0 : index
    %c0_27 = arith.constant 0 : index
    %41 = vector.load %arg3[%c7, %c0_26, %c0_27] : memref<9x24x128xbf16, #tpu.memory_space<vmem>>, vector<1x24x128xbf16>
    %42 = vector.shape_cast %41 : vector<1x24x128xbf16> to vector<24x128xbf16>
    %cst_28 = arith.constant dense<0.000000e+00> : vector<24x128xf32>
    %43 = tpu.matmul %40, %42, %cst_28 {dimension_numbers = #tpu.dot_dimension_numbers<[1], [0], [0], [1], [0, 0, 1, 1], [], []>} : vector<24x24xbf16>, vector<24x128xbf16>, vector<24x128xf32> -> vector<24x128xf32>
    %44 = arith.addf %39, %43 : vector<24x128xf32>
    %45 = vector.extract_strided_slice %4 {offsets = [14, 0], sizes = [24, 24], strides = [1, 1]} : vector<40x24xbf16> to vector<24x24xbf16>
    %c8 = arith.constant 8 : index
    %c0_29 = arith.constant 0 : index
    %c0_30 = arith.constant 0 : index
    %46 = vector.load %arg3[%c8, %c0_29, %c0_30] : memref<9x24x128xbf16, #tpu.memory_space<vmem>>, vector<1x24x128xbf16>
    %47 = vector.shape_cast %46 : vector<1x24x128xbf16> to vector<24x128xbf16>
    %cst_31 = arith.constant dense<0.000000e+00> : vector<24x128xf32>
    %48 = tpu.matmul %45, %47, %cst_31 {dimension_numbers = #tpu.dot_dimension_numbers<[1], [0], [0], [1], [0, 0, 1, 1], [], []>} : vector<24x24xbf16>, vector<24x128xbf16>, vector<24x128xf32> -> vector<24x128xf32>
    %49 = arith.addf %44, %48 : vector<24x128xf32>
    %cst_32 = arith.constant 0.000000e+00 : f32
    %50 = vector.broadcast %cst_32 : f32 to vector<24x128xf32>
    %51 = arith.maximumf %49, %50 : vector<24x128xf32>
    %52 = arith.truncf %51 : vector<24x128xf32> to vector<24x128xbf16>
    %c0_33 = arith.constant 0 : index
    %c0_34 = arith.constant 0 : index
    %c0_35 = arith.constant 0 : index
    %c0_36 = arith.constant 0 : index
    %53 = vector.load %arg5[%c0_33, %c0_34, %c0_35, %c0_36] : memref<1x1x24x128xbf16, #tpu.memory_space<vmem>>, vector<1x1x24x128xbf16>
    %54 = vector.shape_cast %53 : vector<1x1x24x128xbf16> to vector<24x128xbf16>
    %55 = vector.shape_cast %52 : vector<24x128xbf16> to vector<1x1x24x128xbf16>
    tpu.vector_store %arg5[%c0_33, %c0_34, %c0_35, %c0_36], %55 {strides = array<i32>} : memref<1x1x24x128xbf16, #tpu.memory_space<vmem>>, vector<1x1x24x128xbf16>,
    return
  }
  func.func @transform_0(%arg0: i32, %arg1: i32) -> (i32, i32, i32, i32) {
    %c0_i32 = arith.constant 0 : i32
    %c0_i32_0 = arith.constant 0 : i32
    %c0_i32_1 = arith.constant 0 : i32
    return %arg0, %arg1, %c0_i32, %c0_i32_0 : i32, i32, i32, i32
  }
  func.func @transform_1(%arg0: i32, %arg1: i32) -> (i32, i32, i32) {
    %c0_i32 = arith.constant 0 : i32
    %c0_i32_0 = arith.constant 0 : i32
    %c0_i32_1 = arith.constant 0 : i32
    %c0_i32_2 = arith.constant 0 : i32
    return %c0_i32, %c0_i32_0, %c0_i32_1 : i32, i32, i32
  }
  func.func @transform_2(%arg0: i32, %arg1: i32) -> (i32, i32) {
    %c0_i32 = arith.constant 0 : i32
    %c0_i32_0 = arith.constant 0 : i32
    %c0_i32_1 = arith.constant 0 : i32
    return %c0_i32, %c0_i32_0 : i32, i32
  }
  func.func @transform_3(%arg0: i32, %arg1: i32) -> (i32, i32, i32, i32) {
    %c0_i32 = arith.constant 0 : i32
    %c0_i32_0 = arith.constant 0 : i32
    %c0_i32_1 = arith.constant 0 : i32
    return %arg0, %arg1, %c0_i32, %c0_i32_0 : i32, i32, i32, i32
  }
}

module attributes {stable_mosaic.version = 11 : i64} {
  func.func @_conv3d_slab_kernel(%arg0: i32, %arg1: i32, %arg2: memref<1x1x104x48xbf16, #tpu.memory_space<vmem>>, %arg3: memref<1x1x104x24xbf16, #tpu.memory_space<vmem>>, %arg4: memref<9x48x128xbf16, #tpu.memory_space<vmem>>, %arg5: memref<9x24x128xbf16, #tpu.memory_space<vmem>>, %arg6: memref<1x128xf32, #tpu.memory_space<vmem>>, %arg7: memref<1x1x80x128xf32, #tpu.memory_space<vmem>>) attributes {dimension_semantics = [#tpu.dimension_semantics<parallel>, #tpu.dimension_semantics<parallel>], iteration_bounds = array<i64: 2, 8>, scalar_prefetch = 0 : i64, scratch_operands = 0 : i64, tpu.core_type = #tpu.core_type<tc>, window_params = [{transform_indices = @transform_0, window_bounds = array<i64: 1, 1, 104, 48>}, {transform_indices = @transform_1, window_bounds = array<i64: 1, 1, 104, 24>}, {pipeline_mode = #tpu.pipeline_mode<synchronous>, transform_indices = @transform_2, window_bounds = array<i64: 9, 48, 128>}, {pipeline_mode = #tpu.pipeline_mode<synchronous>, transform_indices = @transform_3, window_bounds = array<i64: 9, 24, 128>}, {pipeline_mode = #tpu.pipeline_mode<synchronous>, transform_indices = @transform_4, window_bounds = array<i64: 1, 128>}, {transform_indices = @transform_5, window_bounds = array<i64: 1, 1, 80, 128>}]} {
    %c0 = arith.constant 0 : index
    %c0_0 = arith.constant 0 : index
    %0 = vector.load %arg6[%c0, %c0_0] : memref<1x128xf32, #tpu.memory_space<vmem>>, vector<1x128xf32>
    %1 = vector.shape_cast %0 : vector<1x128xf32> to vector<1x128xf32>
    %2 = vector.broadcast %1 : vector<1x128xf32> to vector<80x128xf32>
    %c0_1 = arith.constant 0 : index
    %c0_2 = arith.constant 0 : index
    %c0_3 = arith.constant 0 : index
    %c0_4 = arith.constant 0 : index
    %3 = vector.load %arg2[%c0_1, %c0_2, %c0_3, %c0_4] : memref<1x1x104x48xbf16, #tpu.memory_space<vmem>>, vector<1x1x104x48xbf16>
    %4 = vector.shape_cast %3 : vector<1x1x104x48xbf16> to vector<104x48xbf16>
    %5 = vector.extract_strided_slice %4 {offsets = [0, 0], sizes = [80, 48], strides = [1, 1]} : vector<104x48xbf16> to vector<80x48xbf16>
    %c0_5 = arith.constant 0 : index
    %c0_6 = arith.constant 0 : index
    %c0_7 = arith.constant 0 : index
    %6 = vector.load %arg4[%c0_5, %c0_6, %c0_7] : memref<9x48x128xbf16, #tpu.memory_space<vmem>>, vector<1x48x128xbf16>
    %7 = vector.shape_cast %6 : vector<1x48x128xbf16> to vector<48x128xbf16>
    %cst = arith.constant dense<0.000000e+00> : vector<80x128xf32>
    %8 = tpu.matmul %5, %7, %cst {dimension_numbers = #tpu.dot_dimension_numbers<[1], [0], [0], [1], [0, 0, 1, 1], [], []>} : vector<80x48xbf16>, vector<48x128xbf16>, vector<80x128xf32> -> vector<80x128xf32>
    %9 = arith.addf %2, %8 : vector<80x128xf32>
    %10 = vector.extract_strided_slice %4 {offsets = [1, 0], sizes = [80, 48], strides = [1, 1]} : vector<104x48xbf16> to vector<80x48xbf16>
    %c1 = arith.constant 1 : index
    %c0_8 = arith.constant 0 : index
    %c0_9 = arith.constant 0 : index
    %11 = vector.load %arg4[%c1, %c0_8, %c0_9] : memref<9x48x128xbf16, #tpu.memory_space<vmem>>, vector<1x48x128xbf16>
    %12 = vector.shape_cast %11 : vector<1x48x128xbf16> to vector<48x128xbf16>
    %cst_10 = arith.constant dense<0.000000e+00> : vector<80x128xf32>
    %13 = tpu.matmul %10, %12, %cst_10 {dimension_numbers = #tpu.dot_dimension_numbers<[1], [0], [0], [1], [0, 0, 1, 1], [], []>} : vector<80x48xbf16>, vector<48x128xbf16>, vector<80x128xf32> -> vector<80x128xf32>
    %14 = arith.addf %9, %13 : vector<80x128xf32>
    %15 = vector.extract_strided_slice %4 {offsets = [2, 0], sizes = [80, 48], strides = [1, 1]} : vector<104x48xbf16> to vector<80x48xbf16>
    %c2 = arith.constant 2 : index
    %c0_11 = arith.constant 0 : index
    %c0_12 = arith.constant 0 : index
    %16 = vector.load %arg4[%c2, %c0_11, %c0_12] : memref<9x48x128xbf16, #tpu.memory_space<vmem>>, vector<1x48x128xbf16>
    %17 = vector.shape_cast %16 : vector<1x48x128xbf16> to vector<48x128xbf16>
    %cst_13 = arith.constant dense<0.000000e+00> : vector<80x128xf32>
    %18 = tpu.matmul %15, %17, %cst_13 {dimension_numbers = #tpu.dot_dimension_numbers<[1], [0], [0], [1], [0, 0, 1, 1], [], []>} : vector<80x48xbf16>, vector<48x128xbf16>, vector<80x128xf32> -> vector<80x128xf32>
    %19 = arith.addf %14, %18 : vector<80x128xf32>
    %20 = vector.extract_strided_slice %4 {offsets = [10, 0], sizes = [80, 48], strides = [1, 1]} : vector<104x48xbf16> to vector<80x48xbf16>
    %c3 = arith.constant 3 : index
    %c0_14 = arith.constant 0 : index
    %c0_15 = arith.constant 0 : index
    %21 = vector.load %arg4[%c3, %c0_14, %c0_15] : memref<9x48x128xbf16, #tpu.memory_space<vmem>>, vector<1x48x128xbf16>
    %22 = vector.shape_cast %21 : vector<1x48x128xbf16> to vector<48x128xbf16>
    %cst_16 = arith.constant dense<0.000000e+00> : vector<80x128xf32>
    %23 = tpu.matmul %20, %22, %cst_16 {dimension_numbers = #tpu.dot_dimension_numbers<[1], [0], [0], [1], [0, 0, 1, 1], [], []>} : vector<80x48xbf16>, vector<48x128xbf16>, vector<80x128xf32> -> vector<80x128xf32>
    %24 = arith.addf %19, %23 : vector<80x128xf32>
    %25 = vector.extract_strided_slice %4 {offsets = [11, 0], sizes = [80, 48], strides = [1, 1]} : vector<104x48xbf16> to vector<80x48xbf16>
    %c4 = arith.constant 4 : index
    %c0_17 = arith.constant 0 : index
    %c0_18 = arith.constant 0 : index
    %26 = vector.load %arg4[%c4, %c0_17, %c0_18] : memref<9x48x128xbf16, #tpu.memory_space<vmem>>, vector<1x48x128xbf16>
    %27 = vector.shape_cast %26 : vector<1x48x128xbf16> to vector<48x128xbf16>
    %cst_19 = arith.constant dense<0.000000e+00> : vector<80x128xf32>
    %28 = tpu.matmul %25, %27, %cst_19 {dimension_numbers = #tpu.dot_dimension_numbers<[1], [0], [0], [1], [0, 0, 1, 1], [], []>} : vector<80x48xbf16>, vector<48x128xbf16>, vector<80x128xf32> -> vector<80x128xf32>
    %29 = arith.addf %24, %28 : vector<80x128xf32>
    %30 = vector.extract_strided_slice %4 {offsets = [12, 0], sizes = [80, 48], strides = [1, 1]} : vector<104x48xbf16> to vector<80x48xbf16>
    %c5 = arith.constant 5 : index
    %c0_20 = arith.constant 0 : index
    %c0_21 = arith.constant 0 : index
    %31 = vector.load %arg4[%c5, %c0_20, %c0_21] : memref<9x48x128xbf16, #tpu.memory_space<vmem>>, vector<1x48x128xbf16>
    %32 = vector.shape_cast %31 : vector<1x48x128xbf16> to vector<48x128xbf16>
    %cst_22 = arith.constant dense<0.000000e+00> : vector<80x128xf32>
    %33 = tpu.matmul %30, %32, %cst_22 {dimension_numbers = #tpu.dot_dimension_numbers<[1], [0], [0], [1], [0, 0, 1, 1], [], []>} : vector<80x48xbf16>, vector<48x128xbf16>, vector<80x128xf32> -> vector<80x128xf32>
    %34 = arith.addf %29, %33 : vector<80x128xf32>
    %35 = vector.extract_strided_slice %4 {offsets = [20, 0], sizes = [80, 48], strides = [1, 1]} : vector<104x48xbf16> to vector<80x48xbf16>
    %c6 = arith.constant 6 : index
    %c0_23 = arith.constant 0 : index
    %c0_24 = arith.constant 0 : index
    %36 = vector.load %arg4[%c6, %c0_23, %c0_24] : memref<9x48x128xbf16, #tpu.memory_space<vmem>>, vector<1x48x128xbf16>
    %37 = vector.shape_cast %36 : vector<1x48x128xbf16> to vector<48x128xbf16>
    %cst_25 = arith.constant dense<0.000000e+00> : vector<80x128xf32>
    %38 = tpu.matmul %35, %37, %cst_25 {dimension_numbers = #tpu.dot_dimension_numbers<[1], [0], [0], [1], [0, 0, 1, 1], [], []>} : vector<80x48xbf16>, vector<48x128xbf16>, vector<80x128xf32> -> vector<80x128xf32>
    %39 = arith.addf %34, %38 : vector<80x128xf32>
    %40 = vector.extract_strided_slice %4 {offsets = [21, 0], sizes = [80, 48], strides = [1, 1]} : vector<104x48xbf16> to vector<80x48xbf16>
    %c7 = arith.constant 7 : index
    %c0_26 = arith.constant 0 : index
    %c0_27 = arith.constant 0 : index
    %41 = vector.load %arg4[%c7, %c0_26, %c0_27] : memref<9x48x128xbf16, #tpu.memory_space<vmem>>, vector<1x48x128xbf16>
    %42 = vector.shape_cast %41 : vector<1x48x128xbf16> to vector<48x128xbf16>
    %cst_28 = arith.constant dense<0.000000e+00> : vector<80x128xf32>
    %43 = tpu.matmul %40, %42, %cst_28 {dimension_numbers = #tpu.dot_dimension_numbers<[1], [0], [0], [1], [0, 0, 1, 1], [], []>} : vector<80x48xbf16>, vector<48x128xbf16>, vector<80x128xf32> -> vector<80x128xf32>
    %44 = arith.addf %39, %43 : vector<80x128xf32>
    %45 = vector.extract_strided_slice %4 {offsets = [22, 0], sizes = [80, 48], strides = [1, 1]} : vector<104x48xbf16> to vector<80x48xbf16>
    %c8 = arith.constant 8 : index
    %c0_29 = arith.constant 0 : index
    %c0_30 = arith.constant 0 : index
    %46 = vector.load %arg4[%c8, %c0_29, %c0_30] : memref<9x48x128xbf16, #tpu.memory_space<vmem>>, vector<1x48x128xbf16>
    %47 = vector.shape_cast %46 : vector<1x48x128xbf16> to vector<48x128xbf16>
    %cst_31 = arith.constant dense<0.000000e+00> : vector<80x128xf32>
    %48 = tpu.matmul %45, %47, %cst_31 {dimension_numbers = #tpu.dot_dimension_numbers<[1], [0], [0], [1], [0, 0, 1, 1], [], []>} : vector<80x48xbf16>, vector<48x128xbf16>, vector<80x128xf32> -> vector<80x128xf32>
    %49 = arith.addf %44, %48 : vector<80x128xf32>
    %c0_32 = arith.constant 0 : index
    %c0_33 = arith.constant 0 : index
    %c0_34 = arith.constant 0 : index
    %c0_35 = arith.constant 0 : index
    %50 = vector.load %arg3[%c0_32, %c0_33, %c0_34, %c0_35] : memref<1x1x104x24xbf16, #tpu.memory_space<vmem>>, vector<1x1x104x24xbf16>
    %51 = vector.shape_cast %50 : vector<1x1x104x24xbf16> to vector<104x24xbf16>
    %52 = vector.extract_strided_slice %51 {offsets = [0, 0], sizes = [80, 24], strides = [1, 1]} : vector<104x24xbf16> to vector<80x24xbf16>
    %c0_36 = arith.constant 0 : index
    %c0_37 = arith.constant 0 : index
    %c0_38 = arith.constant 0 : index
    %53 = vector.load %arg5[%c0_36, %c0_37, %c0_38] : memref<9x24x128xbf16, #tpu.memory_space<vmem>>, vector<1x24x128xbf16>
    %54 = vector.shape_cast %53 : vector<1x24x128xbf16> to vector<24x128xbf16>
    %cst_39 = arith.constant dense<0.000000e+00> : vector<80x128xf32>
    %55 = tpu.matmul %52, %54, %cst_39 {dimension_numbers = #tpu.dot_dimension_numbers<[1], [0], [0], [1], [0, 0, 1, 1], [], []>} : vector<80x24xbf16>, vector<24x128xbf16>, vector<80x128xf32> -> vector<80x128xf32>
    %56 = arith.addf %49, %55 : vector<80x128xf32>
    %57 = vector.extract_strided_slice %51 {offsets = [1, 0], sizes = [80, 24], strides = [1, 1]} : vector<104x24xbf16> to vector<80x24xbf16>
    %c1_40 = arith.constant 1 : index
    %c0_41 = arith.constant 0 : index
    %c0_42 = arith.constant 0 : index
    %58 = vector.load %arg5[%c1_40, %c0_41, %c0_42] : memref<9x24x128xbf16, #tpu.memory_space<vmem>>, vector<1x24x128xbf16>
    %59 = vector.shape_cast %58 : vector<1x24x128xbf16> to vector<24x128xbf16>
    %cst_43 = arith.constant dense<0.000000e+00> : vector<80x128xf32>
    %60 = tpu.matmul %57, %59, %cst_43 {dimension_numbers = #tpu.dot_dimension_numbers<[1], [0], [0], [1], [0, 0, 1, 1], [], []>} : vector<80x24xbf16>, vector<24x128xbf16>, vector<80x128xf32> -> vector<80x128xf32>
    %61 = arith.addf %56, %60 : vector<80x128xf32>
    %62 = vector.extract_strided_slice %51 {offsets = [2, 0], sizes = [80, 24], strides = [1, 1]} : vector<104x24xbf16> to vector<80x24xbf16>
    %c2_44 = arith.constant 2 : index
    %c0_45 = arith.constant 0 : index
    %c0_46 = arith.constant 0 : index
    %63 = vector.load %arg5[%c2_44, %c0_45, %c0_46] : memref<9x24x128xbf16, #tpu.memory_space<vmem>>, vector<1x24x128xbf16>
    %64 = vector.shape_cast %63 : vector<1x24x128xbf16> to vector<24x128xbf16>
    %cst_47 = arith.constant dense<0.000000e+00> : vector<80x128xf32>
    %65 = tpu.matmul %62, %64, %cst_47 {dimension_numbers = #tpu.dot_dimension_numbers<[1], [0], [0], [1], [0, 0, 1, 1], [], []>} : vector<80x24xbf16>, vector<24x128xbf16>, vector<80x128xf32> -> vector<80x128xf32>
    %66 = arith.addf %61, %65 : vector<80x128xf32>
    %67 = vector.extract_strided_slice %51 {offsets = [10, 0], sizes = [80, 24], strides = [1, 1]} : vector<104x24xbf16> to vector<80x24xbf16>
    %c3_48 = arith.constant 3 : index
    %c0_49 = arith.constant 0 : index
    %c0_50 = arith.constant 0 : index
    %68 = vector.load %arg5[%c3_48, %c0_49, %c0_50] : memref<9x24x128xbf16, #tpu.memory_space<vmem>>, vector<1x24x128xbf16>
    %69 = vector.shape_cast %68 : vector<1x24x128xbf16> to vector<24x128xbf16>
    %cst_51 = arith.constant dense<0.000000e+00> : vector<80x128xf32>
    %70 = tpu.matmul %67, %69, %cst_51 {dimension_numbers = #tpu.dot_dimension_numbers<[1], [0], [0], [1], [0, 0, 1, 1], [], []>} : vector<80x24xbf16>, vector<24x128xbf16>, vector<80x128xf32> -> vector<80x128xf32>
    %71 = arith.addf %66, %70 : vector<80x128xf32>
    %72 = vector.extract_strided_slice %51 {offsets = [11, 0], sizes = [80, 24], strides = [1, 1]} : vector<104x24xbf16> to vector<80x24xbf16>
    %c4_52 = arith.constant 4 : index
    %c0_53 = arith.constant 0 : index
    %c0_54 = arith.constant 0 : index
    %73 = vector.load %arg5[%c4_52, %c0_53, %c0_54] : memref<9x24x128xbf16, #tpu.memory_space<vmem>>, vector<1x24x128xbf16>
    %74 = vector.shape_cast %73 : vector<1x24x128xbf16> to vector<24x128xbf16>
    %cst_55 = arith.constant dense<0.000000e+00> : vector<80x128xf32>
    %75 = tpu.matmul %72, %74, %cst_55 {dimension_numbers = #tpu.dot_dimension_numbers<[1], [0], [0], [1], [0, 0, 1, 1], [], []>} : vector<80x24xbf16>, vector<24x128xbf16>, vector<80x128xf32> -> vector<80x128xf32>
    %76 = arith.addf %71, %75 : vector<80x128xf32>
    %77 = vector.extract_strided_slice %51 {offsets = [12, 0], sizes = [80, 24], strides = [1, 1]} : vector<104x24xbf16> to vector<80x24xbf16>
    %c5_56 = arith.constant 5 : index
    %c0_57 = arith.constant 0 : index
    %c0_58 = arith.constant 0 : index
    %78 = vector.load %arg5[%c5_56, %c0_57, %c0_58] : memref<9x24x128xbf16, #tpu.memory_space<vmem>>, vector<1x24x128xbf16>
    %79 = vector.shape_cast %78 : vector<1x24x128xbf16> to vector<24x128xbf16>
    %cst_59 = arith.constant dense<0.000000e+00> : vector<80x128xf32>
    %80 = tpu.matmul %77, %79, %cst_59 {dimension_numbers = #tpu.dot_dimension_numbers<[1], [0], [0], [1], [0, 0, 1, 1], [], []>} : vector<80x24xbf16>, vector<24x128xbf16>, vector<80x128xf32> -> vector<80x128xf32>
    %81 = arith.addf %76, %80 : vector<80x128xf32>
    %82 = vector.extract_strided_slice %51 {offsets = [20, 0], sizes = [80, 24], strides = [1, 1]} : vector<104x24xbf16> to vector<80x24xbf16>
    %c6_60 = arith.constant 6 : index
    %c0_61 = arith.constant 0 : index
    %c0_62 = arith.constant 0 : index
    %83 = vector.load %arg5[%c6_60, %c0_61, %c0_62] : memref<9x24x128xbf16, #tpu.memory_space<vmem>>, vector<1x24x128xbf16>
    %84 = vector.shape_cast %83 : vector<1x24x128xbf16> to vector<24x128xbf16>
    %cst_63 = arith.constant dense<0.000000e+00> : vector<80x128xf32>
    %85 = tpu.matmul %82, %84, %cst_63 {dimension_numbers = #tpu.dot_dimension_numbers<[1], [0], [0], [1], [0, 0, 1, 1], [], []>} : vector<80x24xbf16>, vector<24x128xbf16>, vector<80x128xf32> -> vector<80x128xf32>
    %86 = arith.addf %81, %85 : vector<80x128xf32>
    %87 = vector.extract_strided_slice %51 {offsets = [21, 0], sizes = [80, 24], strides = [1, 1]} : vector<104x24xbf16> to vector<80x24xbf16>
    %c7_64 = arith.constant 7 : index
    %c0_65 = arith.constant 0 : index
    %c0_66 = arith.constant 0 : index
    %88 = vector.load %arg5[%c7_64, %c0_65, %c0_66] : memref<9x24x128xbf16, #tpu.memory_space<vmem>>, vector<1x24x128xbf16>
    %89 = vector.shape_cast %88 : vector<1x24x128xbf16> to vector<24x128xbf16>
    %cst_67 = arith.constant dense<0.000000e+00> : vector<80x128xf32>
    %90 = tpu.matmul %87, %89, %cst_67 {dimension_numbers = #tpu.dot_dimension_numbers<[1], [0], [0], [1], [0, 0, 1, 1], [], []>} : vector<80x24xbf16>, vector<24x128xbf16>, vector<80x128xf32> -> vector<80x128xf32>
    %91 = arith.addf %86, %90 : vector<80x128xf32>
    %92 = vector.extract_strided_slice %51 {offsets = [22, 0], sizes = [80, 24], strides = [1, 1]} : vector<104x24xbf16> to vector<80x24xbf16>
    %c8_68 = arith.constant 8 : index
    %c0_69 = arith.constant 0 : index
    %c0_70 = arith.constant 0 : index
    %93 = vector.load %arg5[%c8_68, %c0_69, %c0_70] : memref<9x24x128xbf16, #tpu.memory_space<vmem>>, vector<1x24x128xbf16>
    %94 = vector.shape_cast %93 : vector<1x24x128xbf16> to vector<24x128xbf16>
    %cst_71 = arith.constant dense<0.000000e+00> : vector<80x128xf32>
    %95 = tpu.matmul %92, %94, %cst_71 {dimension_numbers = #tpu.dot_dimension_numbers<[1], [0], [0], [1], [0, 0, 1, 1], [], []>} : vector<80x24xbf16>, vector<24x128xbf16>, vector<80x128xf32> -> vector<80x128xf32>
    %96 = arith.addf %91, %95 : vector<80x128xf32>
    %c0_72 = arith.constant 0 : index
    %c0_73 = arith.constant 0 : index
    %c0_74 = arith.constant 0 : index
    %c0_75 = arith.constant 0 : index
    %97 = vector.load %arg7[%c0_72, %c0_73, %c0_74, %c0_75] : memref<1x1x80x128xf32, #tpu.memory_space<vmem>>, vector<1x1x80x128xf32>
    %98 = vector.shape_cast %97 : vector<1x1x80x128xf32> to vector<80x128xf32>
    %99 = vector.shape_cast %96 : vector<80x128xf32> to vector<1x1x80x128xf32>
    tpu.vector_store %arg7[%c0_72, %c0_73, %c0_74, %c0_75], %99 {strides = array<i32>} : memref<1x1x80x128xf32, #tpu.memory_space<vmem>>, vector<1x1x80x128xf32>,
    return
  }
  func.func @transform_0(%arg0: i32, %arg1: i32) -> (i32, i32, i32, i32) {
    %c0_i32 = arith.constant 0 : i32
    %c0_i32_0 = arith.constant 0 : i32
    %c0_i32_1 = arith.constant 0 : i32
    return %arg0, %arg1, %c0_i32, %c0_i32_0 : i32, i32, i32, i32
  }
  func.func @transform_1(%arg0: i32, %arg1: i32) -> (i32, i32, i32, i32) {
    %c0_i32 = arith.constant 0 : i32
    %c0_i32_0 = arith.constant 0 : i32
    %c0_i32_1 = arith.constant 0 : i32
    return %arg0, %arg1, %c0_i32, %c0_i32_0 : i32, i32, i32, i32
  }
  func.func @transform_2(%arg0: i32, %arg1: i32) -> (i32, i32, i32) {
    %c0_i32 = arith.constant 0 : i32
    %c0_i32_0 = arith.constant 0 : i32
    %c0_i32_1 = arith.constant 0 : i32
    %c0_i32_2 = arith.constant 0 : i32
    return %c0_i32, %c0_i32_0, %c0_i32_1 : i32, i32, i32
  }
  func.func @transform_3(%arg0: i32, %arg1: i32) -> (i32, i32, i32) {
    %c0_i32 = arith.constant 0 : i32
    %c0_i32_0 = arith.constant 0 : i32
    %c0_i32_1 = arith.constant 0 : i32
    %c0_i32_2 = arith.constant 0 : i32
    return %c0_i32, %c0_i32_0, %c0_i32_1 : i32, i32, i32
  }
  func.func @transform_4(%arg0: i32, %arg1: i32) -> (i32, i32) {
    %c0_i32 = arith.constant 0 : i32
    %c0_i32_0 = arith.constant 0 : i32
    %c0_i32_1 = arith.constant 0 : i32
    return %c0_i32, %c0_i32_0 : i32, i32
  }
  func.func @transform_5(%arg0: i32, %arg1: i32) -> (i32, i32, i32, i32) {
    %c0_i32 = arith.constant 0 : i32
    %c0_i32_0 = arith.constant 0 : i32
    %c0_i32_1 = arith.constant 0 : i32
    return %arg0, %arg1, %c0_i32, %c0_i32_0 : i32, i32, i32, i32
  }
}

</mosaic_0001>

<bundles_post_ra>
// kernel: a_call__.3
= control target key start
LH: loop header
LB: loop body
LE: loop exit
PB: predicated region body
PF: predicated region fallthrough
CT: control target
= control target key end

     0   :  { %s2119_s12 = smov 0   ;;  %s2121_s13 = smov 0   ;;  %s2732_s0 = inlined_call_operand.vmem [shape: bf16[2,8,104,12], index: 0, kind: input, shape index: {}]   ;;  %s2733_s1 = inlined_call_operand.vmem [shape: bf16[9,12,128], index: 1, kind: input, shape index: {}]   ;;  %s2734_s2 = inlined_call_operand.vmem [shape: f32[1,128], index: 2, kind: input, shape index: {}]   ;;  %s2735_s3 = inlined_call_operand.vmem [shape: bf16[2,8,80,128], index: 3, kind: output, shape index: {}]  }
   0x1   :  { %s2123_s14 = smov 0   ;;  %s2125_s15 = smov 0  }
   0x2   :  { %s2127_s16 = smov 0  }
   0x3 LB: > { %s22_s17 = sadd.s32 1, %s2087_s14  ;;  %s25_s18 = sadd.s32 1, %s2091_s15  ;;  %s2095_s16 = sphi %s2127_s16, %s13_s16   ;;  %s2091_s15 = sphi %s2125_s15, %s2739_s15   ;;  %s2087_s14 = sphi %s2123_s14, %s2738_s14   ;;  %s2083_s13 = sphi %s2121_s13, %s2737_s13   ;;  %s2079_s12 = sphi %s2119_s12, %s2736_s12  }
   0x4   : > { %p23_p0 = scmp.ge.s32.totalorder %s22_s17, 8  ;;  %p1595_p1 = scmp.ge.s32.totalorder %s2095_s16, 1 }
   0x5   : > { %p157_p2 = scmp.lt.s32.totalorder %s2095_s16, 17 }
   0x6   : > { %s2741_s17 = smov (%p23_p0, %s22_s17), 0  ;;  %s2743_s18 = smov (!%p23_p0, %s25_s18), %s2091_s15 }
   0x7   : > { %p158_p3 = pnand %p1595_p1, %p157_p2  ;;  %p27_p4 = scmp.ge.s32.totalorder %s2743_s18, 2 }
   0x8   : > { %p189_p5 = scmp.lt.s32.totalorder (!%p158_p3), %s2083_s13, 1  ;;  %p191_p6 = scmp.lt.s32.totalorder (!%p158_p3), %s2079_s12, 7 }
   0x9   : > { %s2745_s18 = smov (%p27_p4, %s2743_s18), 0  ;;  %161 = sbr.rel (%p158_p3) target bundleno = 404 (0x194), region = 32 }
   0xe   : > { %vm276_vm0 = vcmask 1045504   ;;  %v2097_v0 = vmov 0.0   ;;  %v2034_v1 = vld [vmem:[%s2733_s1] sm:$0x3f]   ;;  %vm2098_vm1 = vmmov 0   ;;  %s2747_s13 = smov (!%p189_p5, %s2083_s13), 1 }
   0xf   : > { %1788 = vmatprep.subr.bf16.mxu0 %v2097_v0  ;;  %1986 = vmatprep.subr.bf16.mxu1 %v2097_v0  ;;  %v278_v2 = vsel %vm276_vm0, %v2034_v1, 0  ;;  %s2749_s12 = smov (!%p191_p6, %s2079_s12), 7  ;;  %s1989_s21 = smul.u32 104, %s2747_s13  ;;  %v2041_v3 = vld [vmem:[%s2733_s1 + $0x10] sm:$0x3f]   ;;  %vm260_vm2 = vcmask 97280  }
  0x10   : > { %1790 = vmatprep.mubr.msk.bf16.mxu0 %vm2098_vm1, %v2097_v0  ;;  %1802 = vmatprep.mubr.msk.bf16.mxu1 %vm2098_vm1, %v2097_v0  ;;  %s1988_s22 = smul.u32 13, %s2749_s12  ;;  %v2042_v4 = vld [vmem:[%s2733_s1 + $0x8] sm:$0x3f]   ;;  %v551_v8 = vsel %vm276_vm0, %v2041_v3, 0  ;;  %v2044_v28 = vld [vmem:[%s2733_s1 + $0x18] sm:$0x3f]  }
  0x11   : > { %1789 = vmatpush3.bf16.msra.mxu0 %v278_v2  ;;  %1987 = vmatpush3.bf16.msra.mxu1 %v278_v2  ;;  %v430_v12 = vsel %vm276_vm0, %v2042_v4, 0  ;;  %v2045_v32 = vld [vmem:[%s2733_s1 + $0x20] sm:$0x3f]   ;;  %vm369_vm3 = vsmask.f32 7424  ;;  %vm518_vm4 = vcmask 1046528  }
  0x12   : > { %1832 = vmatprep.subr.bf16.mxu0 %v2097_v0  ;;  %1810 = vmatprep.subr.bf16.mxu1 %v2097_v0  ;;  %s195_s23 = sadd.s32 %s1989_s21, %s1988_s22  ;;  %v679_v39 = vsel %vm276_vm0, %v2044_v28, 0  ;;  %v842_v43 = vsel %vm276_vm0, %v2045_v32, 0  ;;  %vm767_vm5 = vsmask.f32 6400  ;;  %vm1175_vm6 = vsmask.f32 5376 }
  0x13   : > { %s1596_s26 = sshll.u32 %s195_s23, 2  ;;  %vm1318_vm7 = vcmask 1044480   ;;  %s1991_s27 = smul.u32 80, %s2747_s13 }
  0x14   : > { %s2177_s29 = scalar_lea.vmem %s2732_s0, %s1596_s26  ;;  %s1990_s26 = smul.u32 10, %s2749_s12 }
  0x15   : > { %v215_v5 = vld [vmem:[%s2177_s29] sm:$0xf]  ;;  %v2184_v6 = vld [vmem:[%s2177_s29 + $0x4] sm:$0xf]  ;;  %v2189_v9 = vld [vmem:[%s2177_s29 + $0x18] sm:$0xf] }
  0x16   : > { %v1599_v7 = vcombine.low %v215_v5, %v2184_v6  ;;  %v222_v10 = vld [vmem:[%s2177_s29 + $0x1c] sm:$0xf]  ;;  %v2198_v13 = vld [vmem:[%s2177_s29 + $0x8] sm:$0xf]  ;;  %v2201_v14 = vld [vmem:[%s2177_s29 + $0xc] sm:$0xf]  ;;  %s204_s28 = sadd.s32 %s1991_s27, %s1990_s26 }
  0x17   : > { %v2194_v11 = vcombine.low %v2189_v9, %v222_v10  ;;  %v223_v15 = vld [vmem:[%s2177_s29 + $0x20] sm:$0xf]  ;;  %v224_v16 = vld [vmem:[%s2177_s29 + $0x24] sm:$0xf]  ;;  %v2213_v18 = vld [vmem:[%s2177_s29 + $0x10] sm:$0xf]  ;;  %v2217_v19 = vcombine.low %v2198_v13, %v2201_v14 }
  0x18   : > { %1791 = vmatmul.mubr.msk.bf16.vlgmr.msra.gmra.mxu0 %vm260_vm2, %v1599_v7  ;;  %v372_v17 = vshll.u32 %v1599_v7, 16  ;;  %v2221_v20 = vld [vmem:[%s2177_s29 + $0x14] sm:$0xf]  ;;  %v2223_v21 = vcombine.low %v223_v15, %v224_v16  ;;  %v370_v22 = vshrl.u32 %v1599_v7, 16  ;;  %v225_v26 = vld [vmem:[%s2177_s29 + $0x28] sm:$0xf]  ;;  %v2261_v44 = vcombine.low %v222_v10, %v223_v15 }
  0x19   : > { %1833 = vmatpush3.bf16.msra.mxu0 %v551_v8  ;;  %1794 = vmatprep.mubr.msk.bf16.mxu0 %vm2098_vm1, %v2097_v0  ;;  %v376_v24 = vshll.u32 %v2217_v19, 16  ;;  %v2228_v25 = vcombine.low %v2213_v18, %v2221_v20  ;;  %v226_v27 = vld [vmem:[%s2177_s29 + $0x2c] sm:$0xf]  ;;  %v519_v31 = vrot.slane %v1599_v7, 1  ;;  %v520_v35 = vrot.slane %v2217_v19, 1  ;;  %s1597_s12 = sshll.u32 %s204_s28, 2 }
  0x1a   : > { %1803 = vmatmul.mubr.msk.bf16.vlgmr.msra.gmra.mxu1 %vm260_vm2, %v2194_v11  ;;  %1876 = vmatprep.subr.bf16.mxu0 %v2097_v0  ;;  %v374_v23 = vrot.slane %v372_v17, 1  ;;  %v2239_v29 = vcombine.low %v225_v26, %v226_v27  ;;  %v390_v36 = vshll.u32 %v2194_v11, 16  ;;  %v380_v37 = vshrl.u32 %v2217_v19, 16  ;;  %s2692_s30 = scalar_lea.vmem %s2735_s3, %s1597_s12 }
  0x1b   : > { %1811 = vmatpush3.bf16.msra.mxu1 %v430_v12  ;;  %1806 = vmatprep.mubr.msk.bf16.mxu1 %vm2098_vm1, %v2097_v0  ;;  %v383_v30 = vshll.u32 %v2228_v25, 16  ;;  %v378_v34 = vrot.slane %v376_v24, 1  ;;  %v2254_v38 = vcombine.low %v224_v16, %v225_v26  ;;  %v387_v40 = vshrl.u32 %v2228_v25, 16 }
  0x1c   : > { %1854 = vmatprep.subr.bf16.mxu1 %v2097_v0  ;;  %v375_v33 = vor.u32 %v374_v23, %v370_v22  ;;  %v2258_v42 = vrot.slane %v380_v37, 2  ;;  %v521_v47 = vsel %vm518_vm4, %v519_v31, %v520_v35  ;;  %v392_v48 = vrot.slane %v390_v36, 1 }
  0x1d   : > { %v385_v41 = vrot.slane %v383_v30, 1  ;;  %v2264_v46 = vrot.slane %v383_v30, 3  ;;  %v2271_v49 = vrot.slane %v387_v40, 2  ;;  %v652_v50 = vrot.slane %v2261_v44, 1 }
  0x1e   : > { %v379_v45 = vsel %vm369_vm3, %v375_v33, %v378_v34  ;;  %v654_v51 = vrot.slane %v2254_v38, 1  ;;  %v795_v52 = vshrl.u32 %v2261_v44, 16  ;;  %v382_v53 = vor.u32 %v380_v37, %v378_v34  ;;  %v2316_v34 = vld [vmem:[%s2177_s29 + $0x30] ss:$0 sps:$4 sm:$0xff]  }
  0x1f   : > { %v389_v54 = vor.u32 %v387_v40, %v385_v41  ;;  %v522_v55 = vrot.slane %v2228_v25, 1  ;;  %v798_v56 = vshll.u32 %v2261_v44, 16  ;;  %v394_v57 = vshrl.u32 %v2194_v11, 16 }
  0x20   : > { %1795 = vmatmul.mubr.msk.bf16.gmra.mxu0 %vm260_vm2, %v2217_v19  ;;  %v397_v58 = vshll.u32 %v2223_v21, 16  ;;  %v2286_v59 = vsel %vm518_vm4, %v652_v50, %v654_v51  ;;  %v1634_v60 = vcombine.low %v226_v27, %v226_v27  ;;  %v524_v61 = vrot.slane %v2194_v11, 1 }
  0x21   : > { %1798 = vmatprep.mubr.msk.bf16.mxu0 %vm2098_vm1, %v2097_v0  ;;  %v797_v62 = vrot.slane %v795_v52, 1  ;;  %v800_v63 = vrot.slane %v798_v56, 2  ;;  %v804_v1 = vshrl.u32 %v2254_v38, 16  ;;  %v807_v3 = vshll.u32 %v2254_v38, 16 }
  0x22   : > { %1807 = vmatmul.mubr.msk.bf16.gmra.mxu1 %vm260_vm2, %v2223_v21  ;;  %v656_v2 = vrot.slane %v1634_v60, 1  ;;  %v813_v4 = vshrl.u32 %v1634_v60, 16  ;;  %v816_v5 = vshll.u32 %v1634_v60, 16  ;;  %v386_v7 = vsel %vm369_vm3, %v382_v53, %v385_v41 }
  0x23   : > { %1812 = vmatprep.mubr.msk.bf16.mxu1 %vm2098_vm1, %v2097_v0  ;;  %v393_v8 = vsel %vm369_vm3, %v389_v54, %v392_v48  ;;  %v2296_v10 = vcombine.low %v225_v26, %v225_v26  ;;  %v806_v12 = vrot.slane %v804_v1, 1  ;;  %v809_v16 = vrot.slane %v807_v3, 2 }
  0x24   : > { %v2299_v15 = vsel %vm518_vm4, %v654_v51, %v656_v2  ;;  %v815_v17 = vrot.slane %v813_v4, 1  ;;  %v818_v22 = vrot.slane %v816_v5, 2  ;;  %v523_v23 = vsel %vm518_vm4, %v520_v35, %v522_v55 }
  0x25   : > { %v2304_v27 = vor.u32 %v394_v57, %v392_v48  ;;  %v2308_v28 = vcombine.low %v2221_v20, %v2189_v9  ;;  %v2310_v30 = vor.u32 %v800_v63, %v797_v62  ;;  %v810_v26 = vor.u32 %v809_v16, %v806_v12 }
  0x26   : > { %v819_v31 = vor.u32 %v818_v22, %v815_v17  ;;  %v1055_v32 = vrot.slane %v2217_v19, 2  ;;  %v1056_v33 = vrot.slane %v2228_v25, 2  ;;  %v2322_v9 = vrot.slane %v397_v58, 1 }
  0x27   : > { %v401_v20 = vshrl.u32 %v2223_v21, 16  ;;  %v934_v35 = vrot.slane %v2308_v28, 2  ;;  %v936_v37 = vrot.slane %v2261_v44, 2  ;;  %v1060_v48 = vrot.slane %v2223_v21, 2 }
  0x28   : > { %1799 = vmatmul.mubr.msk.bf16.gmra.mxu0 %vm260_vm2, %v2228_v25  ;;  %v2334_v40 = vsel %vm767_vm5, %v810_v26, %v819_v31  ;;  %v2337_v41 = vsel %vm276_vm0, %v1055_v32, %v1056_v33  ;;  %v940_v51 = vrot.slane %v1634_v60, 2  ;;  %v1062_v53 = vrot.slane %v2239_v29, 2 }
  0x29   : > { %1834 = vmatprep.mubr.msk.bf16.mxu0 %vm2098_vm1, %v2097_v0  ;;  %v1064_v54 = vrot.slane %v2316_v34, 2  ;;  %v1181_v2 = vor.u32 %v2264_v46, %v2271_v49  ;;  %v1183_v3 = vrot.slane %v394_v57, 2  ;;  %v1184_v5 = vrot.slane %v390_v36, 3 }
  0x2a   : > { %1813 = vmatmul.mubr.msk.bf16.vlgmr.msra.gmra.mxu1 %vm260_vm2, %v379_v45  ;;  %v2345_v45 = vsel %vm276_vm0, %v934_v35, %v936_v37  ;;  %v2366_v60 = vsel %vm276_vm0, %v1060_v48, %v1062_v53  ;;  %v1187_v12 = vrot.slane %v401_v20, 2  ;;  %v1188_v16 = vrot.slane %v397_v58, 3 }
  0x2b   : > { %1855 = vmatpush3.bf16.msra.mxu1 %v679_v39  ;;  %1816 = vmatprep.mubr.msk.bf16.mxu1 %vm2098_vm1, %v2097_v0  ;;  %v2331_v39 = vsel %vm767_vm5, %v2310_v30, %v810_v26  ;;  %v2369_v1 = vsel %vm276_vm0, %v1062_v53, %v1064_v54  ;;  %v1322_v46 = vrot.slane %v2194_v11, 3  ;;  %v1195_v49 = vshll.u32 %v2239_v29, 16 }
  0x2c   : > { %1898 = vmatprep.subr.bf16.mxu1 %v2097_v0  ;;  %v1189_v17 = vor.u32 %v1188_v16, %v1187_v12  ;;  %v1324_v22 = vrot.slane %v2223_v21, 3  ;;  %v1201_v32 = vshrl.u32 %v2316_v34, 16  ;;  %v400_v53 = vsel %vm369_vm3, %v2304_v27, %v2322_v9 }
  0x2d   : > { %v1197_v31 = vrot.slane %v1195_v49, 3  ;;  %v405_v54 = vshll.u32 %v2296_v10, 16  ;;  %v2450_v12 = vcombine.low %v2184_v6, %v2198_v13 }
  0x2f   : > { %v931_v44 = vrot.slane %v2450_v12, 2 }
  0x30   : > { %1835 = vmatmul.mubr.msk.bf16.vlgmr.msra.gmra.mxu0 %vm260_vm2, %v521_v47  ;;  %v938_v47 = vrot.slane %v2254_v38, 2  ;;  %v1177_v38 = vrot.slane %v376_v24, 3  ;;  %v1320_v24 = vrot.slane %v2228_v25, 3  ;;  %v526_v25 = vrot.slane %v2223_v21, 1 }
  0x31   : > { %1877 = vmatpush3.bf16.msra.mxu0 %v842_v43  ;;  %1838 = vmatprep.mubr.msk.bf16.mxu0 %vm2098_vm1, %v2097_v0  ;;  %v1058_v43 = vrot.slane %v2194_v11, 2  ;;  %v528_v21 = vrot.slane %v2296_v10, 1  ;;  %v769_v11 = vshrl.u32 %v2450_v12, 16 }
  0x32   : > { %1817 = vmatmul.mubr.msk.bf16.gmra.mxu1 %vm260_vm2, %v386_v7  ;;  %1920 = vmatprep.subr.bf16.mxu0 %v2097_v0  ;;  %v2355_v56 = vsel %vm276_vm0, %v936_v37, %v938_v47  ;;  %v2361_v63 = vsel %vm276_vm0, %v938_v47, %v940_v51  ;;  %v1178_v4 = vor.u32 %v1177_v38, %v2258_v42  ;;  %v1319_v7 = vrot.slane %v2217_v19, 3 }
  0x33   : > { %1820 = vmatprep.mubr.msk.bf16.mxu1 %vm2098_vm1, %v2097_v0  ;;  %v2350_v52 = vsel %vm276_vm0, %v1056_v33, %v1058_v43  ;;  %v2358_v62 = vsel %vm276_vm0, %v1058_v43, %v1060_v48  ;;  %v1185_v42 = vor.u32 %v1184_v5, %v1183_v3  ;;  %v1192_v19 = vshrl.u32 %v2239_v29, 16 }
  0x34   : > { %v2387_v36 = vsel %vm1175_vm6, %v1178_v4, %v1181_v2  ;;  %v2393_v57 = vsel %vm1318_vm7, %v1319_v7, %v1320_v24  ;;  %v2396_v58 = vsel %vm1318_vm7, %v1320_v24, %v1322_v46  ;;  %v2409_v33 = vsel %vm1318_vm7, %v1322_v46, %v1324_v22 }
  0x35   : > { %v1194_v26 = vrot.slane %v1192_v19, 2  ;;  %v1204_v37 = vshll.u32 %v2316_v34, 16  ;;  %v525_v43 = vsel %vm518_vm4, %v522_v55, %v524_v61  ;;  %v1203_v48 = vrot.slane %v1201_v32, 2 }
  0x36   : > { %v1328_v4 = vrot.slane %v2316_v34, 3  ;;  %v407_v5 = vrot.slane %v405_v54, 1  ;;  %v527_v24 = vsel %vm518_vm4, %v524_v61, %v526_v25  ;;  %v2454_v34 = vcombine.low %v2201_v14, %v2213_v18 }
  0x37   : > { %v1198_v47 = vor.u32 %v1197_v31, %v1194_v26  ;;  %v1206_v51 = vrot.slane %v1204_v37, 3  ;;  %v772_v61 = vshll.u32 %v2450_v12, 16  ;;  %v647_v14 = vrot.slane %v2450_v12, 1  ;;  %v2051_v37 = vld [vmem:[%s2733_s1 + $0x30] sm:$0x3f]  }
  0x38   : > { %1839 = vmatmul.mubr.msk.bf16.gmra.mxu0 %vm260_vm2, %v523_v23  ;;  %v2402_v23 = vsel %vm1175_vm6, %v1181_v2, %v1185_v42  ;;  %v1326_v2 = vrot.slane %v2239_v29, 3  ;;  %v403_v29 = vor.u32 %v401_v20, %v2322_v9  ;;  %v777_v6 = vshrl.u32 %v2454_v34, 16  ;;  %v2049_v9 = vld [vmem:[%s2733_s1 + $0x28] sm:$0x3f]  }
  0x39   : > { %1842 = vmatprep.mubr.msk.bf16.mxu0 %vm2098_vm1, %v2097_v0  ;;  %v2422_v38 = vsel %vm1175_vm6, %v1189_v17, %v1198_v47  ;;  %v1207_v3 = vor.u32 %v1206_v51, %v1203_v48  ;;  %v780_v13 = vshll.u32 %v2454_v34, 16  ;;  %v648_v18 = vrot.slane %v2454_v34, 1 }
  0x3a   : > { %1821 = vmatmul.mubr.msk.bf16.gmra.mxu1 %vm260_vm2, %v393_v8  ;;  %v2406_v8 = vsel %vm1175_vm6, %v1185_v42, %v1189_v17  ;;  %v2430_v55 = vsel %vm1318_vm7, %v1324_v22, %v1326_v2  ;;  %v2443_v7 = vsel %vm1318_vm7, %v1326_v2, %v1328_v4  ;;  %v408_v16 = vsel %vm369_vm3, %v403_v29, %v407_v5 }
  0x3b   : > { %1824 = vmatprep.mubr.msk.bf16.mxu1 %vm2098_vm1, %v2097_v0  ;;  %v2434_v27 = vsel %vm1175_vm6, %v1198_v47, %v1207_v3  ;;  %v529_v10 = vsel %vm518_vm4, %v526_v25, %v528_v21  ;;  %v771_v20 = vrot.slane %v769_v11, 1  ;;  %v774_v46 = vrot.slane %v772_v61, 2 }
  0x3c   : > { %v779_v42 = vrot.slane %v777_v6, 1  ;;  %v782_v19 = vrot.slane %v780_v13, 2  ;;  %v649_v49 = vsel %vm518_vm4, %v647_v14, %v648_v18  ;;  %v963_v17 = vsel %vm276_vm0, %v2049_v9, 0 }
  0x3d   : > { %v775_v22 = vor.u32 %v774_v46, %v771_v20  ;;  %v786_v31 = vshrl.u32 %v2308_v28, 16  ;;  %v789_v32 = vshll.u32 %v2308_v28, 16 }
  0x3e   : > { %v783_v26 = vor.u32 %v782_v19, %v779_v42 }
  0x3f   : > { %v788_v48 = vrot.slane %v786_v31, 1  ;;  %v791_v51 = vrot.slane %v789_v32, 2 }
  0x40   : > { %1843 = vmatmul.mubr.msk.bf16.gmra.mxu0 %vm260_vm2, %v525_v43  ;;  %v650_v43 = vrot.slane %v2308_v28, 1  ;;  %v784_v47 = vsel %vm767_vm5, %v775_v22, %v783_v26 }
  0x41   : > { %1846 = vmatprep.mubr.msk.bf16.mxu0 %vm2098_vm1, %v2097_v0  ;;  %v792_v2 = vor.u32 %v791_v51, %v788_v48 }
  0x42   : > { %1825 = vmatmul.mubr.msk.bf16.gmra.mxu1 %vm260_vm2, %v400_v53  ;;  %v1087_v53 = vsel %vm276_vm0, %v2051_v37, 0  ;;  %v651_v54 = vsel %vm518_vm4, %v648_v18, %v650_v43  ;;  %v653_v25 = vsel %vm518_vm4, %v650_v43, %v652_v50  ;;  %v932_v50 = vrot.slane %v2454_v34, 2 }
  0x43   : > { %1828 = vmatprep.mubr.msk.bf16.mxu1 %vm2098_vm1, %v2097_v0  ;;  %v793_v3 = vsel %vm767_vm5, %v783_v26, %v792_v2  ;;  %v802_v4 = vsel %vm767_vm5, %v792_v2, %v2310_v30 }
  0x44   : > { %v933_v30 = vsel %vm276_vm0, %v931_v44, %v932_v50 }
  0x48   : > { %1847 = vmatmul.mubr.msk.bf16.gmra.mxu0 %vm260_vm2, %v527_v24 }
  0x49   : > { %1850 = vmatprep.mubr.msk.bf16.mxu0 %vm2098_vm1, %v2097_v0 }
  0x4a   : > { %1829 = vmatmul.mubr.msk.bf16.gmra.mxu1 %vm260_vm2, %v408_v16 }
  0x4b   : > { %1856 = vmatprep.mubr.msk.bf16.mxu1 %vm2098_vm1, %v2097_v0 }
  0x50   : > { %1851 = vmatmul.mubr.msk.bf16.gmra.mxu0 %vm260_vm2, %v529_v10 }
  0x51   : > { %1878 = vmatprep.mubr.msk.bf16.mxu0 %vm2098_vm1, %v2097_v0 }
  0x52   : > { %1857 = vmatmul.mubr.msk.bf16.vlgmr.msra.gmra.mxu1 %vm260_vm2, %v649_v49 }
  0x53   : > { %1899 = vmatpush3.bf16.msra.mxu1 %v963_v17  ;;  %1860 = vmatprep.mubr.msk.bf16.mxu1 %vm2098_vm1, %v2097_v0 }
  0x54   : > { %1942 = vmatprep.subr.bf16.mxu1 %v2097_v0 }
  0x58   : > { %1879 = vmatmul.mubr.msk.bf16.vlgmr.msra.gmra.mxu0 %vm260_vm2, %v784_v47 }
  0x59   : > { %1921 = vmatpush3.bf16.msra.mxu0 %v1087_v53  ;;  %1882 = vmatprep.mubr.msk.bf16.mxu0 %vm2098_vm1, %v2097_v0 }
  0x5a   : > { %1861 = vmatmul.mubr.msk.bf16.gmra.mxu1 %vm260_vm2, %v651_v54  ;;  %1964 = vmatprep.subr.bf16.mxu0 %v2097_v0 }
  0x5b   : > { %1864 = vmatprep.mubr.msk.bf16.mxu1 %vm2098_vm1, %v2097_v0 }
  0x60   : > { %1883 = vmatmul.mubr.msk.bf16.gmra.mxu0 %vm260_vm2, %v793_v3 }
  0x61   : > { %1886 = vmatprep.mubr.msk.bf16.mxu0 %vm2098_vm1, %v2097_v0 }
  0x62   : > { %1865 = vmatmul.mubr.msk.bf16.gmra.mxu1 %vm260_vm2, %v653_v25 }
  0x63   : > { %1868 = vmatprep.mubr.msk.bf16.mxu1 %vm2098_vm1, %v2097_v0 }
  0x68   : > { %1887 = vmatmul.mubr.msk.bf16.gmra.mxu0 %vm260_vm2, %v802_v4 }
  0x69   : > { %1890 = vmatprep.mubr.msk.bf16.mxu0 %vm2098_vm1, %v2097_v0 }
  0x6a   : > { %1869 = vmatmul.mubr.msk.bf16.gmra.mxu1 %vm260_vm2, %v2286_v59  ;;  %v2054_v59 = vld [vmem:[%s2733_s1 + $0x38] sm:$0x3f]  }
  0x6b   : > { %1872 = vmatprep.mubr.msk.bf16.mxu1 %vm2098_vm1, %v2097_v0 }
  0x70   : > { %1891 = vmatmul.mubr.msk.bf16.gmra.mxu0 %vm260_vm2, %v2331_v39  ;;  %v1230_v39 = vsel %vm276_vm0, %v2054_v59, 0 }
  0x71   : > { %1894 = vmatprep.mubr.msk.bf16.mxu0 %vm2098_vm1, %v2097_v0 }
  0x72   : > { %1873 = vmatmul.mubr.msk.bf16.gmra.mxu1 %vm260_vm2, %v2299_v15  ;;  %v2055_v15 = vld [vmem:[%s2733_s1 + $0x40] sm:$0x3f]  }
  0x73   : > { %1900 = vmatprep.mubr.msk.bf16.mxu1 %vm2098_vm1, %v2097_v0  ;;  %v1351_v29 = vsel %vm276_vm0, %v2055_v15, 0 }
  0x78   : > { %1895 = vmatmul.mubr.msk.bf16.gmra.mxu0 %vm260_vm2, %v2334_v40  ;;  %v935_v40 = vsel %vm276_vm0, %v932_v50, %v934_v35 }
  0x79   : > { %1922 = vmatprep.mubr.msk.bf16.mxu0 %vm2098_vm1, %v2097_v0 }
  0x7a   : > { %1901 = vmatmul.mubr.msk.bf16.vlgmr.msra.gmra.mxu1 %vm260_vm2, %v933_v30 }
  0x7b   : > { %1943 = vmatpush3.bf16.msra.mxu1 %v1230_v39  ;;  %1904 = vmatprep.mubr.msk.bf16.mxu1 %vm2098_vm1, %v2097_v0 }
  0x80   : > { %1923 = vmatmul.mubr.msk.bf16.vlgmr.msra.gmra.mxu0 %vm260_vm2, %v2337_v41 }
  0x81   : > { %1965 = vmatpush3.bf16.msra.mxu0 %v1351_v29  ;;  %1926 = vmatprep.mubr.msk.bf16.mxu0 %vm2098_vm1, %v2097_v0 }
  0x82   : > { %1905 = vmatmul.mubr.msk.bf16.gmra.mxu1 %vm260_vm2, %v935_v40 }
  0x83   : > { %1908 = vmatprep.mubr.msk.bf16.mxu1 %vm2098_vm1, %v2097_v0 }
  0x88   : > { %1927 = vmatmul.mubr.msk.bf16.gmra.mxu0 %vm260_vm2, %v2350_v52 }
  0x89   : > { %1930 = vmatprep.mubr.msk.bf16.mxu0 %vm2098_vm1, %v2097_v0 }
  0x8a   : > { %1909 = vmatmul.mubr.msk.bf16.gmra.mxu1 %vm260_vm2, %v2345_v45 }
  0x8b   : > { %1912 = vmatprep.mubr.msk.bf16.mxu1 %vm2098_vm1, %v2097_v0 }
  0x90   : > { %1931 = vmatmul.mubr.msk.bf16.gmra.mxu0 %vm260_vm2, %v2358_v62 }
  0x91   : > { %1934 = vmatprep.mubr.msk.bf16.mxu0 %vm2098_vm1, %v2097_v0 }
  0x92   : > { %1913 = vmatmul.mubr.msk.bf16.gmra.mxu1 %vm260_vm2, %v2355_v56 }
  0x93   : > { %1916 = vmatprep.mubr.msk.bf16.mxu1 %vm2098_vm1, %v2097_v0 }
  0x98   : > { %1935 = vmatmul.mubr.msk.bf16.gmra.mxu0 %vm260_vm2, %v2366_v60 }
  0x99   : > { %1938 = vmatprep.mubr.msk.bf16.mxu0 %vm2098_vm1, %v2097_v0 }
  0x9a   : > { %1917 = vmatmul.mubr.msk.bf16.gmra.mxu1 %vm260_vm2, %v2361_v63 }
  0x9b   : > { %1944 = vmatprep.mubr.msk.bf16.mxu1 %vm2098_vm1, %v2097_v0 }
  0xa0   : > { %1939 = vmatmul.mubr.msk.bf16.gmra.mxu0 %vm260_vm2, %v2369_v1 }
  0xa1   : > { %1966 = vmatprep.mubr.msk.bf16.mxu0 %vm2098_vm1, %v2097_v0 }
  0xa2   : > { %1945 = vmatmul.mubr.msk.bf16.vlgmr.msra.gmra.mxu1 %vm260_vm2, %v2387_v36 }
  0xa3   : > { %1948 = vmatprep.mubr.msk.bf16.mxu1 %vm2098_vm1, %v2097_v0 }
  0xa8   : > { %1967 = vmatmul.mubr.msk.bf16.vlgmr.msra.gmra.mxu0 %vm260_vm2, %v2393_v57 }
  0xa9   : > { %1970 = vmatprep.mubr.msk.bf16.mxu0 %vm2098_vm1, %v2097_v0 }
  0xaa   : > { %1949 = vmatmul.mubr.msk.bf16.gmra.mxu1 %vm260_vm2, %v2402_v23 }
  0xab   : > { %1952 = vmatprep.mubr.msk.bf16.mxu1 %vm2098_vm1, %v2097_v0 }
  0xb0   : > { %1971 = vmatmul.mubr.msk.bf16.gmra.mxu0 %vm260_vm2, %v2396_v58  ;;  %v2623_v58 = vld [vmem:[%s2734_s2] ss:$0 sm:$0xff] }
  0xb1   : > { %1974 = vmatprep.mubr.msk.bf16.mxu0 %vm2098_vm1, %v2097_v0 }
  0xb2   : > { %1953 = vmatmul.mubr.msk.bf16.gmra.mxu1 %vm260_vm2, %v2406_v8 }
  0xb3   : > { %1956 = vmatprep.mubr.msk.bf16.mxu1 %vm2098_vm1, %v2097_v0 }
  0xb8   : > { %1975 = vmatmul.mubr.msk.bf16.gmra.mxu0 %vm260_vm2, %v2409_v33 }
  0xb9   : > { %1978 = vmatprep.mubr.msk.bf16.mxu0 %vm2098_vm1, %v2097_v0 }
  0xba   : > { %1957 = vmatmul.mubr.msk.bf16.gmra.mxu1 %vm260_vm2, %v2422_v38 }
  0xbb   : > { %1960 = vmatprep.mubr.msk.bf16.mxu1 %vm2098_vm1, %v2097_v0 }
  0xc0   : > { %1979 = vmatmul.mubr.msk.bf16.gmra.mxu0 %vm260_vm2, %v2430_v55 }
  0xc1   : > { %1982 = vmatprep.mubr.msk.bf16.mxu0 %vm2098_vm1, %v2097_v0 }
  0xc2   : > { %1961 = vmatmul.mubr.msk.bf16.gmra.mxu1 %vm260_vm2, %v2434_v27 }
  0xc8   : > { %1983 = vmatmul.mubr.msk.bf16.gmra.mxu0 %vm260_vm2, %v2443_v7 }
  0xd8   : > { %v314_v28 = vpop.f32.mrf.mxu0 }
  0xd9   : > { %v353_v55 = vadd.f32 %v2623_v58, %v314_v28 }
  0xda   : > { %v338_v35 = vpop.f32.mrf.mxu1  ;;  %v1792_v41 = vpop.f32.mrf.mxu0 }
  0xdb   : > { %v359_v59 = vadd.f32 %v2623_v58, %v338_v35 }
  0xdc   : > { %v1804_v45 = vpop.f32.mrf.mxu1  ;;  %v317_v52 = vpop.f32.mrf.mxu0 }
  0xdd   : > { %v354_v34 = vadd.f32 %v2623_v58, %v317_v52 }
  0xde   : > { %v341_v56 = vpop.f32.mrf.mxu1  ;;  %v1793_v62 = vpop.f32.mrf.mxu0 }
  0xdf   : > { %v360_v41 = vadd.f32 %v2623_v58, %v341_v56 }
  0xe0   : > { %v1805_v63 = vpop.f32.mrf.mxu1  ;;  %v322_v60 = vpop.f32.mrf.mxu0 }
  0xe1   : > { %v355_v13 = vadd.f32 %v2623_v58, %v322_v60 }
  0xe2   : > { %v2618_v1 = vpop.f32.mrf.mxu1  ;;  %v1796_v36 = vpop.f32.mrf.mxu0 }
  0xe4   : > { %v1808_v57 = vpop.f32.mrf.mxu1  ;;  %v325_v0 = vpop.f32.mrf.mxu0 }
  0xe5   : > { %v356_v42 = vadd.f32 %v2623_v58, %v325_v0  ;;  %v361_v57 = vadd.f32 %v2623_v58, %v2618_v1 }
  0xe6   : > { %v2625_v23 = vpop.f32.mrf.mxu1  ;;  %v1797_v8 = vpop.f32.mrf.mxu0 }
  0xe8   : > { %v1809_v33 = vpop.f32.mrf.mxu1  ;;  %v330_v38 = vpop.f32.mrf.mxu0 }
  0xe9   : > { %v357_v32 = vadd.f32 %v2623_v58, %v330_v38 }
  0xea   : > { %v466_v27 = vpop.f32.mrf.mxu1  ;;  %v1800_v5 = vpop.f32.mrf.mxu0 }
  0xeb   : > { %v505_v7 = vadd.f32 %v466_v27, %v353_v55  ;;  %v362_v27 = vadd.f32 %v2623_v58, %v2625_v23 }
  0xec   : > { %v1814_v24 = vpop.f32.mrf.mxu1  ;;  %v333_v12 = vpop.f32.mrf.mxu0 }
  0xed   : > { %v358_v54 = vadd.f32 %v2623_v58, %v333_v12 }
  0xee   : > { %v469_v16 = vpop.f32.mrf.mxu1  ;;  %v1801_v21 = vpop.f32.mrf.mxu0 }
  0xef   : > { %v506_v11 = vadd.f32 %v469_v16, %v354_v34 }
  0xf0   : > { %v1815_v61 = vpop.f32.mrf.mxu1  ;;  %v587_v6 = vpop.f32.mrf.mxu0 }
  0xf1   : > { %v626_v14 = vadd.f32 %v587_v6, %v505_v7 }
  0xf2   : > { %v474_v18 = vpop.f32.mrf.mxu1  ;;  %v1836_v10 = vpop.f32.mrf.mxu0 }
  0xf3   : > { %v507_v9 = vadd.f32 %v474_v18, %v355_v13 }
  0xf4   : > { %v1818_v20 = vpop.f32.mrf.mxu1  ;;  %v590_v46 = vpop.f32.mrf.mxu0 }
  0xf5   : > { %v627_v19 = vadd.f32 %v590_v46, %v506_v11 }
  0xf6   : > { %v477_v49 = vpop.f32.mrf.mxu1  ;;  %v1837_v17 = vpop.f32.mrf.mxu0 }
  0xf7   : > { %v508_v22 = vadd.f32 %v477_v49, %v356_v42 }
  0xf8   : > { %v1819_v26 = vpop.f32.mrf.mxu1  ;;  %v595_v31 = vpop.f32.mrf.mxu0 }
  0xf9   : > { %v628_v37 = vadd.f32 %v595_v31, %v507_v9 }
  0xfa   : > { %v482_v43 = vpop.f32.mrf.mxu1  ;;  %v1840_v47 = vpop.f32.mrf.mxu0 }
  0xfb   : > { %v509_v48 = vadd.f32 %v482_v43, %v357_v32 }
  0xfc   : > { %v1822_v51 = vpop.f32.mrf.mxu1  ;;  %v598_v53 = vpop.f32.mrf.mxu0 }
  0xfd   : > { %v629_v2 = vadd.f32 %v598_v53, %v508_v22 }
  0xfe   : > { %v485_v3 = vpop.f32.mrf.mxu1  ;;  %v1841_v25 = vpop.f32.mrf.mxu0 }
  0xff   : > { %v510_v4 = vadd.f32 %v485_v3, %v358_v54 }
 0x100   : > { %v1823_v44 = vpop.f32.mrf.mxu1  ;;  %v603_v50 = vpop.f32.mrf.mxu0 }
 0x101   : > { %v630_v30 = vadd.f32 %v603_v50, %v509_v48 }
 0x102   : > { %v490_v39 = vpop.f32.mrf.mxu1  ;;  %v1844_v15 = vpop.f32.mrf.mxu0 }
 0x103   : > { %v511_v29 = vadd.f32 %v490_v39, %v359_v59 }
 0x104   : > { %v1826_v40 = vpop.f32.mrf.mxu1  ;;  %v606_v28 = vpop.f32.mrf.mxu0 }
 0x105   : > { %v631_v45 = vadd.f32 %v606_v28, %v510_v4 }
 0x106   : > { %v493_v52 = vpop.f32.mrf.mxu1  ;;  %v1845_v62 = vpop.f32.mrf.mxu0 }
 0x107   : > { %v512_v63 = vadd.f32 %v493_v52, %v360_v41 }
 0x108   : > { %v1827_v60 = vpop.f32.mrf.mxu1  ;;  %v611_v36 = vpop.f32.mrf.mxu0 }
 0x109   : > { %v632_v0 = vadd.f32 %v611_v36, %v511_v29 }
 0x10a   : > { %v498_v8 = vpop.f32.mrf.mxu1  ;;  %v1848_v35 = vpop.f32.mrf.mxu0 }
 0x10b   : > { %v513_v33 = vadd.f32 %v498_v8, %v361_v57 }
 0x10c   : > { %v1830_v38 = vpop.f32.mrf.mxu1  ;;  %v614_v55 = vpop.f32.mrf.mxu0 }
 0x10d   : > { %v633_v5 = vadd.f32 %v614_v55, %v512_v63 }
 0x10e   : > { %v501_v56 = vpop.f32.mrf.mxu1  ;;  %v1849_v7 = vpop.f32.mrf.mxu0 }
 0x10f   : > { %v514_v24 = vadd.f32 %v501_v56, %v362_v27 }
 0x110   : > { %v1831_v12 = vpop.f32.mrf.mxu1  ;;  %v619_v34 = vpop.f32.mrf.mxu0 }
 0x111   : > { %v634_v16 = vadd.f32 %v619_v34, %v513_v33 }
 0x112   : > { %v715_v21 = vpop.f32.mrf.mxu1  ;;  %v1852_v11 = vpop.f32.mrf.mxu0 }
 0x113   : > { %v754_v61 = vadd.f32 %v715_v21, %v626_v14 }
 0x114   : > { %v1858_v1 = vpop.f32.mrf.mxu1  ;;  %v622_v6 = vpop.f32.mrf.mxu0 }
 0x115   : > { %v635_v13 = vadd.f32 %v622_v6, %v514_v24 }
 0x116   : > { %v718_v18 = vpop.f32.mrf.mxu1  ;;  %v1853_v10 = vpop.f32.mrf.mxu0 }
 0x117   : > { %v755_v9 = vadd.f32 %v718_v18, %v627_v19 }
 0x118   : > { %v1859_v20 = vpop.f32.mrf.mxu1  ;;  %v878_v46 = vpop.f32.mrf.mxu0 }
 0x119   : > { %v2639_v42 = vadd.f32 %v878_v46, %v754_v61 }
 0x11a   : > { %v723_v58 = vpop.f32.mrf.mxu1  ;;  %v1880_v23 = vpop.f32.mrf.mxu0 }
 0x11b   : > { %v756_v49 = vadd.f32 %v723_v58, %v628_v37 }
 0x11c   : > { %v1862_v17 = vpop.f32.mrf.mxu1  ;;  %v881_v22 = vpop.f32.mrf.mxu0 }
 0x11d   : > { %v2641_v26 = vadd.f32 %v881_v22, %v755_v9 }
 0x11e   : > { %v726_v31 = vpop.f32.mrf.mxu1  ;;  %v1881_v32 = vpop.f32.mrf.mxu0 }
 0x11f   : > { %v757_v14 = vadd.f32 %v726_v31, %v629_v2 }
 0x120   : > { %v1863_v43 = vpop.f32.mrf.mxu1  ;;  %v886_v47 = vpop.f32.mrf.mxu0 }
 0x121   : > { %v2643_v48 = vadd.f32 %v886_v47, %v756_v49 }
 0x122   : > { %v731_v51 = vpop.f32.mrf.mxu1  ;;  %v1884_v19 = vpop.f32.mrf.mxu0 }
 0x123   : > { %v758_v53 = vadd.f32 %v731_v51, %v630_v30 }
 0x124   : > { %v1866_v54 = vpop.f32.mrf.mxu1  ;;  %v889_v3 = vpop.f32.mrf.mxu0 }
 0x125   : > { %v2645_v25 = vadd.f32 %v889_v3, %v757_v14 }
 0x126   : > { %v734_v4 = vpop.f32.mrf.mxu1  ;;  %v1885_v37 = vpop.f32.mrf.mxu0 }
 0x127   : > { %v759_v44 = vadd.f32 %v734_v4, %v631_v45 }
 0x128   : > { %v1867_v50 = vpop.f32.mrf.mxu1  ;;  %v894_v59 = vpop.f32.mrf.mxu0 }
 0x129   : > { %v2647_v39 = vadd.f32 %v894_v59, %v758_v53 }
 0x12a   : > { %v739_v15 = vpop.f32.mrf.mxu1  ;;  %v1888_v2 = vpop.f32.mrf.mxu0 }
 0x12b   : > { %v760_v29 = vadd.f32 %v739_v15, %v632_v0 }
 0x12c   : > { %v1870_v40 = vpop.f32.mrf.mxu1  ;;  %v897_v28 = vpop.f32.mrf.mxu0 }
 0x12d   : > { %v2649_v41 = vadd.f32 %v897_v28, %v759_v44 }
 0x12e   : > { %v742_v52 = vpop.f32.mrf.mxu1  ;;  %v1889_v30 = vpop.f32.mrf.mxu0 }
 0x12f   : > { %v761_v62 = vadd.f32 %v742_v52, %v633_v5 }
 0x130   : > { %v1871_v63 = vpop.f32.mrf.mxu1  ;;  %v902_v60 = vpop.f32.mrf.mxu0 }
 0x131   : > { %v2651_v36 = vadd.f32 %v902_v60, %v760_v29 }
 0x132   : > { %v747_v57 = vpop.f32.mrf.mxu1  ;;  %v1892_v45 = vpop.f32.mrf.mxu0 }
 0x133   : > { %v762_v8 = vadd.f32 %v747_v57, %v634_v16 }
 0x134   : > { %v1874_v35 = vpop.f32.mrf.mxu1  ;;  %v905_v33 = vpop.f32.mrf.mxu0 }
 0x135   : > { %v2653_v38 = vadd.f32 %v905_v33, %v761_v62 }
 0x136   : > { %v750_v55 = vpop.f32.mrf.mxu1  ;;  %v1893_v0 = vpop.f32.mrf.mxu0 }
 0x137   : > { %v763_v27 = vadd.f32 %v750_v55, %v635_v13 }
 0x138   : > { %v1875_v56 = vpop.f32.mrf.mxu1  ;;  %v910_v7 = vpop.f32.mrf.mxu0 }
 0x139   : > { %v2655_v24 = vadd.f32 %v910_v7, %v762_v8 }
 0x13a   : > { %v999_v12 = vpop.f32.mrf.mxu1  ;;  %v1896_v5 = vpop.f32.mrf.mxu0 }
 0x13b   : > { %v1038_v57 = vadd.f32 %v999_v12, %v2639_v42 }
 0x13c   : > { %v1902_v34 = vpop.f32.mrf.mxu1  ;;  %v913_v21 = vpop.f32.mrf.mxu0 }
 0x13d   : > { %v2657_v11 = vadd.f32 %v913_v21, %v763_v27 }
 0x13e   : > { %v1002_v61 = vpop.f32.mrf.mxu1  ;;  %v1897_v1 = vpop.f32.mrf.mxu0 }
 0x13f   : > { %v1039_v35 = vadd.f32 %v1002_v61, %v2641_v26 }
 0x140   : > { %v1903_v16 = vpop.f32.mrf.mxu1  ;;  %v1123_v6 = vpop.f32.mrf.mxu0 }
 0x141   : > { %v1162_v33 = vadd.f32 %v1123_v6, %v1038_v57 }
 0x142   : > { %v1007_v18 = vpop.f32.mrf.mxu1  ;;  %v1924_v10 = vpop.f32.mrf.mxu0 }
 0x143   : > { %v1040_v42 = vadd.f32 %v1007_v18, %v2643_v48 }
 0x144   : > { %v1906_v9 = vpop.f32.mrf.mxu1  ;;  %v1126_v20 = vpop.f32.mrf.mxu0 }
 0x145   : > { %v1163_v27 = vadd.f32 %v1126_v20, %v1039_v35 }
 0x146   : > { %v1010_v46 = vpop.f32.mrf.mxu1  ;;  %v1925_v13 = vpop.f32.mrf.mxu0 }
 0x147   : > { %v1041_v26 = vadd.f32 %v1010_v46, %v2645_v25 }
 0x148   : > { %v1907_v58 = vpop.f32.mrf.mxu1  ;;  %v1131_v23 = vpop.f32.mrf.mxu0 }
 0x149   : > { %v1164_v61 = vadd.f32 %v1131_v23, %v1040_v42 }
 0x14a   : > { %v2659_v49 = vpop.f32.mrf.mxu1  ;;  %v1928_v17 = vpop.f32.mrf.mxu0 }
 0x14b   : > { %v1042_v23 = vadd.f32 %v2659_v49, %v2647_v39 }
 0x14c   : > { %v1910_v22 = vpop.f32.mrf.mxu1  ;;  %v1134_v31 = vpop.f32.mrf.mxu0 }
 0x14d   : > { %v1165_v17 = vadd.f32 %v1134_v31, %v1041_v26 }
 0x14e   : > { %v2661_v32 = vpop.f32.mrf.mxu1  ;;  %v1929_v14 = vpop.f32.mrf.mxu0 }
 0x150   : > { %v1911_v43 = vpop.f32.mrf.mxu1  ;;  %v2663_v47 = vpop.f32.mrf.mxu0 }
 0x151   : > { %v1166_v31 = vadd.f32 %v2663_v47, %v1042_v23 }
 0x152   : > { %v2665_v51 = vpop.f32.mrf.mxu1  ;;  %v1932_v19 = vpop.f32.mrf.mxu0 }
 0x154   : > { %v1914_v53 = vpop.f32.mrf.mxu1  ;;  %v2667_v54 = vpop.f32.mrf.mxu0 }
 0x156   : > { %v2669_v3 = vpop.f32.mrf.mxu1  ;;  %v1933_v4 = vpop.f32.mrf.mxu0 }
 0x158   : > { %v1915_v37 = vpop.f32.mrf.mxu1  ;;  %v2671_v44 = vpop.f32.mrf.mxu0 }
 0x15a   : > { %v2673_v50 = vpop.f32.mrf.mxu1  ;;  %v1936_v59 = vpop.f32.mrf.mxu0 }
 0x15b   : > { %v1043_v59 = vadd.f32 %v2661_v32, %v2649_v41  ;;  %v1044_v41 = vadd.f32 %v2665_v51, %v2651_v36 }
 0x15c   : > { %v1918_v15 = vpop.f32.mrf.mxu1  ;;  %v2675_v2 = vpop.f32.mrf.mxu0 }
 0x15e   : > { %v2677_v29 = vpop.f32.mrf.mxu1  ;;  %v1937_v40 = vpop.f32.mrf.mxu0 }
 0x15f   : > { %v1047_v26 = vadd.f32 %v2677_v29, %v2657_v11 }
 0x160   : > { %v1919_v28 = vpop.f32.mrf.mxu1  ;;  %v2679_v52 = vpop.f32.mrf.mxu0 }
 0x162   : > { %v1266_v30 = vpop.f32.mrf.mxu1  ;;  %v1940_v62 = vpop.f32.mrf.mxu0 }
 0x163   : > { %v1305_v56 = vadd.f32 %v1266_v30, %v1162_v33  ;;  %v1167_v62 = vadd.f32 %v2667_v54, %v1043_v59  ;;  %v1168_v54 = vadd.f32 %v2671_v44, %v1044_v41 }
 0x164   : > { %v1946_v63 = vpop.f32.mrf.mxu1  ;;  %v2681_v60 = vpop.f32.mrf.mxu0 }
 0x166   : > { %v1269_v45 = vpop.f32.mrf.mxu1  ;;  %v1941_v8 = vpop.f32.mrf.mxu0 }
 0x167   : > { %v1306_v34 = vadd.f32 %v1269_v45, %v1163_v27 }
 0x168   : > { %v1947_v55 = vpop.f32.mrf.mxu1  ;;  %v1387_v0 = vpop.f32.mrf.mxu0 }
 0x169   : > { %v1426_v21 = vadd.f32 %v1387_v0, %v1305_v56  ;;  %v1045_v0 = vadd.f32 %v2669_v3, %v2653_v38  ;;  %v1046_v38 = vadd.f32 %v2673_v50, %v2655_v24 }
 0x16a   : > { %v1274_v7 = vpop.f32.mrf.mxu1  ;;  %v1968_v5 = vpop.f32.mrf.mxu0 }
 0x16b   : > { %v1436_v6 = vmax.f32 %v1426_v21, 0.0  ;;  %v1307_v22 = vadd.f32 %v1274_v7, %v1164_v61 }
 0x16c   : > { %v1950_v1 = vpop.f32.mrf.mxu1  ;;  %v1390_v16 = vpop.f32.mrf.mxu0 }
 0x16d   : > { %v1427_v12 = vadd.f32 %v1390_v16, %v1306_v34  ;;  %v1169_v34 = vadd.f32 %v2675_v2, %v1045_v0  ;;  %v1170_v2 = vadd.f32 %v2679_v52, %v1046_v38 }
 0x16e   : > { %v1277_v10 = vpop.f32.mrf.mxu1  ;;  %v1969_v9 = vpop.f32.mrf.mxu0 }
 0x16f   : > { %v1437_v13 = vmax.f32 %v1427_v12, 0.0  ;;  %v1308_v43 = vadd.f32 %v1277_v10, %v1165_v17 }
 0x170   : > { %v1951_v20 = vpop.f32.mrf.mxu1  ;;  %v1395_v58 = vpop.f32.mrf.mxu0 }
 0x171   : > { %v1708_v48 = vpack.c.bf16 %v1437_v13, %v1436_v6  ;;  %v1428_v19 = vadd.f32 %v1395_v58, %v1307_v22  ;;  %v1171_v58 = vadd.f32 %v2681_v60, %v1047_v26 }
 0x172   : > { %v1282_v18 = vpop.f32.mrf.mxu1  ;;  %v1972_v14 = vpop.f32.mrf.mxu0 }
 0x173   : > { %1709 = vst [vmem:[%s2692_s30] sm:$0xff] %v1708_v48   ;;  %v1438_v15 = vmax.f32 %v1428_v19, 0.0  ;;  %v1309_v63 = vadd.f32 %v1282_v18, %v1166_v31 }
 0x174   : > { %v1954_v25 = vpop.f32.mrf.mxu1  ;;  %v1398_v46 = vpop.f32.mrf.mxu0 }
 0x175   : > { %v1429_v53 = vadd.f32 %v1398_v46, %v1308_v43 }
 0x176   : > { %v1285_v4 = vpop.f32.mrf.mxu1  ;;  %v1973_v37 = vpop.f32.mrf.mxu0 }
 0x177   : > { %v1439_v40 = vmax.f32 %v1429_v53, 0.0  ;;  %v1310_v39 = vadd.f32 %v1285_v4, %v1167_v62 }
 0x178   : > { %v1955_v28 = vpop.f32.mrf.mxu1  ;;  %v1403_v30 = vpop.f32.mrf.mxu0 }
 0x179   : > { %v1713_v57 = vpack.c.bf16 %v1439_v40, %v1438_v15  ;;  %v1430_v49 = vadd.f32 %v1403_v30, %v1309_v63 }
 0x17a   : > { %v1290_v45 = vpop.f32.mrf.mxu1  ;;  %v1976_v8 = vpop.f32.mrf.mxu0 }
 0x17b   : > { %1730 = vst [vmem:[%s2692_s30 + $0x8] sm:$0xff] %v1713_v57   ;;  %v1440_v27 = vmax.f32 %v1430_v49, 0.0  ;;  %v1311_v21 = vadd.f32 %v1290_v45, %v1168_v54 }
 0x17c   : > { %v1958_v35 = vpop.f32.mrf.mxu1  ;;  %v1406_v33 = vpop.f32.mrf.mxu0 }
 0x17d   : > { %v1431_v32 = vadd.f32 %v1406_v33, %v1310_v39 }
 0x17e   : > { %v1293_v47 = vpop.f32.mrf.mxu1  ;;  %v1977_v55 = vpop.f32.mrf.mxu0 }
 0x17f   : > { %v1441_v56 = vmax.f32 %v1431_v32, 0.0  ;;  %v1312_v36 = vadd.f32 %v1293_v47, %v1169_v34 }
 0x180   : > { %v1959_v7 = vpop.f32.mrf.mxu1  ;;  %v1411_v5 = vpop.f32.mrf.mxu0 }
 0x181   : > { %v1718_v1 = vpack.c.bf16 %v1441_v56, %v1440_v27  ;;  %v1432_v51 = vadd.f32 %v1411_v5, %v1311_v21 }
 0x182   : > { %v1298_v16 = vpop.f32.mrf.mxu1  ;;  %v1980_v42 = vpop.f32.mrf.mxu0 }
 0x183   : > { %1731 = vst [vmem:[%s2692_s30 + $0x10] sm:$0xff] %v1718_v1   ;;  %v1442_v61 = vmax.f32 %v1432_v51, 0.0  ;;  %v1313_v17 = vadd.f32 %v1298_v16, %v1170_v2 }
 0x184   : > { %v1962_v12 = vpop.f32.mrf.mxu1  ;;  %v1414_v10 = vpop.f32.mrf.mxu0 }
 0x185   : > { %v1433_v3 = vadd.f32 %v1414_v10, %v1312_v36 }
 0x186   : > { %v1301_v44 = vpop.f32.mrf.mxu1  ;;  %v1981_v9 = vpop.f32.mrf.mxu0 }
 0x187   : > { %v1443_v6 = vmax.f32 %v1433_v3, 0.0  ;;  %v1314_v18 = vadd.f32 %v1301_v44, %v1171_v58 }
 0x188   : > { %v1963_v13 = vpop.f32.mrf.mxu1  ;;  %v1419_v20 = vpop.f32.mrf.mxu0 }
 0x189   : > { %v1723_v22 = vpack.c.bf16 %v1443_v6, %v1442_v61  ;;  %v1434_v24 = vadd.f32 %v1419_v20, %v1313_v17 }
 0x18a   : > { %v1984_v48 = vpop.f32.mrf.mxu0 }
 0x18b   : > { %1732 = vst [vmem:[%s2692_s30 + $0x18] sm:$0xff] %v1723_v22   ;;  %v1444_v19 = vmax.f32 %v1434_v24, 0.0 }
 0x18c   : > { %v1422_v50 = vpop.f32.mrf.mxu0 }
 0x18d   : > { %v1435_v14 = vadd.f32 %v1422_v50, %v1314_v18 }
 0x18e   : > { %v1985_v43 = vpop.f32.mrf.mxu0 }
 0x18f   : > { %v1445_v11 = vmax.f32 %v1435_v14, 0.0 }
 0x191   : > { %v1728_v29 = vpack.c.bf16 %v1445_v11, %v1444_v19 }
 0x193   : > { %1733 = vst [vmem:[%s2692_s30 + $0x20] sm:$0xff] %v1728_v29  }
 0x194 PF: > { %s13_s16 = sadd.s32 1, %s2095_s16   ;;  %s2736_s12 = smov %s2087_s14 }
 0x195   : > { %p10_p7 = scmp.ge.s32.totalorder %s13_s16, 18   ;;  %s2737_s13 = smov %s2091_s15 }
 0x196   : > { %s2738_s14 = smov %s2741_s17  ;;  %s2739_s15 = smov %s2745_s18 }
 0x197   :  { %12 = sbr.rel (!%p10_p7) target bundleno = 3 (0x3), region = 70 }

// kernel: a_call__.4
= control target key start
LH: loop header
LB: loop body
LE: loop exit
PB: predicated region body
PF: predicated region fallthrough
CT: control target
= control target key end

     0   :  { %s1395_s12 = smov 0   ;;  %s1397_s13 = smov 0   ;;  %s1579_s0 = inlined_call_operand.vmem [shape: bf16[2,4,40,24], index: 0, kind: input, shape index: {}]   ;;  %s1580_s1 = inlined_call_operand.vmem [shape: bf16[9,24,128], index: 1, kind: input, shape index: {}]   ;;  %s1581_s2 = inlined_call_operand.vmem [shape: f32[1,128], index: 2, kind: input, shape index: {}]   ;;  %s1582_s3 = inlined_call_operand.vmem [shape: bf16[2,4,24,128], index: 3, kind: output, shape index: {}]  }
   0x1   :  { %s1399_s14 = smov 0   ;;  %s1401_s15 = smov 0  }
   0x2   :  { %s1403_s16 = smov 0  }
   0x3 LB: > { %s22_s17 = sadd.s32 1, %s1365_s14  ;;  %s25_s18 = sadd.s32 1, %s1369_s15  ;;  %s1373_s16 = sphi %s1403_s16, %s13_s16   ;;  %s1369_s15 = sphi %s1401_s15, %s1586_s15   ;;  %s1365_s14 = sphi %s1399_s14, %s1585_s14   ;;  %s1361_s13 = sphi %s1397_s13, %s1584_s13   ;;  %s1357_s12 = sphi %s1395_s12, %s1583_s12  }
   0x4   : > { %p23_p0 = scmp.ge.s32.totalorder %s22_s17, 4  ;;  %p1067_p1 = scmp.ge.s32.totalorder %s1373_s16, 1 }
   0x5   : > { %p157_p2 = scmp.lt.s32.totalorder %s1373_s16, 9 }
   0x6   : > { %s1588_s17 = smov (%p23_p0, %s22_s17), 0  ;;  %s1590_s18 = smov (!%p23_p0, %s25_s18), %s1369_s15 }
   0x7   : > { %p158_p3 = pnand %p1067_p1, %p157_p2  ;;  %p27_p4 = scmp.ge.s32.totalorder %s1590_s18, 2 }
   0x8   : > { %p189_p5 = scmp.lt.s32.totalorder (!%p158_p3), %s1361_s13, 1  ;;  %p191_p6 = scmp.lt.s32.totalorder (!%p158_p3), %s1357_s12, 3 }
   0x9   : > { %s1592_s18 = smov (%p27_p4, %s1590_s18), 0  ;;  %161 = sbr.rel (%p158_p3) target bundleno = 265 (0x109), region = 32 }
   0xe   : > { %v1311_v0 = vld [vmem:[%s1580_s1 + $0x8] ss:$0 sps:$4 sm:$0xff]   ;;  %vm247_vm0 = vcmask 1043456   ;;  %v1312_v1 = vld [vmem:[%s1580_s1] sm:$0xff]   ;;  %v1313_v3 = vld [vmem:[%s1580_s1 + $0x14] ss:$0 sps:$4 sm:$0xff]  }
   0xf   : > { %1258 = vmatprep.subr.msk.bf16.mxu0 %vm247_vm0, %v1311_v0  ;;  %v249_v2 = vsel %vm247_vm0, %v1311_v0, 0  ;;  %v1317_v4 = vld [vmem:[%s1580_s1 + $0x20] ss:$0 sps:$4 sm:$0xff]   ;;  %1259 = vmatprep.subr.msk.bf16.mxu1 %vm247_vm0, %v1313_v3  ;;  %s1594_s13 = smov (!%p189_p5, %s1361_s13), 1  ;;  %v340_v5 = vsel %vm247_vm0, %v1313_v3, 0  ;;  %v1318_v6 = vld [vmem:[%s1580_s1 + $0xc] sm:$0xff]  }
  0x10   : > { %1187 = vmatpush3.bf16.msra.mxu0 %v249_v2  ;;  %s1596_s12 = smov (!%p191_p6, %s1357_s12), 3  ;;  %1195 = vmatpush3.bf16.msra.mxu1 %v340_v5  ;;  %s1268_s29 = smul.u32 20, %s1594_s13  ;;  %v1320_v7 = vld [vmem:[%s1580_s1 + $0x2c] ss:$0 sps:$4 sm:$0xff]   ;;  %vm240_vm1 = vcmask 195584   ;;  %v417_v14 = vsel %vm247_vm0, %v1317_v4, 0 }
  0x11   : > { %1188 = vmatprep.subr.bf16.mxu0 %v1312_v1  ;;  %1196 = vmatprep.subr.bf16.mxu1 %v1318_v6  ;;  %s1267_s30 = smul.u32 5, %s1596_s12  ;;  %v1319_v15 = vld [vmem:[%s1580_s1 + $0x18] sm:$0xff]   ;;  %vm309_vm2 = vsmask.f32 7424  ;;  %vm397_vm3 = vcmask 1046528   ;;  %v494_v30 = vsel %vm247_vm0, %v1320_v7, 0 }
  0x12   : > { %v1321_v25 = vld [vmem:[%s1580_s1 + $0x38] ss:$0 sps:$4 sm:$0xff]   ;;  %v1322_v36 = vld [vmem:[%s1580_s1 + $0x24] sm:$0xff]   ;;  %vm474_vm4 = vcmask 1044480   ;;  %vm551_vm5 = vsmask.f32 4352 }
  0x13   : > { %s195_s6 = sadd.s32 %s1268_s29, %s1267_s30  ;;  %v575_v41 = vsel %vm247_vm0, %v1321_v25, 0  ;;  %v1323_v42 = vld [vmem:[%s1580_s1 + $0x30] sm:$0xff]   ;;  %v1324_v47 = vld [vmem:[%s1580_s1 + $0x44] ss:$0 sps:$4 sm:$0xff]   ;;  %v1326_v56 = vld [vmem:[%s1580_s1 + $0x3c] sm:$0xff]   ;;  %vm710_vm6 = vcmask 1045504  }
  0x14   : > { %1189 = vmatpush3.bf16.msra.mxu0 %v1312_v1  ;;  %1197 = vmatpush3.bf16.msra.mxu1 %v1318_v6  ;;  %s1068_s7 = sshll.u32 %s195_s6, 2  ;;  %v1325_v48 = vld [vmem:[%s1580_s1 + $0x50] ss:$0 sps:$4 sm:$0xff]   ;;  %v650_v55 = vsel %vm247_vm0, %v1324_v47, 0  ;;  %v1327_v58 = vld [vmem:[%s1580_s1 + $0x48] sm:$0xff]   ;;  %s1269_s24 = smul.u32 3, %s1596_s12 }
  0x15   : > { %1260 = vmatprep.subr.msk.bf16.mxu0 %vm247_vm0, %v1317_v4  ;;  %1261 = vmatprep.subr.msk.bf16.mxu1 %vm247_vm0, %v1320_v7  ;;  %s1462_s10 = scalar_lea.vmem %s1579_s0, %s1068_s7  ;;  %v730_v57 = vsel %vm247_vm0, %v1325_v48, 0  ;;  %v1329_v0 = vld [vmem:[%s1580_s1 + $0x5c] ss:$0 sps:$4 sm:$0xff]   ;;  %v1332_v1 = vld [vmem:[%s1580_s1 + $0x68] ss:$0 sps:$4 sm:$0xff]   ;;  %s1270_s25 = smul.u32 12, %s1594_s13 }
  0x16   : > { %v215_v8 = vld [vmem:[%s1462_s10] sm:$0xf]  ;;  %v216_v9 = vld [vmem:[%s1462_s10 + $0x4] sm:$0xf]  ;;  %v217_v10 = vld [vmem:[%s1462_s10 + $0x8] sm:$0xf] }
  0x17   : > { %v1071_v11 = vcombine.low %v215_v8, %v216_v9  ;;  %v1468_v12 = vld [vmem:[%s1462_s10 + $0xc] sm:$0xf]  ;;  %v1072_v13 = vcombine.low %v217_v10, %v217_v10  ;;  %v219_v40 = vld [vmem:[%s1462_s10 + $0x10] sm:$0xf]  ;;  %v1109_v45 = vcombine.low %v216_v9, %v217_v10  ;;  %vm787_vm7 = vsmask.f32 5376  ;;  %s204_s26 = sadd.s32 %s1270_s25, %s1269_s24 }
  0x18   : > { %v1475_v16 = vcombine.low %v217_v10, %v1468_v12  ;;  %v1503_v46 = vcombine.low %v1468_v12, %v219_v40  ;;  %v1110_v2 = vcombine.low %v1468_v12, %v1468_v12  ;;  %v820_v7 = vsel %vm247_vm0, %v1329_v0, 0  ;;  %v1333_v8 = vld [vmem:[%s1580_s1 + $0x54] sm:$0xff]   ;;  %v1334_v10 = vld [vmem:[%s1580_s1 + $0x60] sm:$0xff]   ;;  %s1069_s27 = sshll.u32 %s204_s26, 2 }
  0x19   : > { %1190 = vmatprep.mubr.msk.bf16.mxu0 %vm240_vm1, %v1071_v11  ;;  %v310_v17 = vshrl.u32 %v1071_v11, 16  ;;  %v312_v18 = vshll.u32 %v1071_v11, 16  ;;  %v398_v19 = vrot.slane %v1071_v11, 1  ;;  %v475_v32 = vrot.slane %v1071_v11, 3  ;;  %s206_s28 = scalar_lea.vmem %s1582_s3, %s1069_s27 }
  0x1a   : > { %1191 = vmatmul.mubr.msk.bf16.vlgmr.msra.gmra.mxu0 %vm240_vm1, %v1072_v13  ;;  %v317_v20 = vshll.u32 %v1475_v16, 16  ;;  %v321_v21 = vshrl.u32 %v1475_v16, 16  ;;  %v399_v22 = vrot.slane %v1475_v16, 1  ;;  %v476_v33 = vrot.slane %v1475_v16, 3 }
  0x1b   : > { %1203 = vmatpush3.bf16.msra.mxu0 %v417_v14  ;;  %v314_v23 = vrot.slane %v312_v18, 1  ;;  %v552_v24 = vrot.slane %v310_v17, 3  ;;  %v553_v26 = vrot.slane %v312_v18, 4  ;;  %v788_v49 = vshrl.u32 %v1109_v45, 16 }
  0x1c   : > { %1204 = vmatprep.subr.bf16.mxu0 %v1319_v15  ;;  %v319_v27 = vrot.slane %v317_v20, 1  ;;  %v556_v28 = vrot.slane %v317_v20, 4  ;;  %v400_v29 = vsel %vm397_vm3, %v398_v19, %v399_v22  ;;  %v555_v34 = vrot.slane %v321_v21, 3  ;;  %v1070_v19 = vld [vmem:[%s1581_s2] ss:$0 sm:$0xff] }
  0x1d   : > { %v315_v31 = vor.u32 %v314_v23, %v310_v17  ;;  %1206 = vmatprep.mubr.msk.bf16.mxu0 %vm240_vm1, %v400_v29  ;;  %v554_v37 = vor.u32 %v553_v26, %v552_v24  ;;  %v477_v43 = vsel %vm474_vm4, %v475_v32, %v476_v33  ;;  %v791_v50 = vshll.u32 %v1109_v45, 16 }
  0x1e   : > { %v323_v35 = vor.u32 %v321_v21, %v319_v27  ;;  %v557_v39 = vor.u32 %v556_v28, %v555_v34  ;;  %v796_v51 = vshrl.u32 %v1503_v46, 16  ;;  %v799_v52 = vshll.u32 %v1503_v46, 16 }
  0x1f   : > { %1205 = vmatpush3.bf16.msra.mxu0 %v1319_v15  ;;  %v320_v38 = vsel %vm309_vm2, %v315_v31, %v319_v27  ;;  %v711_v53 = vrot.slane %v1109_v45, 2  ;;  %v712_v54 = vrot.slane %v1503_v46, 2  ;;  %v790_v59 = vrot.slane %v788_v49, 2 }
  0x20   : > { %1198 = vmatprep.mubr.msk.bf16.mxu1 %vm240_vm1, %v320_v38  ;;  %1262 = vmatprep.subr.msk.bf16.mxu0 %vm247_vm0, %v1321_v25  ;;  %v558_v44 = vsel %vm551_vm5, %v554_v37, %v557_v39  ;;  %v793_v60 = vrot.slane %v791_v50, 3  ;;  %v798_v61 = vrot.slane %v796_v51, 2  ;;  %v801_v62 = vrot.slane %v799_v52, 3 }
  0x21   : > { %1199 = vmatmul.mubr.msk.bf16.vlgmr.msra.gmra.mxu1 %vm240_vm1, %v323_v35  ;;  %v713_v63 = vsel %vm710_vm6, %v711_v53, %v712_v54  ;;  %v877_v5 = vrot.slane %v1109_v45, 3  ;;  %v878_v6 = vrot.slane %v1503_v46, 3  ;;  %v896_v9 = vsel %vm247_vm0, %v1332_v1, 0 }
  0x22   : > { %1211 = vmatpush3.bf16.msra.mxu1 %v494_v30  ;;  %1207 = vmatmul.mubr.msk.bf16.vlgmr.msra.gmra.mxu0 %vm240_vm1, %v399_v22  ;;  %v794_v3 = vor.u32 %v793_v60, %v790_v59  ;;  %v802_v4 = vor.u32 %v801_v62, %v798_v61 }
  0x23   : > { %1219 = vmatpush3.bf16.msra.mxu0 %v575_v41  ;;  %1212 = vmatprep.subr.bf16.mxu1 %v1322_v36  ;;  %v879_v12 = vsel %vm474_vm4, %v877_v5, %v878_v6 }
  0x24   : > { %1220 = vmatprep.subr.bf16.mxu0 %v1323_v42  ;;  %1214 = vmatprep.mubr.msk.bf16.mxu1 %vm240_vm1, %v477_v43  ;;  %v803_v11 = vsel %vm787_vm7, %v794_v3, %v802_v4 }
  0x25   : > { %1222 = vmatprep.mubr.msk.bf16.mxu0 %vm240_vm1, %v558_v44 }
  0x26   : > { %1213 = vmatpush3.bf16.msra.mxu1 %v1322_v36 }
  0x27   : > { %1221 = vmatpush3.bf16.msra.mxu0 %v1323_v42  ;;  %1263 = vmatprep.subr.msk.bf16.mxu1 %vm247_vm0, %v1324_v47 }
  0x28   : > { %1264 = vmatprep.subr.msk.bf16.mxu0 %vm247_vm0, %v1325_v48 }
  0x29   : > { %1215 = vmatmul.mubr.msk.bf16.vlgmr.msra.gmra.mxu1 %vm240_vm1, %v476_v33 }
  0x2a   : > { %1227 = vmatpush3.bf16.msra.mxu1 %v650_v55  ;;  %1223 = vmatmul.mubr.msk.bf16.vlgmr.msra.gmra.mxu0 %vm240_vm1, %v557_v39 }
  0x2b   : > { %1235 = vmatpush3.bf16.msra.mxu0 %v730_v57  ;;  %1228 = vmatprep.subr.bf16.mxu1 %v1326_v56 }
  0x2c   : > { %1236 = vmatprep.subr.bf16.mxu0 %v1327_v58  ;;  %1230 = vmatprep.mubr.msk.bf16.mxu1 %vm240_vm1, %v1109_v45 }
  0x2d   : > { %1238 = vmatprep.mubr.msk.bf16.mxu0 %vm240_vm1, %v713_v63 }
  0x2e   : > { %1229 = vmatpush3.bf16.msra.mxu1 %v1326_v56 }
  0x2f   : > { %1237 = vmatpush3.bf16.msra.mxu0 %v1327_v58  ;;  %1265 = vmatprep.subr.msk.bf16.mxu1 %vm247_vm0, %v1329_v0 }
  0x30   : > { %1266 = vmatprep.subr.msk.bf16.mxu0 %vm247_vm0, %v1332_v1 }
  0x31   : > { %1231 = vmatmul.mubr.msk.bf16.vlgmr.msra.gmra.mxu1 %vm240_vm1, %v1110_v2 }
  0x32   : > { %1243 = vmatpush3.bf16.msra.mxu1 %v820_v7  ;;  %1239 = vmatmul.mubr.msk.bf16.vlgmr.msra.gmra.mxu0 %vm240_vm1, %v712_v54 }
  0x33   : > { %1251 = vmatpush3.bf16.msra.mxu0 %v896_v9  ;;  %1244 = vmatprep.subr.bf16.mxu1 %v1333_v8 }
  0x34   : > { %1252 = vmatprep.subr.bf16.mxu0 %v1334_v10  ;;  %1246 = vmatprep.mubr.msk.bf16.mxu1 %vm240_vm1, %v803_v11 }
  0x35   : > { %1254 = vmatprep.mubr.msk.bf16.mxu0 %vm240_vm1, %v879_v12 }
  0x36   : > { %1245 = vmatpush3.bf16.msra.mxu1 %v1333_v8 }
  0x37   : > { %1253 = vmatpush3.bf16.msra.mxu0 %v1334_v10 }
  0x39   : > { %1247 = vmatmul.mubr.msk.bf16.vlgmr.msra.gmra.mxu1 %vm240_vm1, %v802_v4 }
  0x3a   : > { %1255 = vmatmul.mubr.msk.bf16.vlgmr.msra.gmra.mxu0 %vm240_vm1, %v878_v6 }
  0xda   : > { %v1192_v13 = vpop.f32.mrf.mxu0 }
  0xdb   : > { %v301_v23 = vadd.f32 %v1192_v13, %v1070_v19 }
  0xdc   : > { %v285_v14 = vpop.f32.mrf.mxu0 }
  0xdd   : > { %v299_v26 = vadd.f32 %v1070_v19, %v285_v14 }
  0xde   : > { %v1193_v15 = vpop.f32.mrf.mxu0 }
  0xe0   : > { %v288_v16 = vpop.f32.mrf.mxu0 }
  0xe1   : > { %v1200_v17 = vpop.f32.mrf.mxu1  ;;  %v300_v33 = vadd.f32 %v1070_v19, %v288_v16 }
  0xe2   : > { %v1208_v18 = vpop.f32.mrf.mxu0  ;;  %v392_v27 = vadd.f32 %v1200_v17, %v301_v23 }
  0xe3   : > { %v376_v20 = vpop.f32.mrf.mxu1 }
  0xe4   : > { %v453_v21 = vpop.f32.mrf.mxu0  ;;  %v390_v30 = vadd.f32 %v376_v20, %v299_v26  ;;  %v469_v34 = vadd.f32 %v1208_v18, %v392_v27 }
  0xe5   : > { %v1201_v22 = vpop.f32.mrf.mxu1 }
  0xe6   : > { %v1209_v24 = vpop.f32.mrf.mxu0  ;;  %v467_v37 = vadd.f32 %v453_v21, %v390_v30 }
  0xe7   : > { %v379_v25 = vpop.f32.mrf.mxu1 }
  0xe8   : > { %v456_v28 = vpop.f32.mrf.mxu0  ;;  %v391_v38 = vadd.f32 %v379_v25, %v300_v33 }
  0xe9   : > { %v1216_v29 = vpop.f32.mrf.mxu1 }
  0xea   : > { %v1224_v31 = vpop.f32.mrf.mxu0  ;;  %v546_v39 = vadd.f32 %v1216_v29, %v469_v34  ;;  %v468_v45 = vadd.f32 %v456_v28, %v391_v38 }
  0xeb   : > { %v530_v32 = vpop.f32.mrf.mxu1 }
  0xec   : > { %v611_v35 = vpop.f32.mrf.mxu0  ;;  %v544_v42 = vadd.f32 %v530_v32, %v467_v37  ;;  %v627_v46 = vadd.f32 %v1224_v31, %v546_v39 }
  0xed   : > { %v1217_v36 = vpop.f32.mrf.mxu1 }
  0xee   : > { %v1225_v40 = vpop.f32.mrf.mxu0  ;;  %v625_v49 = vadd.f32 %v611_v35, %v544_v42 }
  0xef   : > { %v533_v41 = vpop.f32.mrf.mxu1 }
  0xf0   : > { %v614_v43 = vpop.f32.mrf.mxu0  ;;  %v545_v50 = vadd.f32 %v533_v41, %v468_v45 }
  0xf1   : > { %v1232_v44 = vpop.f32.mrf.mxu1 }
  0xf2   : > { %v1240_v47 = vpop.f32.mrf.mxu0  ;;  %v702_v51 = vadd.f32 %v1232_v44, %v627_v46  ;;  %v626_v57 = vadd.f32 %v614_v43, %v545_v50 }
  0xf3   : > { %v686_v48 = vpop.f32.mrf.mxu1 }
  0xf4   : > { %v766_v52 = vpop.f32.mrf.mxu0  ;;  %v700_v54 = vadd.f32 %v686_v48, %v625_v49  ;;  %v782_v58 = vadd.f32 %v1240_v47, %v702_v51 }
  0xf5   : > { %v1233_v53 = vpop.f32.mrf.mxu1 }
  0xf6   : > { %v1241_v55 = vpop.f32.mrf.mxu0  ;;  %v780_v61 = vadd.f32 %v766_v52, %v700_v54 }
  0xf7   : > { %v689_v56 = vpop.f32.mrf.mxu1 }
  0xf8   : > { %v769_v59 = vpop.f32.mrf.mxu0  ;;  %v701_v62 = vadd.f32 %v689_v56, %v626_v57 }
  0xf9   : > { %v1248_v60 = vpop.f32.mrf.mxu1 }
  0xfa   : > { %v872_v63 = vadd.f32 %v1248_v60, %v782_v58  ;;  %v1256_v0 = vpop.f32.mrf.mxu0  ;;  %v781_v6 = vadd.f32 %v769_v59, %v701_v62 }
  0xfb   : > { %v856_v1 = vpop.f32.mrf.mxu1 }
  0xfc   : > { %v948_v2 = vadd.f32 %v1256_v0, %v872_v63  ;;  %v870_v3 = vadd.f32 %v856_v1, %v780_v61  ;;  %v932_v4 = vpop.f32.mrf.mxu0 }
  0xfd   : > { %v1249_v5 = vpop.f32.mrf.mxu1 }
  0xfe   : > { %v951_v7 = vmax.f32 %v948_v2, 0.0  ;;  %v1257_v8 = vpop.f32.mrf.mxu0  ;;  %v946_v11 = vadd.f32 %v932_v4, %v870_v3 }
  0xff   : > { %v859_v9 = vpop.f32.mrf.mxu1 }
 0x100   : > { %v1144_v10 = vpack.c.bf16 %v951_v7, %v951_v7  ;;  %v871_v12 = vadd.f32 %v859_v9, %v781_v6  ;;  %v935_v13 = vpop.f32.mrf.mxu0  ;;  %v949_v15 = vmax.f32 %v946_v11, 0.0 }
 0x102   : > { %967 = vst [vmem:[%s206_s28 + $0x8] sm:$0xf] %v1144_v10  ;;  %v947_v14 = vadd.f32 %v935_v13, %v871_v12 }
 0x104   : > { %v950_v16 = vmax.f32 %v947_v14, 0.0 }
 0x106   : > { %v1148_v17 = vpack.c.bf16 %v950_v16, %v949_v15 }
 0x108   : > { %1149 = vst [vmem:[%s206_s28] sm:$0xff] %v1148_v17  }
 0x109 PF: > { %s13_s16 = sadd.s32 1, %s1373_s16   ;;  %s1583_s12 = smov %s1365_s14 }
 0x10a   : > { %p10_p7 = scmp.ge.s32.totalorder %s13_s16, 10   ;;  %s1584_s13 = smov %s1369_s15 }
 0x10b   : > { %s1585_s14 = smov %s1588_s17  ;;  %s1586_s15 = smov %s1592_s18 }
 0x10c   :  { %12 = sbr.rel (!%p10_p7) target bundleno = 3 (0x3), region = 70 }

// kernel: a_call__.5
= control target key start
LH: loop header
LB: loop body
LE: loop exit
PB: predicated region body
PF: predicated region fallthrough
CT: control target
= control target key end

     0   :  { %s4057_s18 = smov 0   ;;  %s4059_s19 = smov 0   ;;  %s5274_s0 = inlined_call_operand.vmem [shape: bf16[2,8,104,48], index: 0, kind: input, shape index: {}]   ;;  %s5275_s1 = inlined_call_operand.vmem [shape: bf16[2,8,104,24], index: 1, kind: input, shape index: {}]   ;;  %s5276_s2 = inlined_call_operand.vmem [shape: bf16[9,48,128], index: 2, kind: input, shape index: {}]   ;;  %s5277_s3 = inlined_call_operand.vmem [shape: bf16[9,24,128], index: 3, kind: input, shape index: {}]   ;;  %s5278_s4 = inlined_call_operand.vmem [shape: f32[1,128], index: 4, kind: input, shape index: {}]   ;;  %s5279_s5 = inlined_call_operand.vmem [shape: f32[2,8,80,128], index: 5, kind: output, shape index: {}]  }
   0x1   :  { %s4061_s20 = smov 0   ;;  %s4063_s21 = smov 0  }
   0x2   :  { %s4065_s22 = smov 0  }
   0x3 LB: > { %s24_s23 = sadd.s32 1, %s4015_s20  ;;  %s27_s24 = sadd.s32 1, %s4019_s21  ;;  %s4023_s22 = sphi %s4065_s22, %s15_s22   ;;  %s4019_s21 = sphi %s4063_s21, %s5283_s21   ;;  %s4015_s20 = sphi %s4061_s20, %s5282_s20   ;;  %s4011_s19 = sphi %s4059_s19, %s5281_s19   ;;  %s4007_s18 = sphi %s4057_s18, %s5280_s18  }
   0x4   : > { %p25_p0 = scmp.ge.s32.totalorder %s24_s23, 8  ;;  %p3039_p1 = scmp.ge.s32.totalorder %s4023_s22, 1 }
   0x5   : > { %p223_p2 = scmp.lt.s32.totalorder %s4023_s22, 17 }
   0x6   : > { %s5285_s23 = smov (%p25_p0, %s24_s23), 0  ;;  %s5287_s24 = smov (!%p25_p0, %s27_s24), %s4019_s21 }
   0x7   : > { %p224_p3 = pnand %p3039_p1, %p223_p2  ;;  %p29_p4 = scmp.ge.s32.totalorder %s5287_s24, 2 }
   0x8   : > { %p268_p5 = scmp.lt.s32.totalorder (!%p224_p3), %s4011_s19, 1  ;;  %p270_p6 = scmp.lt.s32.totalorder (!%p224_p3), %s4007_s18, 7 }
   0x9   : > { %s5289_s24 = smov (%p29_p4, %s5287_s24), 0  ;;  %227 = sbr.rel (%p224_p3) target bundleno = 583 (0x247), region = 40 }
   0xe   : > { %v3912_v0 = vld [vmem:[%s5276_s2 + $0x10] sm:$0xff]   ;;  %v4025_v1 = vmov 0.0   ;;  %v3913_v2 = vld [vmem:[%s5276_s2 + $0x8] sm:$0xff]   ;;  %vm4026_vm0 = vmmov 0   ;;  %v3916_v4 = vld [vmem:[%s5276_s2 + $0x20] sm:$0xff]   ;;  %s5291_s19 = smov (!%p268_p5, %s4011_s19), 1 }
   0xf   : > { %3416 = vmatprep.subr.bf16.mxu0 %v4025_v1  ;;  %3442 = vmatprep.subr.bf16.mxu1 %v4025_v1  ;;  %v3914_v3 = vld [vmem:[%s5276_s2 + $0x28] sm:$0xff]   ;;  %s5293_s18 = smov (!%p270_p6, %s4007_s18), 7  ;;  %v3915_v5 = vld [vmem:[%s5276_s2] sm:$0xff]   ;;  %s3867_s10 = smul.u32 104, %s5291_s19  ;;  %v3922_v6 = vld [vmem:[%s5276_s2 + $0x18] sm:$0xff]   ;;  %vm365_vm1 = vcmask 392192  }
  0x10   : > { %3417 = vmatpush3.bf16.msra.mxu0 %v3912_v0  ;;  %3422 = vmatprep.mubr.msk.bf16.mxu0 %vm4026_vm0, %v4025_v1  ;;  %s3866_s11 = smul.u32 13, %s5293_s18  ;;  %v3923_v7 = vld [vmem:[%s5276_s2 + $0x40] sm:$0xff]   ;;  %v3925_v20 = vld [vmem:[%s5276_s2 + $0x38] sm:$0xff]   ;;  %vm474_vm2 = vsmask.f32 7424  ;;  %v3929_v28 = vld [vmem:[%s5276_s2 + $0x30] sm:$0xff]  }
  0x11   : > { %3418 = vmatprep.subr.bf16.mxu0 %v4025_v1  ;;  %3448 = vmatprep.mubr.msk.bf16.mxu1 %vm4026_vm0, %v4025_v1  ;;  %v3924_v23 = vld [vmem:[%s5276_s2 + $0x58] sm:$0xff]   ;;  %v3926_v35 = vld [vmem:[%s5276_s2 + $0x50] sm:$0xff]   ;;  %v3930_v43 = vld [vmem:[%s5276_s2 + $0x48] sm:$0xff]   ;;  %vm1091_vm3 = vcmask 1045504   ;;  %vm637_vm4 = vcmask 1046528   ;;  %vm1521_vm6 = vcmask 1044480  }
  0x12   : > { %3443 = vmatpush3.bf16.msra.mxu1 %v3914_v3  ;;  %s4128_s14 = sadd.s32 %s3867_s10, %s3866_s11  ;;  %vm1364_vm5 = vsmask.f32 5376  ;;  %vm914_vm7 = vsmask.f32 6400  ;;  %vm1715_vm8 = vcmask 1043456   ;;  %vm1699_vm9 = vcmask 195584  }
  0x13   : > { %3444 = vmatprep.subr.bf16.mxu1 %v4025_v1  ;;  %s3040_s15 = sshll.u32 %s4128_s14, 2  ;;  %s3869_s17 = smul.u32 80, %s5291_s19 }
  0x14   : > { %3419 = vmatpush3.bf16.msra.mxu0 %v3913_v2  ;;  %s4137_s25 = scalar_lea.vmem %s5274_s0, %s3040_s15  ;;  %s4353_s26 = scalar_lea.vmem %s5275_s1, %s3040_s15 }
  0x15   : > { %3420 = vmatprep.subr.bf16.mxu0 %v4025_v1  ;;  %v303_v8 = vld [vmem:[%s4137_s25] sm:$0xf]  ;;  %v4145_v9 = vld [vmem:[%s4137_s25 + $0x4] sm:$0xf]  ;;  %v4148_v10 = vld [vmem:[%s4137_s25 + $0x8] sm:$0xf] }
  0x16   : > { %3445 = vmatpush3.bf16.msra.mxu1 %v3916_v4  ;;  %v4151_v11 = vld [vmem:[%s4137_s25 + $0xc] sm:$0xf]  ;;  %v4154_v12 = vld [vmem:[%s4137_s25 + $0x10] sm:$0xf]  ;;  %v4157_v13 = vld [vmem:[%s4137_s25 + $0x14] sm:$0xf]  ;;  %v4160_v14 = vcombine.low %v303_v8, %v4145_v9  ;;  %v4264_v58 = vcombine.low %v4145_v9, %v4148_v10 }
  0x17   : > { %3446 = vmatprep.subr.bf16.mxu1 %v4025_v1  ;;  %v4165_v15 = vcombine.low %v4148_v10, %v4151_v11  ;;  %v4169_v16 = vcombine.low %v4154_v12, %v4157_v13  ;;  %v4188_v27 = vld [vmem:[%s4137_s25 + $0x18] sm:$0xf]  ;;  %v4194_v29 = vld [vmem:[%s4137_s25 + $0x1c] sm:$0xf]  ;;  %v4199_v31 = vld [vmem:[%s4137_s25 + $0x28] sm:$0xf]  ;;  %v4271_v60 = vcombine.low %v4151_v11, %v4154_v12 }
  0x18   : > { %3421 = vmatpush3.bf16.msra.mxu0 %v3915_v5  ;;  %v475_v17 = vshrl.u32 %v4160_v14, 16  ;;  %v477_v18 = vshll.u32 %v4160_v14, 16  ;;  %v4203_v32 = vld [vmem:[%s4137_s25 + $0x2c] sm:$0xf]  ;;  %v4212_v36 = vcombine.low %v4188_v27, %v4194_v29  ;;  %v4224_v38 = vld [vmem:[%s4137_s25 + $0x20] sm:$0xf]  ;;  %v4254_v50 = vcombine.low %v4199_v31, %v4199_v31 }
  0x19   : > { %3468 = vmatprep.subr.bf16.mxu0 %v4025_v1  ;;  %v481_v19 = vshll.u32 %v4165_v15, 16  ;;  %v485_v25 = vshrl.u32 %v4165_v15, 16  ;;  %v488_v26 = vshll.u32 %v4169_v16, 16  ;;  %v4216_v37 = vcombine.low %v4199_v31, %v4203_v32  ;;  %v4227_v39 = vld [vmem:[%s4137_s25 + $0x24] sm:$0xf] }
  0x1a   : > { %3447 = vmatpush3.bf16.msra.mxu1 %v3922_v6  ;;  %v479_v21 = vrot.slane %v477_v18, 1  ;;  %v492_v41 = vshrl.u32 %v4169_v16, 16  ;;  %v495_v42 = vshll.u32 %v4212_v36, 16  ;;  %v4244_v46 = vcombine.low %v4224_v38, %v4227_v39  ;;  %v4278_v4 = vld [vmem:[%s4137_s25 + $0x30] ss:$0 sps:$4 sm:$0xff]  }
  0x1b   : > { %3494 = vmatprep.subr.bf16.mxu1 %v4025_v1  ;;  %3423 = vmatmul.mubr.msk.bf16.vlgmr.msra.gmra.mxu0 %vm365_vm1, %v4160_v14  ;;  %v483_v22 = vrot.slane %v481_v19, 1  ;;  %v490_v34 = vrot.slane %v488_v26, 1  ;;  %v499_v48 = vshrl.u32 %v4212_v36, 16  ;;  %v1366_v51 = vrot.slane %v481_v19, 3 }
  0x1c   : > { %3469 = vmatpush3.bf16.msra.mxu0 %v3923_v7  ;;  %3426 = vmatprep.mubr.msk.bf16.mxu0 %vm4026_vm0, %v4025_v1  ;;  %v480_v24 = vor.u32 %v479_v21, %v475_v17  ;;  %v497_v45 = vrot.slane %v495_v42, 1  ;;  %v502_v49 = vshll.u32 %v4244_v46, 16  ;;  %v1365_v52 = vrot.slane %v485_v25, 2 }
  0x1d   : > { %3470 = vmatprep.subr.bf16.mxu0 %v4025_v1  ;;  %v487_v33 = vor.u32 %v485_v25, %v483_v22  ;;  %v494_v44 = vor.u32 %v492_v41, %v490_v34  ;;  %v1369_v53 = vrot.slane %v488_v26, 3  ;;  %v1368_v54 = vrot.slane %v492_v41, 2 }
  0x1e   : > { %v484_v30 = vsel %vm474_vm2, %v480_v24, %v483_v22  ;;  %v501_v55 = vor.u32 %v499_v48, %v497_v45  ;;  %v504_v56 = vrot.slane %v502_v49, 1  ;;  %v510_v57 = vshll.u32 %v4254_v50, 16 }
  0x1f   : > { %3449 = vmatmul.mubr.msk.bf16.vlgmr.msra.gmra.mxu1 %vm365_vm1, %v484_v30  ;;  %v491_v40 = vsel %vm474_vm2, %v487_v33, %v490_v34  ;;  %v498_v47 = vsel %vm474_vm2, %v494_v44, %v497_v45  ;;  %v1230_v59 = vrot.slane %v4165_v15, 2  ;;  %v506_v61 = vshrl.u32 %v4244_v46, 16 }
  0x20   : > { %3471 = vmatpush3.bf16.msra.mxu0 %v3925_v20  ;;  %3495 = vmatpush3.bf16.msra.mxu1 %v3924_v23  ;;  %v1231_v62 = vrot.slane %v4169_v16, 2  ;;  %v638_v63 = vrot.slane %v4160_v14, 1  ;;  %v639_v0 = vrot.slane %v4165_v15, 1  ;;  %v1367_v2 = vor.u32 %v1366_v51, %v1365_v52 }
  0x21   : > { %3472 = vmatprep.subr.bf16.mxu0 %v4025_v1  ;;  %3452 = vmatprep.mubr.msk.bf16.mxu1 %vm4026_vm0, %v4025_v1  ;;  %v1370_v3 = vor.u32 %v1369_v53, %v1368_v54  ;;  %v505_v5 = vsel %vm474_vm2, %v501_v55, %v504_v56  ;;  %v512_v6 = vrot.slane %v510_v57, 1  ;;  %v1233_v8 = vrot.slane %v4212_v36, 2 }
  0x22   : > { %3496 = vmatprep.subr.bf16.mxu1 %v4025_v1  ;;  %v4282_v7 = vsel %vm1091_vm3, %v1230_v59, %v1231_v62  ;;  %v1372_v10 = vrot.slane %v499_v48, 2  ;;  %v1373_v11 = vrot.slane %v495_v42, 3  ;;  %v1235_v12 = vrot.slane %v4244_v46, 2 }
  0x23   : > { %3427 = vmatmul.mubr.msk.bf16.gmra.mxu0 %vm365_vm1, %v4165_v15  ;;  %v4286_v9 = vsel %vm1364_vm5, %v1367_v2, %v1370_v3  ;;  %v508_v14 = vor.u32 %v506_v61, %v504_v56  ;;  %v4290_v17 = vsel %vm1091_vm3, %v1231_v62, %v1233_v8  ;;  %v1376_v18 = vrot.slane %v506_v61, 2  ;;  %v3937_v2 = vld [vmem:[%s5276_s2 + $0x68] sm:$0xff]  }
  0x24   : > { %3430 = vmatprep.mubr.msk.bf16.mxu0 %vm4026_vm0, %v4025_v1  ;;  %3473 = vmatpush3.bf16.msra.mxu0 %v3929_v28  ;;  %v1377_v19 = vrot.slane %v502_v49, 3  ;;  %v1374_v20 = vor.u32 %v1373_v11, %v1372_v10  ;;  %v4294_v21 = vsel %vm1091_vm3, %v1233_v8, %v1235_v12  ;;  %v1237_v22 = vrot.slane %v4216_v37, 2  ;;  %v3934_v49 = vld [vmem:[%s5276_s2 + $0x70] sm:$0xff]   ;;  %v3940_v8 = vld [vmem:[%s5276_s2 + $0x60] sm:$0xff]  }
  0x25   : > { %3520 = vmatprep.subr.bf16.mxu0 %v4025_v1  ;;  %3497 = vmatpush3.bf16.msra.mxu1 %v3926_v35  ;;  %v1381_v23 = vshrl.u32 %v4216_v37, 16  ;;  %v1384_v25 = vshll.u32 %v4216_v37, 16  ;;  %v1239_v26 = vrot.slane %v4278_v4, 2  ;;  %v1390_v28 = vshrl.u32 %v4278_v4, 16 }
  0x26   : > { %3498 = vmatprep.subr.bf16.mxu1 %v4025_v1  ;;  %v1378_v24 = vor.u32 %v1377_v19, %v1376_v18  ;;  %v4308_v30 = vsel %vm1364_vm5, %v1370_v3, %v1374_v20  ;;  %v4311_v33 = vsel %vm1091_vm3, %v1235_v12, %v1237_v22  ;;  %v1393_v35 = vshll.u32 %v4278_v4, 16 }
  0x27   : > { %3453 = vmatmul.mubr.msk.bf16.gmra.mxu1 %vm365_vm1, %v491_v40  ;;  %v1383_v34 = vrot.slane %v1381_v23, 2  ;;  %v1386_v41 = vrot.slane %v1384_v25, 3  ;;  %v4318_v42 = vsel %vm1091_vm3, %v1237_v22, %v1239_v26  ;;  %v1522_v45 = vrot.slane %v4165_v15, 3  ;;  %v3938_v15 = vld [vmem:[%s5276_s2 + $0x80] sm:$0xff]  }
  0x28   : > { %3456 = vmatprep.mubr.msk.bf16.mxu1 %vm4026_vm0, %v4025_v1  ;;  %v4315_v40 = vsel %vm1364_vm5, %v1374_v20, %v1378_v24  ;;  %v1395_v44 = vrot.slane %v1393_v35, 3  ;;  %v513_v48 = vsel %vm474_vm2, %v508_v14, %v512_v6  ;;  %v640_v52 = vsel %vm637_vm4, %v638_v63, %v639_v0 }
  0x29   : > { %3499 = vmatpush3.bf16.msra.mxu1 %v3930_v43  ;;  %v1392_v43 = vrot.slane %v1390_v28, 2  ;;  %v1387_v51 = vor.u32 %v1386_v41, %v1383_v34  ;;  %v1525_v56 = vrot.slane %v4212_v36, 3  ;;  %v780_v57 = vrot.slane %v4264_v58, 1 }
  0x2a   : > { %3546 = vmatprep.subr.bf16.mxu1 %v4025_v1  ;;  %v781_v59 = vrot.slane %v4271_v60, 1  ;;  %v641_v63 = vrot.slane %v4169_v16, 1  ;;  %v4368_v6 = vcombine.low %v4157_v13, %v4188_v27  ;;  %v1527_v10 = vrot.slane %v4244_v46, 3 }
  0x2b   : > { %3431 = vmatmul.mubr.msk.bf16.gmra.mxu0 %vm365_vm1, %v4169_v16  ;;  %v1396_v53 = vor.u32 %v1395_v44, %v1392_v43  ;;  %v4333_v55 = vsel %vm1364_vm5, %v1378_v24, %v1387_v51  ;;  %v4397_v12 = vcombine.low %v4194_v29, %v4224_v38  ;;  %v1529_v18 = vrot.slane %v4216_v37, 3 }
  0x2c   : > { %3434 = vmatprep.mubr.msk.bf16.mxu0 %vm4026_vm0, %v4025_v1  ;;  %v782_v3 = vsel %vm637_vm4, %v780_v57, %v781_v59  ;;  %v783_v13 = vrot.slane %v4368_v6, 1  ;;  %v4385_v27 = vsel %vm1521_vm6, %v1525_v56, %v1527_v10  ;;  %v645_v19 = vrot.slane %v4244_v46, 1  ;;  %v3943_v57 = vld [vmem:[%s5276_s2 + $0xa0] sm:$0xff]  }
  0x2d   : > { %v4340_v61 = vsel %vm1364_vm5, %v1387_v51, %v1396_v53  ;;  %v785_v29 = vrot.slane %v4397_v12, 1  ;;  %v4411_v38 = vsel %vm1521_vm6, %v1527_v10, %v1529_v18  ;;  %v4419_v37 = vcombine.low %v4227_v39, %v4199_v31  ;;  %v4455_v51 = vld [vmem:[%s4353_s26 + $0x8] sm:$0xf] }
  0x2e   : > { %v784_v11 = vsel %vm637_vm4, %v781_v59, %v783_v13  ;;  %v1531_v23 = vrot.slane %v4278_v4, 3  ;;  %v647_v24 = vrot.slane %v4254_v50, 1  ;;  %v916_v39 = vshrl.u32 %v4264_v58, 16 }
  0x2f   : > { %3457 = vmatmul.mubr.msk.bf16.gmra.mxu1 %vm365_vm1, %v498_v47  ;;  %v1523_v47 = vrot.slane %v4169_v16, 3  ;;  %v642_v16 = vsel %vm637_vm4, %v639_v0, %v641_v63  ;;  %v643_v0 = vrot.slane %v4212_v36, 1  ;;  %v786_v20 = vsel %vm637_vm4, %v783_v13, %v785_v29  ;;  %v4479_v13 = vld [vmem:[%s4353_s26 + $0x10] sm:$0xf] }
  0x30   : > { %3460 = vmatprep.mubr.msk.bf16.mxu1 %vm4026_vm0, %v4025_v1  ;;  %v4431_v31 = vsel %vm1521_vm6, %v1529_v18, %v1531_v23  ;;  %v919_v4 = vshll.u32 %v4264_v58, 16  ;;  %v924_v25 = vshrl.u32 %v4271_v60, 16  ;;  %v927_v26 = vshll.u32 %v4271_v60, 16 }
  0x31   : > { %v4330_v54 = vsel %vm1521_vm6, %v1522_v45, %v1523_v47  ;;  %v4346_v62 = vsel %vm1521_vm6, %v1523_v47, %v1525_v56  ;;  %v644_v14 = vsel %vm637_vm4, %v641_v63, %v643_v0  ;;  %v646_v22 = vsel %vm637_vm4, %v643_v0, %v645_v19 }
  0x32   : > { %v648_v34 = vsel %vm637_vm4, %v645_v19, %v647_v24  ;;  %v4443_v50 = vcombine.low %v4203_v32, %v4203_v32  ;;  %v918_v35 = vrot.slane %v916_v39, 1  ;;  %v921_v41 = vrot.slane %v919_v4, 2  ;;  %v3944_v19 = vld [vmem:[%s5276_s2 + $0xb8] sm:$0xff]   ;;  %v3947_v24 = vld [vmem:[%s5276_s2 + $0x90] sm:$0xff]  }
  0x33   : > { %3435 = vmatmul.mubr.msk.bf16.gmra.mxu0 %vm365_vm1, %v4212_v36  ;;  %v3941_v36 = vld [vmem:[%s5276_s2 + $0x78] sm:$0xff]   ;;  %v926_v43 = vrot.slane %v924_v25, 1  ;;  %v929_v44 = vrot.slane %v927_v26, 2  ;;  %v942_v10 = vshrl.u32 %v4397_v12, 16  ;;  %v945_v0 = vshll.u32 %v4397_v12, 16  ;;  %v3946_v26 = vld [vmem:[%s5276_s2 + $0xb0] sm:$0xff]  }
  0x34   : > { %3438 = vmatprep.mubr.msk.bf16.mxu0 %vm4026_vm0, %v4025_v1  ;;  %v789_v45 = vrot.slane %v4443_v50, 1  ;;  %v922_v47 = vor.u32 %v921_v41, %v918_v35  ;;  %v1095_v25 = vrot.slane %v4368_v6, 2  ;;  %v954_v35 = vshll.u32 %v4419_v37, 16 }
  0x35   : > { %v930_v32 = vor.u32 %v929_v44, %v926_v43  ;;  %v947_v23 = vrot.slane %v945_v0, 2  ;;  %v1101_v0 = vrot.slane %v4443_v50, 2 }
  0x37   : > { %3461 = vmatmul.mubr.msk.bf16.gmra.mxu1 %vm365_vm1, %v505_v5  ;;  %v3935_v5 = vld [vmem:[%s5276_s2 + $0x88] sm:$0xff]   ;;  %v931_v56 = vsel %vm914_vm7, %v922_v47, %v930_v32  ;;  %v956_v47 = vrot.slane %v954_v35, 2 }
  0x38   : > { %3464 = vmatprep.mubr.msk.bf16.mxu1 %vm4026_vm0, %v4025_v1 }
  0x3b   : > { %3439 = vmatmul.mubr.msk.bf16.gmra.mxu0 %vm365_vm1, %v4244_v46  ;;  %v787_v46 = vrot.slane %v4419_v37, 1 }
  0x3c   : > { %3474 = vmatprep.mubr.msk.bf16.mxu0 %vm4026_vm0, %v4025_v1 }
  0x3d   : > { %v788_v28 = vsel %vm637_vm4, %v785_v29, %v787_v46  ;;  %v790_v53 = vsel %vm637_vm4, %v787_v46, %v789_v45 }
  0x3f   : > { %3465 = vmatmul.mubr.msk.bf16.gmra.mxu1 %vm365_vm1, %v513_v48  ;;  %v933_v48 = vshrl.u32 %v4368_v6, 16 }
  0x40   : > { %3500 = vmatprep.mubr.msk.bf16.mxu1 %vm4026_vm0, %v4025_v1 }
  0x41   : > { %v935_v59 = vrot.slane %v933_v48, 1  ;;  %v1097_v48 = vrot.slane %v4397_v12, 2  ;;  %v1099_v12 = vrot.slane %v4419_v37, 2 }
  0x43   : > { %3475 = vmatmul.mubr.msk.bf16.vlgmr.msra.gmra.mxu0 %vm365_vm1, %v640_v52  ;;  %v4458_v52 = vld [vmem:[%s4353_s26 + $0xc] sm:$0xf] }
  0x44   : > { %3521 = vmatpush3.bf16.msra.mxu0 %v3934_v49  ;;  %3478 = vmatprep.mubr.msk.bf16.mxu0 %vm4026_vm0, %v4025_v1  ;;  %v936_v49 = vshll.u32 %v4368_v6, 16 }
  0x45   : > { %3522 = vmatprep.subr.bf16.mxu0 %v4025_v1 }
  0x46   : > { %v938_v63 = vrot.slane %v936_v49, 2 }
  0x47   : > { %3501 = vmatmul.mubr.msk.bf16.vlgmr.msra.gmra.mxu1 %vm365_vm1, %v782_v3  ;;  %v1092_v3 = vrot.slane %v4264_v58, 2 }
  0x48   : > { %3523 = vmatpush3.bf16.msra.mxu0 %v3937_v2  ;;  %3547 = vmatpush3.bf16.msra.mxu1 %v3935_v5  ;;  %v4467_v2 = vcombine.low %v4455_v51, %v4458_v52  ;;  %v939_v58 = vor.u32 %v938_v63, %v935_v59 }
  0x49   : > { %3524 = vmatprep.subr.bf16.mxu0 %v4025_v1  ;;  %3504 = vmatprep.mubr.msk.bf16.mxu1 %vm4026_vm0, %v4025_v1 }
  0x4a   : > { %3548 = vmatprep.subr.bf16.mxu1 %v4025_v1  ;;  %v1815_v5 = vshll.u32 %v4467_v2, 16 }
  0x4b   : > { %3479 = vmatmul.mubr.msk.bf16.gmra.mxu0 %vm365_vm1, %v642_v16  ;;  %v1819_v16 = vshrl.u32 %v4467_v2, 16 }
  0x4c   : > { %3482 = vmatprep.mubr.msk.bf16.mxu0 %vm4026_vm0, %v4025_v1  ;;  %3525 = vmatpush3.bf16.msra.mxu0 %v3940_v8  ;;  %v1093_v8 = vrot.slane %v4271_v60, 2  ;;  %v1817_v35 = vrot.slane %v1815_v5, 1 }
  0x4d   : > { %3572 = vmatprep.subr.bf16.mxu0 %v4025_v1  ;;  %3549 = vmatpush3.bf16.msra.mxu1 %v3938_v15  ;;  %v4482_v15 = vld [vmem:[%s4353_s26 + $0x14] sm:$0xf]  ;;  %v4492_v60 = vrot.slane %v1819_v16, 2 }
  0x4e   : > { %3550 = vmatprep.subr.bf16.mxu1 %v4025_v1  ;;  %v1094_v29 = vsel %vm1091_vm3, %v1092_v3, %v1093_v8  ;;  %v1096_v43 = vsel %vm1091_vm3, %v1093_v8, %v1095_v25 }
  0x4f   : > { %3505 = vmatmul.mubr.msk.bf16.gmra.mxu1 %vm365_vm1, %v784_v11  ;;  %v3945_v11 = vld [vmem:[%s5276_s2 + $0x98] sm:$0xff]  }
  0x50   : > { %3508 = vmatprep.mubr.msk.bf16.mxu1 %vm4026_vm0, %v4025_v1 }
  0x51   : > { %3551 = vmatpush3.bf16.msra.mxu1 %v3941_v36  ;;  %v4501_v36 = vcombine.low %v4479_v13, %v4482_v15 }
  0x52   : > { %3598 = vmatprep.subr.bf16.mxu1 %v4025_v1 }
  0x53   : > { %3483 = vmatmul.mubr.msk.bf16.gmra.mxu0 %vm365_vm1, %v644_v14  ;;  %v4496_v14 = vrot.slane %v1815_v5, 3  ;;  %v1822_v46 = vshll.u32 %v4501_v36, 16  ;;  %v1826_v4 = vshrl.u32 %v4501_v36, 16 }
  0x54   : > { %3486 = vmatprep.mubr.msk.bf16.mxu0 %vm4026_vm0, %v4025_v1 }
  0x55   : > { %v2643_v18 = vor.u32 %v4496_v14, %v4492_v60  ;;  %v2645_v39 = vrot.slane %v1822_v46, 3  ;;  %v2644_v41 = vrot.slane %v1826_v4, 2  ;;  %v3966_v60 = vld [vmem:[%s5277_s3 + $0x2c] ss:$0 sps:$4 sm:$0xff]  }
  0x57   : > { %3509 = vmatmul.mubr.msk.bf16.gmra.mxu1 %vm365_vm1, %v786_v20  ;;  %v940_v20 = vsel %vm914_vm7, %v930_v32, %v939_v58  ;;  %v4534_v6 = vor.u32 %v2645_v39, %v2644_v41  ;;  %v3948_v32 = vld [vmem:[%s5276_s2 + $0xa8] sm:$0xff]   ;;  %v4707_v39 = vld [vmem:[%s4353_s26 + $0x20] sm:$0xf] }
  0x58   : > { %3512 = vmatprep.mubr.msk.bf16.mxu1 %vm4026_vm0, %v4025_v1 }
  0x5b   : > { %3487 = vmatmul.mubr.msk.bf16.gmra.mxu0 %vm365_vm1, %v646_v22  ;;  %v944_v22 = vrot.slane %v942_v10, 1  ;;  %v1100_v10 = vsel %vm1091_vm3, %v1097_v48, %v1099_v12 }
  0x5c   : > { %3490 = vmatprep.mubr.msk.bf16.mxu0 %vm4026_vm0, %v4025_v1 }
  0x5f   : > { %3513 = vmatmul.mubr.msk.bf16.gmra.mxu1 %vm365_vm1, %v788_v28  ;;  %v948_v28 = vor.u32 %v947_v23, %v944_v22 }
  0x60   : > { %3516 = vmatprep.mubr.msk.bf16.mxu1 %vm4026_vm0, %v4025_v1 }
  0x61   : > { %v949_v44 = vsel %vm914_vm7, %v939_v58, %v948_v28 }
  0x63   : > { %3491 = vmatmul.mubr.msk.bf16.gmra.mxu0 %vm365_vm1, %v648_v34  ;;  %v951_v34 = vshrl.u32 %v4419_v37, 16  ;;  %v1102_v37 = vsel %vm1091_vm3, %v1099_v12, %v1101_v0 }
  0x64   : > { %3526 = vmatprep.mubr.msk.bf16.mxu0 %vm4026_vm0, %v4025_v1 }
  0x65   : > { %v953_v45 = vrot.slane %v951_v34, 1 }
  0x67   : > { %3517 = vmatmul.mubr.msk.bf16.gmra.mxu1 %vm365_vm1, %v790_v53  ;;  %v957_v49 = vor.u32 %v956_v47, %v953_v45  ;;  %v960_v53 = vshrl.u32 %v4443_v50, 16 }
  0x68   : > { %3552 = vmatprep.mubr.msk.bf16.mxu1 %vm4026_vm0, %v4025_v1 }
  0x69   : > { %v958_v59 = vsel %vm914_vm7, %v948_v28, %v957_v49  ;;  %v962_v63 = vrot.slane %v960_v53, 1  ;;  %v4718_v28 = vsel %vm1364_vm5, %v2643_v18, %v4534_v6 }
  0x6b   : > { %3527 = vmatmul.mubr.msk.bf16.vlgmr.msra.gmra.mxu0 %vm365_vm1, %v931_v56  ;;  %v963_v56 = vshll.u32 %v4443_v50, 16  ;;  %v3950_v50 = vld [vmem:[%s5277_s3 + $0x8] ss:$0 sps:$4 sm:$0xff]  }
  0x6c   : > { %3573 = vmatpush3.bf16.msra.mxu0 %v3943_v57  ;;  %3530 = vmatprep.mubr.msk.bf16.mxu0 %vm4026_vm0, %v4025_v1  ;;  %v1098_v57 = vsel %vm1091_vm3, %v1095_v25, %v1097_v48  ;;  %v4710_v25 = vld [vmem:[%s4353_s26 + $0x24] sm:$0xf]  ;;  %v2131_v48 = vsel %vm1715_vm8, %v3966_v60, 0 }
  0x6d   : > { %3574 = vmatprep.subr.bf16.mxu0 %v4025_v1  ;;  %v965_v3 = vrot.slane %v963_v56, 2 }
  0x6f   : > { %3553 = vmatmul.mubr.msk.bf16.vlgmr.msra.gmra.mxu1 %vm365_vm1, %v1094_v29  ;;  %v966_v8 = vor.u32 %v965_v3, %v962_v63  ;;  %v3951_v29 = vld [vmem:[%s5276_s2 + $0xc8] sm:$0xff]   ;;  %v1963_v63 = vrot.slane %v4467_v2, 1 }
  0x70   : > { %3575 = vmatpush3.bf16.msra.mxu0 %v3945_v11  ;;  %3599 = vmatpush3.bf16.msra.mxu1 %v3944_v19  ;;  %v3949_v11 = vld [vmem:[%s5276_s2 + $0xd0] sm:$0xff]   ;;  %v3953_v19 = vld [vmem:[%s5276_s2 + $0xc0] sm:$0xff]  }
  0x71   : > { %3576 = vmatprep.subr.bf16.mxu0 %v4025_v1  ;;  %3556 = vmatprep.mubr.msk.bf16.mxu1 %vm4026_vm0, %v4025_v1  ;;  %v967_v58 = vsel %vm914_vm7, %v957_v49, %v966_v8  ;;  %v3967_v8 = vld [vmem:[%s5277_s3 + $0x38] ss:$0 sps:$4 sm:$0xff]  }
  0x72   : > { %3600 = vmatprep.subr.bf16.mxu1 %v4025_v1 }
  0x73   : > { %3531 = vmatmul.mubr.msk.bf16.gmra.mxu0 %vm365_vm1, %v940_v20  ;;  %v3952_v20 = vld [vmem:[%s5277_s3] sm:$0xff]  }
  0x74   : > { %3534 = vmatprep.mubr.msk.bf16.mxu0 %vm4026_vm0, %v4025_v1  ;;  %3577 = vmatpush3.bf16.msra.mxu0 %v3947_v24 }
  0x75   : > { %3624 = vmatprep.subr.bf16.mxu0 %v4025_v1  ;;  %3601 = vmatpush3.bf16.msra.mxu1 %v3946_v26 }
  0x76   : > { %3602 = vmatprep.subr.bf16.mxu1 %v4025_v1 }
  0x77   : > { %3557 = vmatmul.mubr.msk.bf16.gmra.mxu1 %vm365_vm1, %v1096_v43  ;;  %v4735_v43 = vcombine.low %v4707_v39, %v4710_v25 }
  0x78   : > { %3560 = vmatprep.mubr.msk.bf16.mxu1 %vm4026_vm0, %v4025_v1 }
  0x79   : > { %3603 = vmatpush3.bf16.msra.mxu1 %v3948_v32 }
  0x7a   : > { %3650 = vmatprep.subr.bf16.mxu1 %v4025_v1 }
  0x7b   : > { %3535 = vmatmul.mubr.msk.bf16.gmra.mxu0 %vm365_vm1, %v949_v44 }
  0x7c   : > { %3538 = vmatprep.mubr.msk.bf16.mxu0 %vm4026_vm0, %v4025_v1 }
  0x7f   : > { %3561 = vmatmul.mubr.msk.bf16.gmra.mxu1 %vm365_vm1, %v1098_v57 }
  0x80   : > { %3564 = vmatprep.mubr.msk.bf16.mxu1 %vm4026_vm0, %v4025_v1 }
  0x83   : > { %3539 = vmatmul.mubr.msk.bf16.gmra.mxu0 %vm365_vm1, %v958_v59 }
  0x84   : > { %3542 = vmatprep.mubr.msk.bf16.mxu0 %vm4026_vm0, %v4025_v1 }
  0x87   : > { %3565 = vmatmul.mubr.msk.bf16.gmra.mxu1 %vm365_vm1, %v1100_v10  ;;  %v1821_v10 = vor.u32 %v1819_v16, %v1817_v35 }
  0x88   : > { %3568 = vmatprep.mubr.msk.bf16.mxu1 %vm4026_vm0, %v4025_v1 }
  0x8b   : > { %3543 = vmatmul.mubr.msk.bf16.gmra.mxu0 %vm365_vm1, %v967_v58  ;;  %v1824_v58 = vrot.slane %v1822_v46, 1  ;;  %v2298_v46 = vsel %vm1715_vm8, %v3967_v8, 0 }
  0x8c   : > { %3578 = vmatprep.mubr.msk.bf16.mxu0 %vm4026_vm0, %v4025_v1 }
  0x8f   : > { %3569 = vmatmul.mubr.msk.bf16.gmra.mxu1 %vm365_vm1, %v1102_v37 }
  0x90   : > { %3604 = vmatprep.mubr.msk.bf16.mxu1 %vm4026_vm0, %v4025_v1 }
  0x93   : > { %3579 = vmatmul.mubr.msk.bf16.vlgmr.msra.gmra.mxu0 %vm365_vm1, %v4282_v7  ;;  %v1717_v7 = vsel %vm1715_vm8, %v3950_v50, 0 }
  0x94   : > { %3625 = vmatpush3.bf16.msra.mxu0 %v3949_v11  ;;  %3582 = vmatprep.mubr.msk.bf16.mxu0 %vm4026_vm0, %v4025_v1 }
  0x95   : > { %3626 = vmatprep.subr.bf16.mxu0 %v4025_v1 }
  0x97   : > { %3605 = vmatmul.mubr.msk.bf16.vlgmr.msra.gmra.mxu1 %vm365_vm1, %v4286_v9  ;;  %v3955_v9 = vld [vmem:[%s5277_s3 + $0x14] ss:$0 sps:$4 sm:$0xff]  }
  0x98   : > { %3627 = vmatpush3.bf16.msra.mxu0 %v3951_v29  ;;  %3651 = vmatpush3.bf16.msra.mxu1 %v1717_v7 }
  0x99   : > { %3628 = vmatprep.subr.bf16.mxu0 %v4025_v1  ;;  %3608 = vmatprep.mubr.msk.bf16.mxu1 %vm4026_vm0, %v4025_v1 }
  0x9a   : > { %3652 = vmatprep.subr.bf16.mxu1 %v4025_v1 }
  0x9b   : > { %3583 = vmatmul.mubr.msk.bf16.gmra.mxu0 %vm365_vm1, %v4290_v17  ;;  %v1873_v17 = vsel %vm1715_vm8, %v3955_v9, 0 }
  0x9c   : > { %3586 = vmatprep.mubr.msk.bf16.mxu0 %vm4026_vm0, %v4025_v1  ;;  %3629 = vmatpush3.bf16.msra.mxu0 %v3953_v19 }
  0x9d   : > { %3674 = vmatprep.subr.bf16.mxu0 %v4025_v1  ;;  %3653 = vmatpush3.bf16.msra.mxu1 %v3952_v20  ;;  %v1825_v20 = vsel %vm474_vm2, %v1821_v10, %v1824_v58 }
  0x9e   : > { %3698 = vmatprep.subr.bf16.mxu1 %v4025_v1 }
  0x9f   : > { %3609 = vmatmul.mubr.msk.bf16.gmra.mxu1 %vm365_vm1, %v4308_v30  ;;  %v4643_v30 = vld [vmem:[%s4353_s26 + $0x4] sm:$0xf] }
  0xa0   : > { %3612 = vmatprep.mubr.msk.bf16.mxu1 %vm4026_vm0, %v4025_v1 }
  0xa3   : > { %3587 = vmatmul.mubr.msk.bf16.gmra.mxu0 %vm365_vm1, %v4294_v21  ;;  %v1649_v21 = vld [vmem:[%s4353_s26] sm:$0xf] }
  0xa4   : > { %3590 = vmatprep.mubr.msk.bf16.mxu0 %vm4026_vm0, %v4025_v1 }
  0xa7   : > { %3613 = vmatmul.mubr.msk.bf16.gmra.mxu1 %vm365_vm1, %v4315_v40  ;;  %v3962_v40 = vld [vmem:[%s5277_s3 + $0xc] sm:$0xff]  }
  0xa8   : > { %3616 = vmatprep.mubr.msk.bf16.mxu1 %vm4026_vm0, %v4025_v1 }
  0xab   : > { %3591 = vmatmul.mubr.msk.bf16.gmra.mxu0 %vm365_vm1, %v4311_v33  ;;  %v3957_v33 = vld [vmem:[%s5277_s3 + $0x20] ss:$0 sps:$4 sm:$0xff]  }
  0xac   : > { %3594 = vmatprep.mubr.msk.bf16.mxu0 %vm4026_vm0, %v4025_v1 }
  0xaf   : > { %3617 = vmatmul.mubr.msk.bf16.gmra.mxu1 %vm365_vm1, %v4333_v55  ;;  %v3963_v55 = vld [vmem:[%s5277_s3 + $0x18] sm:$0xff]  }
  0xb0   : > { %3620 = vmatprep.mubr.msk.bf16.mxu1 %vm4026_vm0, %v4025_v1 }
  0xb3   : > { %3595 = vmatmul.mubr.msk.bf16.gmra.mxu0 %vm365_vm1, %v4318_v42  ;;  %v4655_v42 = vcombine.low %v1649_v21, %v4643_v30 }
  0xb4   : > { %3630 = vmatprep.mubr.msk.bf16.mxu0 %vm4026_vm0, %v4025_v1 }
  0xb5   : > { %v1809_v23 = vshrl.u32 %v4655_v42, 16  ;;  %v1962_v59 = vrot.slane %v4655_v42, 1 }
  0xb7   : > { %3621 = vmatmul.mubr.msk.bf16.gmra.mxu1 %vm365_vm1, %v4340_v61  ;;  %v4687_v61 = vld [vmem:[%s4353_s26 + $0x18] sm:$0xf]  ;;  %v1964_v16 = vsel %vm637_vm4, %v1962_v59, %v1963_v63 }
  0xb8   : > { %3654 = vmatprep.mubr.msk.bf16.mxu1 %vm4026_vm0, %v4025_v1 }
  0xbb   : > { %3631 = vmatmul.mubr.msk.bf16.vlgmr.msra.gmra.mxu0 %vm365_vm1, %v4330_v54  ;;  %v1998_v54 = vsel %vm1715_vm8, %v3957_v33, 0 }
  0xbc   : > { %3675 = vmatpush3.bf16.msra.mxu0 %v1873_v17  ;;  %3634 = vmatprep.mubr.msk.bf16.mxu0 %vm4026_vm0, %v4025_v1 }
  0xbd   : > { %3676 = vmatprep.subr.bf16.mxu0 %v4025_v1 }
  0xbf   : > { %3655 = vmatmul.mubr.msk.bf16.vlgmr.msra.gmra.mxu1 %vm1699_vm9, %v4655_v42 }
  0xc0   : > { %3677 = vmatpush3.bf16.msra.mxu0 %v3962_v40  ;;  %3699 = vmatpush3.bf16.msra.mxu1 %v1998_v54  ;;  %v1965_v40 = vrot.slane %v4501_v36, 1 }
  0xc1   : > { %3722 = vmatprep.subr.bf16.mxu0 %v4025_v1  ;;  %3658 = vmatprep.mubr.msk.bf16.mxu1 %vm4026_vm0, %v4025_v1 }
  0xc2   : > { %3700 = vmatprep.subr.bf16.mxu1 %v4025_v1  ;;  %v1966_v60 = vsel %vm637_vm4, %v1963_v63, %v1965_v40 }
  0xc3   : > { %3635 = vmatmul.mubr.msk.bf16.gmra.mxu0 %vm365_vm1, %v4346_v62  ;;  %v4690_v62 = vld [vmem:[%s4353_s26 + $0x1c] sm:$0xf] }
  0xc4   : > { %3638 = vmatprep.mubr.msk.bf16.mxu0 %vm4026_vm0, %v4025_v1  ;;  %3701 = vmatpush3.bf16.msra.mxu1 %v3963_v55  ;;  %v4697_v22 = vcombine.low %v4687_v61, %v4690_v62  ;;  %v1828_v55 = vor.u32 %v1826_v4, %v1824_v58  ;;  %v1836_v4 = vshll.u32 %v4735_v43, 16 }
  0xc5   : > { %3746 = vmatprep.subr.bf16.mxu1 %v4025_v1 }
  0xc6   : > { %v1829_v26 = vshll.u32 %v4697_v22, 16  ;;  %v1833_v14 = vshrl.u32 %v4697_v22, 16  ;;  %v1838_v59 = vrot.slane %v1836_v4, 1 }
  0xc7   : > { %3659 = vmatmul.mubr.msk.bf16.gmra.mxu1 %vm1699_vm9, %v4467_v2 }
  0xc8   : > { %3662 = vmatprep.mubr.msk.bf16.mxu1 %vm4026_vm0, %v4025_v1  ;;  %v2649_v18 = vrot.slane %v1829_v26, 3  ;;  %v2648_v47 = vrot.slane %v1833_v14, 2 }
  0xca   : > { %v4742_v49 = vor.u32 %v2649_v18, %v2648_v47 }
  0xcb   : > { %3639 = vmatmul.mubr.msk.bf16.gmra.mxu0 %vm365_vm1, %v4385_v27  ;;  %v1811_v27 = vshll.u32 %v4655_v42, 16  ;;  %v3969_v42 = vld [vmem:[%s5277_s3 + $0x30] sm:$0xff]  }
  0xcc   : > { %3642 = vmatprep.mubr.msk.bf16.mxu0 %vm4026_vm0, %v4025_v1  ;;  %v4756_v3 = vsel %vm1364_vm5, %v4534_v6, %v4742_v49  ;;  %v3968_v6 = vld [vmem:[%s5277_s3 + $0x24] sm:$0xff]  }
  0xcd   : > { %v1813_v24 = vrot.slane %v1811_v27, 1  ;;  %v1831_v27 = vrot.slane %v1829_v26, 1 }
  0xcf   : > { %3663 = vmatmul.mubr.msk.bf16.gmra.mxu1 %vm1699_vm9, %v4501_v36  ;;  %v1814_v34 = vor.u32 %v1813_v24, %v1809_v23 }
  0xd0   : > { %3666 = vmatprep.mubr.msk.bf16.mxu1 %vm4026_vm0, %v4025_v1 }
  0xd1   : > { %v1818_v5 = vsel %vm474_vm2, %v1814_v34, %v1817_v35 }
  0xd3   : > { %3643 = vmatmul.mubr.msk.bf16.gmra.mxu0 %vm365_vm1, %v4411_v38 }
  0xd4   : > { %3646 = vmatprep.mubr.msk.bf16.mxu0 %vm4026_vm0, %v4025_v1 }
  0xd7   : > { %3667 = vmatmul.mubr.msk.bf16.gmra.mxu1 %vm1699_vm9, %v4697_v22 }
  0xd8   : > { %3670 = vmatprep.mubr.msk.bf16.mxu1 %vm4026_vm0, %v4025_v1 }
  0xdb   : > { %v415_v38 = vpop.f32.mrf.mxu0  ;;  %3647 = vmatmul.mubr.msk.bf16.gmra.mxu0 %vm365_vm1, %v4431_v31  ;;  %v4723_v31 = vld [vmem:[%s5278_s4] ss:$0 sm:$0xff] }
  0xdc   : > { %3678 = vmatprep.mubr.msk.bf16.mxu0 %vm4026_vm0, %v4025_v1  ;;  %v454_v44 = vadd.f32 %v4723_v31, %v415_v38 }
  0xdd   : > { %v3424_v41 = vpop.f32.mrf.mxu0 }
  0xdf   : > { %v418_v45 = vpop.f32.mrf.mxu0  ;;  %v581_v53 = vpop.f32.mrf.mxu1  ;;  %3671 = vmatmul.mubr.msk.bf16.gmra.mxu1 %vm1699_vm9, %v4735_v43 }
  0xe0   : > { %v4746_v56 = vadd.f32 %v581_v53, %v454_v44  ;;  %3702 = vmatprep.mubr.msk.bf16.mxu1 %vm4026_vm0, %v4025_v1  ;;  %v455_v0 = vadd.f32 %v4723_v31, %v418_v45  ;;  %v1832_v44 = vsel %vm474_vm2, %v1828_v55, %v1831_v27  ;;  %v4803_v45 = vld [vmem:[%s4353_s26 + $0x28] sm:$0xf] }
  0xe1   : > { %v3425_v32 = vpop.f32.mrf.mxu0  ;;  %v3450_v12 = vpop.f32.mrf.mxu1  ;;  %v3193_v63 = vcombine.low %v4803_v45, %v4803_v45 }
  0xe3   : > { %v423_v57 = vpop.f32.mrf.mxu0  ;;  %3679 = vmatmul.mubr.msk.bf16.vlgmr.msra.gmra.mxu0 %vm1699_vm9, %v1818_v5  ;;  %v584_v11 = vpop.f32.mrf.mxu1 }
  0xe4   : > { %3723 = vmatpush3.bf16.msra.mxu0 %v2131_v48  ;;  %3682 = vmatprep.mubr.msk.bf16.mxu0 %vm4026_vm0, %v4025_v1  ;;  %v456_v50 = vadd.f32 %v4723_v31, %v423_v57  ;;  %v4773_v29 = vadd.f32 %v584_v11, %v455_v0  ;;  %v1967_v48 = vrot.slane %v4697_v22, 1  ;;  %v1835_v57 = vor.u32 %v1833_v14, %v1831_v27 }
  0xe5   : > { %v3428_v37 = vpop.f32.mrf.mxu0  ;;  %3724 = vmatprep.subr.bf16.mxu0 %v4025_v1  ;;  %v3451_v19 = vpop.f32.mrf.mxu1 }
  0xe6   : > { %v1968_v14 = vsel %vm637_vm4, %v1965_v40, %v1967_v48  ;;  %v1839_v11 = vsel %vm474_vm2, %v1835_v57, %v1838_v59 }
  0xe7   : > { %v426_v7 = vpop.f32.mrf.mxu0  ;;  %v589_v17 = vpop.f32.mrf.mxu1  ;;  %3703 = vmatmul.mubr.msk.bf16.vlgmr.msra.gmra.mxu1 %vm1699_vm9, %v1964_v16 }
  0xe8   : > { %3725 = vmatpush3.bf16.msra.mxu0 %v3968_v6  ;;  %v4780_v21 = vadd.f32 %v589_v17, %v456_v50  ;;  %3747 = vmatpush3.bf16.msra.mxu1 %v2298_v46  ;;  %v457_v23 = vadd.f32 %v4723_v31, %v426_v7  ;;  %v1840_v50 = vshrl.u32 %v4735_v43, 16  ;;  %v1844_v7 = vshll.u32 %v3193_v63, 16 }
  0xe9   : > { %v3429_v9 = vpop.f32.mrf.mxu0  ;;  %3770 = vmatprep.subr.bf16.mxu0 %v4025_v1  ;;  %v3454_v54 = vpop.f32.mrf.mxu1  ;;  %3706 = vmatprep.mubr.msk.bf16.mxu1 %vm4026_vm0, %v4025_v1 }
  0xea   : > { %3748 = vmatprep.subr.bf16.mxu1 %v4025_v1  ;;  %v1969_v9 = vrot.slane %v4735_v43, 1  ;;  %v1846_v40 = vrot.slane %v1844_v7, 1 }
  0xeb   : > { %v431_v33 = vpop.f32.mrf.mxu0  ;;  %3683 = vmatmul.mubr.msk.bf16.gmra.mxu0 %vm1699_vm9, %v1825_v20  ;;  %v592_v38 = vpop.f32.mrf.mxu1 }
  0xec   : > { %3686 = vmatprep.mubr.msk.bf16.mxu0 %vm4026_vm0, %v4025_v1  ;;  %v458_v34 = vadd.f32 %v4723_v31, %v431_v33  ;;  %v4796_v35 = vadd.f32 %v592_v38, %v457_v23  ;;  %3749 = vmatpush3.bf16.msra.mxu1 %v3969_v42  ;;  %v1842_v33 = vor.u32 %v1840_v50, %v1838_v59 }
  0xed   : > { %v3432_v24 = vpop.f32.mrf.mxu0  ;;  %v3455_v18 = vpop.f32.mrf.mxu1  ;;  %3794 = vmatprep.subr.bf16.mxu1 %v4025_v1  ;;  %v1970_v38 = vsel %vm637_vm4, %v1967_v48, %v1969_v9 }
  0xee   : > { %v1847_v18 = vsel %vm474_vm2, %v1842_v33, %v1846_v40 }
  0xef   : > { %v434_v41 = vpop.f32.mrf.mxu0  ;;  %v597_v47 = vpop.f32.mrf.mxu1  ;;  %3707 = vmatmul.mubr.msk.bf16.gmra.mxu1 %vm1699_vm9, %v1966_v60 }
  0xf0   : > { %v4806_v5 = vadd.f32 %v597_v47, %v458_v34  ;;  %3710 = vmatprep.mubr.msk.bf16.mxu1 %vm4026_vm0, %v4025_v1  ;;  %v459_v12 = vadd.f32 %v4723_v31, %v434_v41  ;;  %v4845_v34 = vcombine.low %v4643_v30, %v4455_v51  ;;  %v4849_v41 = vcombine.low %v4458_v52, %v4479_v13 }
  0xf1   : > { %v3433_v26 = vpop.f32.mrf.mxu0  ;;  %v3458_v53 = vpop.f32.mrf.mxu1  ;;  %v1971_v51 = vrot.slane %v3193_v63, 1  ;;  %v3973_v63 = vld [vmem:[%s5277_s3 + $0x44] ss:$0 sps:$4 sm:$0xff]  }
  0xf2   : > { %v2221_v47 = vshrl.u32 %v4845_v34, 16  ;;  %v2229_v52 = vshrl.u32 %v4849_v41, 16  ;;  %v2232_v13 = vshll.u32 %v4849_v41, 16  ;;  %v2095_v59 = vrot.slane %v4845_v34, 1 }
  0xf3   : > { %v439_v32 = vpop.f32.mrf.mxu0  ;;  %3687 = vmatmul.mubr.msk.bf16.gmra.mxu0 %vm1699_vm9, %v1832_v44  ;;  %v600_v10 = vpop.f32.mrf.mxu1  ;;  %v2423_v40 = vsel %vm1715_vm8, %v3973_v63, 0 }
  0xf4   : > { %3690 = vmatprep.mubr.msk.bf16.mxu0 %vm4026_vm0, %v4025_v1  ;;  %v460_v58 = vadd.f32 %v4723_v31, %v439_v32  ;;  %v4822_v6 = vadd.f32 %v600_v10, %v459_v12  ;;  %v2224_v32 = vshll.u32 %v4845_v34, 16  ;;  %v2096_v12 = vrot.slane %v4849_v41, 1 }
  0xf5   : > { %v3436_v8 = vpop.f32.mrf.mxu0  ;;  %v3459_v37 = vpop.f32.mrf.mxu1  ;;  %v2231_v7 = vrot.slane %v2229_v52, 1 }
  0xf7   : > { %v442_v0 = vpop.f32.mrf.mxu0  ;;  %v605_v19 = vpop.f32.mrf.mxu1  ;;  %3711 = vmatmul.mubr.msk.bf16.gmra.mxu1 %vm1699_vm9, %v1968_v14  ;;  %v2226_v14 = vrot.slane %v2224_v32, 2 }
  0xf8   : > { %v4828_v46 = vadd.f32 %v605_v19, %v460_v58  ;;  %3714 = vmatprep.mubr.msk.bf16.mxu1 %vm4026_vm0, %v4025_v1  ;;  %v461_v42 = vadd.f32 %v4723_v31, %v442_v0  ;;  %v2223_v0 = vrot.slane %v2221_v47, 1 }
  0xf9   : > { %v3437_v16 = vpop.f32.mrf.mxu0  ;;  %v3462_v17 = vpop.f32.mrf.mxu1 }
  0xfa   : > { %v2234_v16 = vrot.slane %v2232_v13, 2  ;;  %v4878_v17 = vcombine.low %v4482_v15, %v4687_v61 }
  0xfb   : > { %v447_v20 = vpop.f32.mrf.mxu0  ;;  %3691 = vmatmul.mubr.msk.bf16.gmra.mxu0 %vm1699_vm9, %v1839_v11  ;;  %v608_v55 = vpop.f32.mrf.mxu1  ;;  %v1972_v11 = vsel %vm637_vm4, %v1969_v9, %v1971_v51 }
  0xfc   : > { %3694 = vmatprep.mubr.msk.bf16.mxu0 %vm4026_vm0, %v4025_v1  ;;  %v462_v27 = vadd.f32 %v4723_v31, %v447_v20  ;;  %v4840_v23 = vadd.f32 %v608_v55, %v461_v42  ;;  %v2241_v15 = vshll.u32 %v4878_v17, 16 }
  0xfd   : > { %v3440_v54 = vpop.f32.mrf.mxu0  ;;  %v3463_v60 = vpop.f32.mrf.mxu1 }
  0xfe   : > { %v2227_v54 = vor.u32 %v2226_v14, %v2223_v0  ;;  %v2098_v60 = vrot.slane %v4878_v17, 1  ;;  %v2243_v51 = vrot.slane %v2241_v15, 2 }
  0xff   : > { %v450_v24 = vpop.f32.mrf.mxu0  ;;  %v613_v26 = vpop.f32.mrf.mxu1  ;;  %3715 = vmatmul.mubr.msk.bf16.gmra.mxu1 %vm1699_vm9, %v1970_v38  ;;  %v3974_v38 = vld [vmem:[%s5277_s3 + $0x50] ss:$0 sps:$4 sm:$0xff]  }
 0x100   : > { %v4855_v48 = vadd.f32 %v613_v26, %v462_v27  ;;  %3718 = vmatprep.mubr.msk.bf16.mxu1 %vm4026_vm0, %v4025_v1  ;;  %v463_v8 = vadd.f32 %v4723_v31, %v450_v24  ;;  %v2097_v31 = vsel %vm637_vm4, %v2095_v59, %v2096_v12  ;;  %v2238_v27 = vshrl.u32 %v4878_v17, 16 }
 0x101   : > { %v3441_v44 = vpop.f32.mrf.mxu0  ;;  %v3466_v30 = vpop.f32.mrf.mxu1  ;;  %v4908_v59 = vcombine.low %v4690_v62, %v4707_v39  ;;  %v3978_v62 = vld [vmem:[%s5277_s3 + $0x48] sm:$0xff]  }
 0x102   : > { %v2552_v30 = vsel %vm1715_vm8, %v3974_v38, 0 }
 0x103   : > { %v716_v53 = vpop.f32.mrf.mxu0  ;;  %3695 = vmatmul.mubr.msk.bf16.gmra.mxu0 %vm1699_vm9, %v1847_v18  ;;  %v616_v58 = vpop.f32.mrf.mxu1  ;;  %v3977_v18 = vld [vmem:[%s5277_s3 + $0x3c] sm:$0xff]   ;;  %v2250_v0 = vshll.u32 %v4908_v59, 16 }
 0x104   : > { %v755_v57 = vadd.f32 %v716_v53, %v4746_v56  ;;  %3726 = vmatprep.mubr.msk.bf16.mxu0 %vm4026_vm0, %v4025_v1  ;;  %v4871_v37 = vadd.f32 %v616_v58, %v463_v8  ;;  %v2240_v53 = vrot.slane %v2238_v27, 1 }
 0x105   : > { %v3476_v10 = vpop.f32.mrf.mxu0  ;;  %v3467_v19 = vpop.f32.mrf.mxu1 }
 0x107   : > { %v719_v56 = vpop.f32.mrf.mxu0  ;;  %v858_v42 = vpop.f32.mrf.mxu1  ;;  %3719 = vmatmul.mubr.msk.bf16.gmra.mxu1 %vm1699_vm9, %v1972_v11 }
 0x108   : > { %v756_v20 = vadd.f32 %v719_v56, %v4773_v29  ;;  %v4882_v55 = vadd.f32 %v858_v42, %v755_v57  ;;  %3750 = vmatprep.mubr.msk.bf16.mxu1 %vm4026_vm0, %v4025_v1  ;;  %v2235_v29 = vor.u32 %v2234_v16, %v2231_v7  ;;  %v2099_v57 = vsel %vm637_vm4, %v2096_v12, %v2098_v60 }
 0x109   : > { %v3477_v33 = vpop.f32.mrf.mxu0  ;;  %v3502_v61 = vpop.f32.mrf.mxu1  ;;  %v2247_v12 = vshrl.u32 %v4908_v59, 16  ;;  %v2100_v56 = vrot.slane %v4908_v59, 1 }
 0x10a   : > { %v2236_v32 = vsel %vm914_vm7, %v2227_v54, %v2235_v29  ;;  %v2252_v33 = vrot.slane %v2250_v0, 2 }
 0x10b   : > { %v724_v9 = vpop.f32.mrf.mxu0  ;;  %3727 = vmatmul.mubr.msk.bf16.vlgmr.msra.gmra.mxu0 %vm1699_vm9, %v2097_v31  ;;  %v861_v26 = vpop.f32.mrf.mxu1  ;;  %v2249_v31 = vrot.slane %v2247_v12, 1  ;;  %v2101_v54 = vsel %vm637_vm4, %v2098_v60, %v2100_v56 }
 0x10c   : > { %v757_v24 = vadd.f32 %v724_v9, %v4780_v21  ;;  %3771 = vmatpush3.bf16.msra.mxu0 %v2423_v40  ;;  %3730 = vmatprep.mubr.msk.bf16.mxu0 %vm4026_vm0, %v4025_v1  ;;  %v4900_v47 = vadd.f32 %v861_v26, %v756_v20 }
 0x10d   : > { %v3480_v44 = vpop.f32.mrf.mxu0  ;;  %3772 = vmatprep.subr.bf16.mxu0 %v4025_v1  ;;  %v3503_v52 = vpop.f32.mrf.mxu1 }
 0x10f   : > { %v727_v21 = vpop.f32.mrf.mxu0  ;;  %v866_v10 = vpop.f32.mrf.mxu1  ;;  %3751 = vmatmul.mubr.msk.bf16.vlgmr.msra.gmra.mxu1 %vm1699_vm9, %v2236_v32 }
 0x110   : > { %v758_v13 = vadd.f32 %v727_v21, %v4796_v35  ;;  %3773 = vmatpush3.bf16.msra.mxu0 %v3977_v18  ;;  %v4912_v63 = vadd.f32 %v866_v10, %v757_v24  ;;  %3795 = vmatpush3.bf16.msra.mxu1 %v2552_v30  ;;  %v2244_v35 = vor.u32 %v2243_v51, %v2240_v53  ;;  %v4950_v18 = vld [vmem:[%s4353_s26 + $0x2c] sm:$0xf] }
 0x111   : > { %v3481_v8 = vpop.f32.mrf.mxu0  ;;  %3818 = vmatprep.subr.bf16.mxu0 %v4025_v1  ;;  %v3506_v39 = vpop.f32.mrf.mxu1  ;;  %3754 = vmatprep.mubr.msk.bf16.mxu1 %vm4026_vm0, %v4025_v1 }
 0x112   : > { %3796 = vmatprep.subr.bf16.mxu1 %v4025_v1  ;;  %v2245_v20 = vsel %vm914_vm7, %v2235_v29, %v2244_v35 }
 0x113   : > { %v732_v58 = vpop.f32.mrf.mxu0  ;;  %3731 = vmatmul.mubr.msk.bf16.gmra.mxu0 %vm1699_vm9, %v2099_v57  ;;  %v869_v7 = vpop.f32.mrf.mxu1  ;;  %v4959_v57 = vcombine.low %v4950_v18, %v4950_v18 }
 0x114   : > { %v759_v14 = vadd.f32 %v732_v58, %v4806_v5  ;;  %3734 = vmatprep.mubr.msk.bf16.mxu0 %vm4026_vm0, %v4025_v1  ;;  %v4927_v16 = vadd.f32 %v869_v7, %v758_v13  ;;  %3797 = vmatpush3.bf16.msra.mxu1 %v3978_v62  ;;  %v4932_v5 = vcombine.low %v4710_v25, %v4803_v45 }
 0x115   : > { %v3484_v11 = vpop.f32.mrf.mxu0  ;;  %v3507_v40 = vpop.f32.mrf.mxu1  ;;  %3842 = vmatprep.subr.bf16.mxu1 %v4025_v1  ;;  %v2253_v25 = vor.u32 %v2252_v33, %v2249_v31  ;;  %v2268_v0 = vshll.u32 %v4959_v57, 16 }
 0x116   : > { %v2259_v61 = vshll.u32 %v4932_v5, 16  ;;  %v2102_v60 = vrot.slane %v4932_v5, 1 }
 0x117   : > { %v735_v19 = vpop.f32.mrf.mxu0  ;;  %v874_v27 = vpop.f32.mrf.mxu1  ;;  %3755 = vmatmul.mubr.msk.bf16.gmra.mxu1 %vm1699_vm9, %v2245_v20  ;;  %v2254_v53 = vsel %vm914_vm7, %v2244_v35, %v2253_v25  ;;  %v2270_v33 = vrot.slane %v2268_v0, 2  ;;  %v3982_v0 = vld [vmem:[%s5277_s3 + $0x54] sm:$0xff]  }
 0x118   : > { %v760_v42 = vadd.f32 %v735_v19, %v4822_v6  ;;  %v4938_v29 = vadd.f32 %v874_v27, %v759_v14  ;;  %3758 = vmatprep.mubr.msk.bf16.mxu1 %vm4026_vm0, %v4025_v1  ;;  %v2256_v6 = vshrl.u32 %v4932_v5, 16  ;;  %v2261_v52 = vrot.slane %v2259_v61, 2 }
 0x119   : > { %v3485_v9 = vpop.f32.mrf.mxu0  ;;  %v3510_v24 = vpop.f32.mrf.mxu1  ;;  %v2104_v14 = vrot.slane %v4959_v57, 1 }
 0x11a   : > { %v2258_v51 = vrot.slane %v2256_v6, 1  ;;  %v2388_v24 = vrot.slane %v4849_v41, 2 }
 0x11b   : > { %v740_v15 = vpop.f32.mrf.mxu0  ;;  %3735 = vmatmul.mubr.msk.bf16.gmra.mxu0 %vm1699_vm9, %v2101_v54  ;;  %v877_v26 = vpop.f32.mrf.mxu1  ;;  %v2105_v54 = vsel %vm637_vm4, %v2102_v60, %v2104_v14 }
 0x11c   : > { %v761_v38 = vadd.f32 %v740_v15, %v4828_v46  ;;  %3738 = vmatprep.mubr.msk.bf16.mxu0 %vm4026_vm0, %v4025_v1  ;;  %v4952_v21 = vadd.f32 %v877_v26, %v760_v42  ;;  %v2103_v46 = vsel %vm637_vm4, %v2100_v56, %v2102_v60  ;;  %v2262_v35 = vor.u32 %v2261_v52, %v2258_v51  ;;  %v3980_v60 = vld [vmem:[%s5277_s3 + $0x5c] ss:$0 sps:$4 sm:$0xff]  }
 0x11d   : > { %v3488_v44 = vpop.f32.mrf.mxu0  ;;  %v3511_v13 = vpop.f32.mrf.mxu1 }
 0x11e   : > { %v2263_v20 = vsel %vm914_vm7, %v2253_v25, %v2262_v35 }
 0x11f   : > { %v743_v32 = vpop.f32.mrf.mxu0  ;;  %v882_v10 = vpop.f32.mrf.mxu1  ;;  %3759 = vmatmul.mubr.msk.bf16.gmra.mxu1 %vm1699_vm9, %v2254_v53 }
 0x120   : > { %v762_v30 = vadd.f32 %v743_v32, %v4840_v23  ;;  %v4962_v58 = vadd.f32 %v882_v10, %v761_v38  ;;  %3762 = vmatprep.mubr.msk.bf16.mxu1 %vm4026_vm0, %v4025_v1  ;;  %v2265_v23 = vshrl.u32 %v4959_v57, 16 }
 0x121   : > { %v3489_v8 = vpop.f32.mrf.mxu0  ;;  %v3514_v62 = vpop.f32.mrf.mxu1 }
 0x122   : > { %v2267_v31 = vrot.slane %v2265_v23, 1  ;;  %v2516_v8 = vrot.slane %v4467_v2, 2  ;;  %v2390_v23 = vrot.slane %v4878_v17, 2 }
 0x123   : > { %v748_v12 = vpop.f32.mrf.mxu0  ;;  %3739 = vmatmul.mubr.msk.bf16.gmra.mxu0 %vm1699_vm9, %v2103_v46  ;;  %v885_v11 = vpop.f32.mrf.mxu1 }
 0x124   : > { %v763_v39 = vadd.f32 %v748_v12, %v4855_v48  ;;  %3742 = vmatprep.mubr.msk.bf16.mxu0 %vm4026_vm0, %v4025_v1  ;;  %v4973_v7 = vadd.f32 %v885_v11, %v762_v30  ;;  %v2271_v25 = vor.u32 %v2270_v33, %v2267_v31  ;;  %v2391_v17 = vsel %vm1091_vm3, %v2388_v24, %v2390_v23 }
 0x125   : > { %v3492_v56 = vpop.f32.mrf.mxu0  ;;  %v3515_v40 = vpop.f32.mrf.mxu1 }
 0x126   : > { %v2272_v53 = vsel %vm914_vm7, %v2262_v35, %v2271_v25  ;;  %v3981_v35 = vld [vmem:[%s5277_s3 + $0x68] ss:$0 sps:$4 sm:$0xff]  }
 0x127   : > { %v751_v19 = vpop.f32.mrf.mxu0  ;;  %v890_v9 = vpop.f32.mrf.mxu1  ;;  %3763 = vmatmul.mubr.msk.bf16.gmra.mxu1 %vm1699_vm9, %v2263_v20  ;;  %v2824_v20 = vsel %vm1715_vm8, %v3981_v35, 0 }
 0x128   : > { %v764_v42 = vadd.f32 %v751_v19, %v4871_v37  ;;  %v4979_v27 = vadd.f32 %v890_v9, %v763_v39  ;;  %3766 = vmatprep.mubr.msk.bf16.mxu1 %vm4026_vm0, %v4025_v1  ;;  %v2387_v37 = vrot.slane %v4845_v34, 2  ;;  %v2699_v34 = vsel %vm1715_vm8, %v3980_v60, 0 }
 0x129   : > { %v3493_v48 = vpop.f32.mrf.mxu0  ;;  %v3518_v6 = vpop.f32.mrf.mxu1 }
 0x12a   : > { %v2389_v52 = vsel %vm1091_vm3, %v2387_v37, %v2388_v24 }
 0x12b   : > { %v1035_v15 = vpop.f32.mrf.mxu0  ;;  %3743 = vmatmul.mubr.msk.bf16.gmra.mxu0 %vm1699_vm9, %v2105_v54  ;;  %v893_v44 = vpop.f32.mrf.mxu1  ;;  %v2519_v54 = vrot.slane %v4697_v22, 2 }
 0x12c   : > { %v1074_v61 = vadd.f32 %v1035_v15, %v4882_v55  ;;  %3774 = vmatprep.mubr.msk.bf16.mxu0 %vm4026_vm0, %v4025_v1  ;;  %v4992_v26 = vadd.f32 %v893_v44, %v764_v42  ;;  %v2392_v15 = vrot.slane %v4908_v59, 2 }
 0x12d   : > { %v3528_v38 = vpop.f32.mrf.mxu0  ;;  %v3519_v51 = vpop.f32.mrf.mxu1 }
 0x12e   : > { %v2393_v60 = vsel %vm1091_vm3, %v2390_v23, %v2392_v15  ;;  %v2521_v51 = vrot.slane %v4735_v43, 2 }
 0x12f   : > { %v1038_v32 = vpop.f32.mrf.mxu0  ;;  %v1170_v41 = vpop.f32.mrf.mxu1  ;;  %3767 = vmatmul.mubr.msk.bf16.gmra.mxu1 %vm1699_vm9, %v2272_v53 }
 0x130   : > { %v1075_v55 = vadd.f32 %v1038_v32, %v4900_v47  ;;  %v4999_v30 = vadd.f32 %v1170_v41, %v1074_v61  ;;  %3798 = vmatprep.mubr.msk.bf16.mxu1 %vm4026_vm0, %v4025_v1  ;;  %v2517_v47 = vrot.slane %v4501_v36, 2  ;;  %v5056_v41 = vcombine.low %v4803_v45, %v4950_v18 }
 0x131   : > { %v3529_v13 = vpop.f32.mrf.mxu0  ;;  %v3554_v10 = vpop.f32.mrf.mxu1 }
 0x132   : > { %v2518_v56 = vsel %vm1091_vm3, %v2516_v8, %v2517_v47  ;;  %v2520_v24 = vsel %vm1091_vm3, %v2517_v47, %v2519_v54  ;;  %v2522_v47 = vsel %vm1091_vm3, %v2519_v54, %v2521_v51  ;;  %v2523_v45 = vrot.slane %v5056_v41, 2 }
 0x133   : > { %v1043_v46 = vpop.f32.mrf.mxu0  ;;  %3775 = vmatmul.mubr.msk.bf16.vlgmr.msra.gmra.mxu0 %vm1699_vm9, %v2389_v52  ;;  %v1173_v39 = vpop.f32.mrf.mxu1 }
 0x134   : > { %v1076_v12 = vadd.f32 %v1043_v46, %v4912_v63  ;;  %3819 = vmatpush3.bf16.msra.mxu0 %v2699_v34  ;;  %3778 = vmatprep.mubr.msk.bf16.mxu0 %vm4026_vm0, %v4025_v1  ;;  %v5017_v14 = vadd.f32 %v1173_v39, %v1075_v55 }
 0x135   : > { %v3532_v62 = vpop.f32.mrf.mxu0  ;;  %3820 = vmatprep.subr.bf16.mxu0 %v4025_v1  ;;  %v3555_v11 = vpop.f32.mrf.mxu1 }
 0x136   : > { %v2396_v62 = vrot.slane %v4959_v57, 2 }
 0x137   : > { %v1046_v63 = vpop.f32.mrf.mxu0  ;;  %v1178_v33 = vpop.f32.mrf.mxu1  ;;  %3799 = vmatmul.mubr.msk.bf16.vlgmr.msra.gmra.mxu1 %vm1699_vm9, %v2518_v56 }
 0x138   : > { %v1077_v19 = vadd.f32 %v1046_v63, %v4927_v16  ;;  %3821 = vmatpush3.bf16.msra.mxu0 %v3982_v0  ;;  %v5024_v40 = vadd.f32 %v1178_v33, %v1076_v12  ;;  %3843 = vmatpush3.bf16.msra.mxu1 %v2824_v20  ;;  %v3983_v16 = vld [vmem:[%s5277_s3 + $0x60] sm:$0xff]   ;;  %v5078_v20 = vld [vmem:[%s4353_s26 + $0x30] ss:$0 sps:$4 sm:$0xff]   ;;  %s3868_s26 = smul.u32 10, %s5293_s18 }
 0x139   : > { %v3533_v31 = vpop.f32.mrf.mxu0  ;;  %v3558_v48 = vpop.f32.mrf.mxu1  ;;  %3802 = vmatprep.mubr.msk.bf16.mxu1 %vm4026_vm0, %v4025_v1  ;;  %3844 = vmatprep.subr.bf16.mxu1 %v4025_v1 }
 0x13a   : > { %s292_s25 = sadd.s32 %s3869_s17, %s3868_s26 }
 0x13b   : > { %v1051_v42 = vpop.f32.mrf.mxu0  ;;  %3779 = vmatmul.mubr.msk.bf16.gmra.mxu0 %vm1699_vm9, %v2391_v17  ;;  %v1181_v6 = vpop.f32.mrf.mxu1  ;;  %s3042_s27 = sshll.u32 %s292_s25, 3 }
 0x13c   : > { %v1078_v9 = vadd.f32 %v1051_v42, %v4938_v29  ;;  %3782 = vmatprep.mubr.msk.bf16.mxu0 %vm4026_vm0, %v4025_v1  ;;  %v5038_v61 = vadd.f32 %v1181_v6, %v1077_v19  ;;  %3845 = vmatpush3.bf16.msra.mxu1 %v3983_v16  ;;  %v2524_v19 = vsel %vm1091_vm3, %v2521_v51, %v2523_v45  ;;  %v2525_v16 = vrot.slane %v5078_v20, 2  ;;  %s5228_s28 = scalar_lea.vmem %s5279_s5, %s3042_s27 }
 0x13d   : > { %v3536_v25 = vpop.f32.mrf.mxu0  ;;  %v3559_v38 = vpop.f32.mrf.mxu1 }
 0x13f   : > { %v1054_v37 = vpop.f32.mrf.mxu0  ;;  %v1186_v32 = vpop.f32.mrf.mxu1  ;;  %3803 = vmatmul.mubr.msk.bf16.gmra.mxu1 %vm1699_vm9, %v2520_v24 }
 0x140   : > { %v1079_v29 = vadd.f32 %v1054_v37, %v4952_v21  ;;  %v5044_v59 = vadd.f32 %v1186_v32, %v1078_v9  ;;  %3806 = vmatprep.mubr.msk.bf16.mxu1 %vm4026_vm0, %v4025_v1  ;;  %v2394_v21 = vrot.slane %v4932_v5, 2  ;;  %v2526_v37 = vsel %vm1091_vm3, %v2523_v45, %v2525_v16 }
 0x141   : > { %v3537_v44 = vpop.f32.mrf.mxu0  ;;  %v3562_v55 = vpop.f32.mrf.mxu1  ;;  %v2788_v32 = vrot.slane %v4467_v2, 3  ;;  %v2652_v2 = vrot.slane %v1840_v50, 2 }
 0x142   : > { %v2397_v33 = vsel %vm1091_vm3, %v2394_v21, %v2396_v62 }
 0x143   : > { %v1059_v53 = vpop.f32.mrf.mxu0  ;;  %3783 = vmatmul.mubr.msk.bf16.gmra.mxu0 %vm1699_vm9, %v2393_v60  ;;  %v1189_v34 = vpop.f32.mrf.mxu1 }
 0x144   : > { %v1080_v52 = vadd.f32 %v1059_v53, %v4962_v58  ;;  %3786 = vmatprep.mubr.msk.bf16.mxu0 %vm4026_vm0, %v4025_v1  ;;  %v5058_v46 = vadd.f32 %v1189_v34, %v1079_v29  ;;  %v2395_v58 = vsel %vm1091_vm3, %v2392_v15, %v2394_v21  ;;  %v2789_v53 = vrot.slane %v4501_v36, 3 }
 0x145   : > { %v3540_v13 = vpop.f32.mrf.mxu0  ;;  %v3563_v10 = vpop.f32.mrf.mxu1  ;;  %v2653_v36 = vrot.slane %v1836_v4, 3 }
 0x147   : > { %v1062_v8 = vpop.f32.mrf.mxu0  ;;  %v1194_v23 = vpop.f32.mrf.mxu1  ;;  %3807 = vmatmul.mubr.msk.bf16.gmra.mxu1 %vm1699_vm9, %v2522_v47  ;;  %v2654_v4 = vor.u32 %v2653_v36, %v2652_v2 }
 0x148   : > { %v1081_v12 = vadd.f32 %v1062_v8, %v4973_v7  ;;  %v5064_v5 = vadd.f32 %v1194_v23, %v1080_v52  ;;  %3810 = vmatprep.mubr.msk.bf16.mxu1 %vm4026_vm0, %v4025_v1  ;;  %v2660_v23 = vshll.u32 %v5056_v41, 16 }
 0x149   : > { %v3541_v35 = vpop.f32.mrf.mxu0  ;;  %v3566_v18 = vpop.f32.mrf.mxu1 }
 0x14a   : > { %v2657_v35 = vshrl.u32 %v5056_v41, 16 }
 0x14b   : > { %v1067_v0 = vpop.f32.mrf.mxu0  ;;  %3787 = vmatmul.mubr.msk.bf16.gmra.mxu0 %vm1699_vm9, %v2395_v58  ;;  %v1197_v63 = vpop.f32.mrf.mxu1 }
 0x14c   : > { %v1082_v7 = vadd.f32 %v1067_v0, %v4979_v27  ;;  %3790 = vmatprep.mubr.msk.bf16.mxu0 %vm4026_vm0, %v4025_v1  ;;  %v5074_v56 = vadd.f32 %v1197_v63, %v1081_v12  ;;  %v2662_v63 = vrot.slane %v2660_v23, 3 }
 0x14d   : > { %v3544_v39 = vpop.f32.mrf.mxu0  ;;  %v3567_v17 = vpop.f32.mrf.mxu1 }
 0x14e   : > { %v2659_v39 = vrot.slane %v2657_v35, 2 }
 0x14f   : > { %v1070_v11 = vpop.f32.mrf.mxu0  ;;  %v1202_v42 = vpop.f32.mrf.mxu1  ;;  %3811 = vmatmul.mubr.msk.bf16.gmra.mxu1 %vm1699_vm9, %v2524_v19 }
 0x150   : > { %v1083_v31 = vadd.f32 %v1070_v11, %v4992_v26  ;;  %v5083_v54 = vadd.f32 %v1202_v42, %v1082_v7  ;;  %3814 = vmatprep.mubr.msk.bf16.mxu1 %vm4026_vm0, %v4025_v1  ;;  %v2666_v42 = vshrl.u32 %v5078_v20, 16 }
 0x151   : > { %v3545_v27 = vpop.f32.mrf.mxu0  ;;  %v3570_v48 = vpop.f32.mrf.mxu1 }
 0x153   : > { %v1308_v57 = vpop.f32.mrf.mxu0  ;;  %3791 = vmatmul.mubr.msk.bf16.gmra.mxu0 %vm1699_vm9, %v2397_v33  ;;  %v1205_v15 = vpop.f32.mrf.mxu1  ;;  %v2793_v33 = vrot.slane %v4735_v43, 3 }
 0x154   : > { %v1347_v9 = vadd.f32 %v1308_v57, %v4999_v30  ;;  %3822 = vmatprep.mubr.msk.bf16.mxu0 %vm4026_vm0, %v4025_v1  ;;  %v5092_v25 = vadd.f32 %v1205_v15, %v1083_v31  ;;  %v2669_v57 = vshll.u32 %v5078_v20, 16 }
 0x155   : > { %v3580_v26 = vpop.f32.mrf.mxu0  ;;  %v3571_v24 = vpop.f32.mrf.mxu1 }
 0x156   : > { %v2671_v24 = vrot.slane %v2669_v57, 3 }
 0x157   : > { %v1311_v6 = vpop.f32.mrf.mxu0  ;;  %v1465_v60 = vpop.f32.mrf.mxu1  ;;  %3815 = vmatmul.mubr.msk.bf16.gmra.mxu1 %vm1699_vm9, %v2526_v37  ;;  %v2668_v37 = vrot.slane %v2666_v42, 2 }
 0x158   : > { %v1348_v38 = vadd.f32 %v1311_v6, %v5017_v14  ;;  %v5097_v44 = vadd.f32 %v1465_v60, %v1347_v9  ;;  %3846 = vmatprep.mubr.msk.bf16.mxu1 %vm4026_vm0, %v4025_v1 }
 0x159   : > { %v3581_v29 = vpop.f32.mrf.mxu0  ;;  %v3606_v51 = vpop.f32.mrf.mxu1 }
 0x15a   : > { %v2672_v51 = vor.u32 %v2671_v24, %v2668_v37 }
 0x15b   : > { %v1316_v30 = vpop.f32.mrf.mxu0  ;;  %3823 = vmatmul.mubr.msk.bf16.vlgmr.msra.gmra.mxu0 %vm1699_vm9, %v4718_v28  ;;  %v1468_v52 = vpop.f32.mrf.mxu1  ;;  %v2790_v28 = vsel %vm1521_vm6, %v2788_v32, %v2789_v53  ;;  %v2795_v32 = vrot.slane %v5056_v41, 3 }
 0x15c   : > { %v1349_v14 = vadd.f32 %v1316_v30, %v5024_v40  ;;  %3826 = vmatprep.mubr.msk.bf16.mxu0 %vm4026_vm0, %v4025_v1  ;;  %v5108_v21 = vadd.f32 %v1468_v52, %v1348_v38 }
 0x15d   : > { %v3584_v55 = vpop.f32.mrf.mxu0  ;;  %v3607_v34 = vpop.f32.mrf.mxu1 }
 0x15f   : > { %v1319_v13 = vpop.f32.mrf.mxu0  ;;  %v1473_v47 = vpop.f32.mrf.mxu1  ;;  %3847 = vmatmul.mubr.msk.bf16.vlgmr.msra.gmra.mxu1 %vm1699_vm9, %v2790_v28  ;;  %v2796_v28 = vsel %vm1521_vm6, %v2793_v33, %v2795_v32 }
 0x160   : > { %v1350_v8 = vadd.f32 %v1319_v13, %v5038_v61  ;;  %v5117_v10 = vadd.f32 %v1473_v47, %v1349_v14  ;;  %3850 = vmatprep.mubr.msk.bf16.mxu1 %vm4026_vm0, %v4025_v1  ;;  %v2791_v61 = vrot.slane %v4697_v22, 3  ;;  %v2797_v47 = vrot.slane %v5078_v20, 3 }
 0x161   : > { %v3585_v40 = vpop.f32.mrf.mxu0  ;;  %v3610_v58 = vpop.f32.mrf.mxu1 }
 0x162   : > { %v2792_v7 = vsel %vm1521_vm6, %v2789_v53, %v2791_v61  ;;  %v2794_v15 = vsel %vm1521_vm6, %v2791_v61, %v2793_v33  ;;  %v2798_v35 = vsel %vm1521_vm6, %v2795_v32, %v2797_v47 }
 0x163   : > { %v1324_v12 = vpop.f32.mrf.mxu0  ;;  %3827 = vmatmul.mubr.msk.bf16.gmra.mxu0 %vm1699_vm9, %v4756_v3  ;;  %v1476_v45 = vpop.f32.mrf.mxu1 }
 0x164   : > { %v1351_v50 = vadd.f32 %v1324_v12, %v5044_v59  ;;  %3830 = vmatprep.mubr.msk.bf16.mxu0 %vm4026_vm0, %v4025_v1  ;;  %v5129_v18 = vadd.f32 %v1476_v45, %v1350_v8  ;;  %v2655_v59 = vsel %vm1364_vm5, %v4742_v49, %v2654_v4  ;;  %v2663_v49 = vor.u32 %v2662_v63, %v2659_v39 }
 0x165   : > { %v3588_v0 = vpop.f32.mrf.mxu0  ;;  %v3611_v62 = vpop.f32.mrf.mxu1 }
 0x166   : > { %v2673_v2 = vsel %vm1364_vm5, %v2663_v49, %v2672_v51 }
 0x167   : > { %v1327_v3 = vpop.f32.mrf.mxu0  ;;  %v1481_v19 = vpop.f32.mrf.mxu1  ;;  %3851 = vmatmul.mubr.msk.bf16.gmra.mxu1 %vm1699_vm9, %v2792_v7 }
 0x168   : > { %v1352_v22 = vadd.f32 %v1327_v3, %v5058_v46  ;;  %v5136_v17 = vadd.f32 %v1481_v19, %v1351_v50  ;;  %3854 = vmatprep.mubr.msk.bf16.mxu1 %vm4026_vm0, %v4025_v1 }
 0x169   : > { %v3589_v11 = vpop.f32.mrf.mxu0  ;;  %v3614_v46 = vpop.f32.mrf.mxu1 }
 0x16b   : > { %v1332_v31 = vpop.f32.mrf.mxu0  ;;  %3831 = vmatmul.mubr.msk.bf16.gmra.mxu0 %vm1699_vm9, %v2655_v59  ;;  %v1484_v48 = vpop.f32.mrf.mxu1 }
 0x16c   : > { %v1353_v27 = vadd.f32 %v1332_v31, %v5064_v5  ;;  %3834 = vmatprep.mubr.msk.bf16.mxu0 %vm4026_vm0, %v4025_v1  ;;  %v5147_v9 = vadd.f32 %v1484_v48, %v1352_v22  ;;  %v2664_v5 = vsel %vm1364_vm5, %v2654_v4, %v2663_v49 }
 0x16d   : > { %v3592_v16 = vpop.f32.mrf.mxu0  ;;  %v3615_v6 = vpop.f32.mrf.mxu1 }
 0x16f   : > { %v1335_v26 = vpop.f32.mrf.mxu0  ;;  %v1489_v29 = vpop.f32.mrf.mxu1  ;;  %3855 = vmatmul.mubr.msk.bf16.gmra.mxu1 %vm1699_vm9, %v2794_v15 }
 0x170   : > { %v1354_v43 = vadd.f32 %v1335_v26, %v5074_v56  ;;  %v5153_v60 = vadd.f32 %v1489_v29, %v1353_v27  ;;  %3858 = vmatprep.mubr.msk.bf16.mxu1 %vm4026_vm0, %v4025_v1 }
 0x171   : > { %v3593_v38 = vpop.f32.mrf.mxu0  ;;  %v3618_v53 = vpop.f32.mrf.mxu1 }
 0x173   : > { %v1340_v30 = vpop.f32.mrf.mxu0  ;;  %3835 = vmatmul.mubr.msk.bf16.gmra.mxu0 %vm1699_vm9, %v2664_v5  ;;  %v1492_v55 = vpop.f32.mrf.mxu1 }
 0x174   : > { %v1355_v56 = vadd.f32 %v1340_v30, %v5083_v54  ;;  %3838 = vmatprep.mubr.msk.bf16.mxu0 %vm4026_vm0, %v4025_v1  ;;  %v1511_v52 = vadd.f32 %v1492_v55, %v1354_v43 }
 0x175   : > { %v3596_v14 = vpop.f32.mrf.mxu0  ;;  %v3619_v34 = vpop.f32.mrf.mxu1 }
 0x177   : > { %v1343_v13 = vpop.f32.mrf.mxu0  ;;  %v1497_v41 = vpop.f32.mrf.mxu1  ;;  %3859 = vmatmul.mubr.msk.bf16.gmra.mxu1 %vm1699_vm9, %v2796_v28 }
 0x178   : > { %v1356_v8 = vadd.f32 %v1343_v13, %v5092_v25  ;;  %v1512_v54 = vadd.f32 %v1497_v41, %v1355_v56  ;;  %3862 = vmatprep.mubr.msk.bf16.mxu1 %vm4026_vm0, %v4025_v1 }
 0x179   : > { %v3597_v36 = vpop.f32.mrf.mxu0  ;;  %v3622_v12 = vpop.f32.mrf.mxu1 }
 0x17b   : > { %v1600_v40 = vpop.f32.mrf.mxu0  ;;  %3839 = vmatmul.mubr.msk.bf16.gmra.mxu0 %vm1699_vm9, %v2673_v2  ;;  %v1500_v25 = vpop.f32.mrf.mxu1 }
 0x17c   : > { %v1639_v61 = vadd.f32 %v1600_v40, %v5097_v44  ;;  %v1513_v50 = vadd.f32 %v1500_v25, %v1356_v8 }
 0x17d   : > { %v3632_v58 = vpop.f32.mrf.mxu0  ;;  %v3623_v23 = vpop.f32.mrf.mxu1 }
 0x17f   : > { %v1603_v4 = vpop.f32.mrf.mxu0  ;;  %v1753_v3 = vpop.f32.mrf.mxu1  ;;  %3863 = vmatmul.mubr.msk.bf16.gmra.mxu1 %vm1699_vm9, %v2798_v35 }
 0x180   : > { %v1640_v0 = vadd.f32 %v1603_v4, %v5108_v21  ;;  %v1792_v7 = vadd.f32 %v1753_v3, %v1639_v61 }
 0x181   : > { %v3633_v45 = vpop.f32.mrf.mxu0  ;;  %v3656_v62 = vpop.f32.mrf.mxu1 }
 0x183   : > { %v1608_v1 = vpop.f32.mrf.mxu0  ;;  %v1756_v44 = vpop.f32.mrf.mxu1 }
 0x184   : > { %v1641_v20 = vadd.f32 %v1608_v1, %v5117_v10  ;;  %v1793_v59 = vadd.f32 %v1756_v44, %v1640_v0 }
 0x185   : > { %v3636_v22 = vpop.f32.mrf.mxu0  ;;  %v3657_v63 = vpop.f32.mrf.mxu1 }
 0x187   : > { %v1611_v39 = vpop.f32.mrf.mxu0  ;;  %v1761_v31 = vpop.f32.mrf.mxu1 }
 0x188   : > { %v1642_v11 = vadd.f32 %v1611_v39, %v5129_v18  ;;  %v1794_v33 = vadd.f32 %v1761_v31, %v1641_v20 }
 0x189   : > { %v3637_v19 = vpop.f32.mrf.mxu0  ;;  %v3660_v46 = vpop.f32.mrf.mxu1 }
 0x18b   : > { %v1616_v21 = vpop.f32.mrf.mxu0  ;;  %v1764_v42 = vpop.f32.mrf.mxu1 }
 0x18c   : > { %v1643_v27 = vadd.f32 %v1616_v21, %v5136_v17  ;;  %v1795_v57 = vadd.f32 %v1764_v42, %v1642_v11 }
 0x18d   : > { %v3640_v49 = vpop.f32.mrf.mxu0  ;;  %v3661_v48 = vpop.f32.mrf.mxu1 }
 0x18f   : > { %v1619_v16 = vpop.f32.mrf.mxu0  ;;  %v1769_v15 = vpop.f32.mrf.mxu1 }
 0x190   : > { %v1644_v10 = vadd.f32 %v1619_v16, %v5147_v9  ;;  %v1796_v6 = vadd.f32 %v1769_v15, %v1643_v27 }
 0x191   : > { %v3641_v26 = vpop.f32.mrf.mxu0  ;;  %v3664_v5 = vpop.f32.mrf.mxu1 }
 0x193   : > { %v1624_v43 = vpop.f32.mrf.mxu0  ;;  %v1772_v24 = vpop.f32.mrf.mxu1 }
 0x194   : > { %v1645_v18 = vadd.f32 %v1624_v43, %v5153_v60  ;;  %v1797_v38 = vadd.f32 %v1772_v24, %v1644_v10 }
 0x195   : > { %v3644_v37 = vpop.f32.mrf.mxu0  ;;  %v3665_v30 = vpop.f32.mrf.mxu1 }
 0x197   : > { %v1627_v29 = vpop.f32.mrf.mxu0  ;;  %v1777_v53 = vpop.f32.mrf.mxu1 }
 0x198   : > { %v1646_v17 = vadd.f32 %v1627_v29, %v1511_v52  ;;  %v1798_v56 = vadd.f32 %v1777_v53, %v1645_v18 }
 0x199   : > { %v3645_v32 = vpop.f32.mrf.mxu0  ;;  %v3668_v14 = vpop.f32.mrf.mxu1 }
 0x19b   : > { %v1632_v51 = vpop.f32.mrf.mxu0  ;;  %v1780_v13 = vpop.f32.mrf.mxu1 }
 0x19c   : > { %v1647_v55 = vadd.f32 %v1632_v51, %v1512_v54  ;;  %v1799_v28 = vadd.f32 %v1780_v13, %v1646_v17 }
 0x19d   : > { %v3648_v9 = vpop.f32.mrf.mxu0  ;;  %v3669_v8 = vpop.f32.mrf.mxu1 }
 0x19f   : > { %v1635_v34 = vpop.f32.mrf.mxu0  ;;  %v1785_v60 = vpop.f32.mrf.mxu1 }
 0x1a0   : > { %v1648_v2 = vadd.f32 %v1635_v34, %v1513_v50  ;;  %v1800_v41 = vadd.f32 %v1785_v60, %v1647_v55 }
 0x1a1   : > { %v3649_v36 = vpop.f32.mrf.mxu0  ;;  %v3672_v47 = vpop.f32.mrf.mxu1 }
 0x1a3   : > { %v1909_v40 = vpop.f32.mrf.mxu0  ;;  %v1788_v52 = vpop.f32.mrf.mxu1 }
 0x1a4   : > { %v1948_v12 = vadd.f32 %v1909_v40, %v1792_v7  ;;  %v1801_v58 = vadd.f32 %v1788_v52, %v1648_v2 }
 0x1a5   : > { %v3680_v61 = vpop.f32.mrf.mxu0  ;;  %v3673_v4 = vpop.f32.mrf.mxu1 }
 0x1a7   : > { %v1912_v25 = vpop.f32.mrf.mxu0  ;;  %v2034_v54 = vpop.f32.mrf.mxu1 }
 0x1a8   : > { %v1949_v35 = vadd.f32 %v1912_v25, %v1793_v59  ;;  %v2073_v0 = vadd.f32 %v2034_v54, %v1948_v12 }
 0x1a9   : > { %v3681_v23 = vpop.f32.mrf.mxu0  ;;  %v3704_v3 = vpop.f32.mrf.mxu1 }
 0x1ab   : > { %v1917_v45 = vpop.f32.mrf.mxu0  ;;  %v2037_v50 = vpop.f32.mrf.mxu1 }
 0x1ac   : > { %v1950_v1 = vadd.f32 %v1917_v45, %v1794_v33  ;;  %v2074_v20 = vadd.f32 %v2037_v50, %v1949_v35 }
 0x1ad   : > { %v3684_v62 = vpop.f32.mrf.mxu0  ;;  %v3705_v44 = vpop.f32.mrf.mxu1 }
 0x1af   : > { %v1920_v22 = vpop.f32.mrf.mxu0  ;;  %v2042_v7 = vpop.f32.mrf.mxu1 }
 0x1b0   : > { %v1951_v39 = vadd.f32 %v1920_v22, %v1795_v57  ;;  %v2075_v11 = vadd.f32 %v2042_v7, %v1950_v1 }
 0x1b1   : > { %v3685_v63 = vpop.f32.mrf.mxu0  ;;  %v3708_v31 = vpop.f32.mrf.mxu1 }
 0x1b3   : > { %v1925_v19 = vpop.f32.mrf.mxu0  ;;  %v2045_v59 = vpop.f32.mrf.mxu1 }
 0x1b4   : > { %v1952_v21 = vadd.f32 %v1925_v19, %v1796_v6  ;;  %v2076_v27 = vadd.f32 %v2045_v59, %v1951_v39 }
 0x1b5   : > { %v3688_v46 = vpop.f32.mrf.mxu0  ;;  %v3709_v42 = vpop.f32.mrf.mxu1 }
 0x1b7   : > { %v1928_v49 = vpop.f32.mrf.mxu0  ;;  %v2050_v33 = vpop.f32.mrf.mxu1 }
 0x1b8   : > { %v1953_v16 = vadd.f32 %v1928_v49, %v1797_v38  ;;  %v2077_v10 = vadd.f32 %v2050_v33, %v1952_v21 }
 0x1b9   : > { %v3689_v48 = vpop.f32.mrf.mxu0  ;;  %v3712_v15 = vpop.f32.mrf.mxu1 }
 0x1bb   : > { %v1933_v26 = vpop.f32.mrf.mxu0  ;;  %v2053_v57 = vpop.f32.mrf.mxu1 }
 0x1bc   : > { %v1954_v43 = vadd.f32 %v1933_v26, %v1798_v56  ;;  %v2078_v18 = vadd.f32 %v2053_v57, %v1953_v16 }
 0x1bd   : > { %v3692_v5 = vpop.f32.mrf.mxu0  ;;  %v3713_v24 = vpop.f32.mrf.mxu1 }
 0x1bf   : > { %v1936_v37 = vpop.f32.mrf.mxu0  ;;  %v2058_v6 = vpop.f32.mrf.mxu1 }
 0x1c0   : > { %v1955_v29 = vadd.f32 %v1936_v37, %v1799_v28  ;;  %v2079_v17 = vadd.f32 %v2058_v6, %v1954_v43 }
 0x1c1   : > { %v3693_v30 = vpop.f32.mrf.mxu0  ;;  %v3716_v53 = vpop.f32.mrf.mxu1 }
 0x1c3   : > { %v1941_v32 = vpop.f32.mrf.mxu0  ;;  %v2061_v38 = vpop.f32.mrf.mxu1 }
 0x1c4   : > { %v1956_v51 = vadd.f32 %v1941_v32, %v1800_v41  ;;  %v2080_v55 = vadd.f32 %v2061_v38, %v1955_v29 }
 0x1c5   : > { %v3696_v14 = vpop.f32.mrf.mxu0  ;;  %v3717_v13 = vpop.f32.mrf.mxu1 }
 0x1c7   : > { %v1944_v9 = vpop.f32.mrf.mxu0  ;;  %v2066_v56 = vpop.f32.mrf.mxu1 }
 0x1c8   : > { %v1957_v34 = vadd.f32 %v1944_v9, %v1801_v58  ;;  %v2081_v2 = vadd.f32 %v2066_v56, %v1956_v51 }
 0x1c9   : > { %v3697_v8 = vpop.f32.mrf.mxu0  ;;  %v3720_v60 = vpop.f32.mrf.mxu1 }
 0x1cb   : > { %v2167_v36 = vpop.f32.mrf.mxu0  ;;  %v2069_v28 = vpop.f32.mrf.mxu1 }
 0x1cc   : > { %v2206_v40 = vadd.f32 %v2167_v36, %v2073_v0  ;;  %v2082_v12 = vadd.f32 %v2069_v28, %v1957_v34 }
 0x1cd   : > { %v3728_v47 = vpop.f32.mrf.mxu0  ;;  %v3721_v52 = vpop.f32.mrf.mxu1 }
 0x1cf   : > { %v2170_v61 = vpop.f32.mrf.mxu0  ;;  %v2334_v41 = vpop.f32.mrf.mxu1 }
 0x1d0   : > { %v2207_v25 = vadd.f32 %v2170_v61, %v2074_v20  ;;  %v5179_v35 = vadd.f32 %v2334_v41, %v2206_v40 }
 0x1d1   : > { %v3729_v4 = vpop.f32.mrf.mxu0  ;;  %v3752_v54 = vpop.f32.mrf.mxu1 }
 0x1d3   : > { %v2175_v23 = vpop.f32.mrf.mxu0  ;;  %v2337_v3 = vpop.f32.mrf.mxu1 }
 0x1d4   : > { %v2208_v45 = vadd.f32 %v2175_v23, %v2075_v11  ;;  %v5181_v1 = vadd.f32 %v2337_v3, %v2207_v25 }
 0x1d5   : > { %v3732_v58 = vpop.f32.mrf.mxu0  ;;  %v3753_v50 = vpop.f32.mrf.mxu1 }
 0x1d7   : > { %v2178_v62 = vpop.f32.mrf.mxu0  ;;  %v2342_v44 = vpop.f32.mrf.mxu1 }
 0x1d8   : > { %v2209_v0 = vadd.f32 %v2178_v62, %v2076_v27  ;;  %v5183_v39 = vadd.f32 %v2342_v44, %v2208_v45 }
 0x1d9   : > { %v3733_v22 = vpop.f32.mrf.mxu0  ;;  %v3756_v20 = vpop.f32.mrf.mxu1 }
 0x1db   : > { %v2183_v63 = vpop.f32.mrf.mxu0  ;;  %v2345_v31 = vpop.f32.mrf.mxu1 }
 0x1dc   : > { %v2210_v7 = vadd.f32 %v2183_v63, %v2077_v10  ;;  %v5185_v21 = vadd.f32 %v2345_v31, %v2209_v0 }
 0x1dd   : > { %v3736_v19 = vpop.f32.mrf.mxu0  ;;  %v3757_v11 = vpop.f32.mrf.mxu1 }
 0x1df   : > { %v2186_v46 = vpop.f32.mrf.mxu0  ;;  %v2350_v42 = vpop.f32.mrf.mxu1 }
 0x1e0   : > { %v2211_v59 = vadd.f32 %v2186_v46, %v2078_v18  ;;  %v5187_v16 = vadd.f32 %v2350_v42, %v2210_v7 }
 0x1e1   : > { %v3737_v49 = vpop.f32.mrf.mxu0  ;;  %v3760_v27 = vpop.f32.mrf.mxu1 }
 0x1e3   : > { %v2191_v48 = vpop.f32.mrf.mxu0  ;;  %v2353_v15 = vpop.f32.mrf.mxu1 }
 0x1e4   : > { %v2212_v33 = vadd.f32 %v2191_v48, %v2079_v17  ;;  %v5189_v43 = vadd.f32 %v2353_v15, %v2211_v59 }
 0x1e5   : > { %v3740_v26 = vpop.f32.mrf.mxu0  ;;  %v3761_v10 = vpop.f32.mrf.mxu1 }
 0x1e7   : > { %v2194_v5 = vpop.f32.mrf.mxu0  ;;  %v2358_v24 = vpop.f32.mrf.mxu1 }
 0x1e8   : > { %v2213_v57 = vadd.f32 %v2194_v5, %v2080_v55  ;;  %v5191_v29 = vadd.f32 %v2358_v24, %v2212_v33 }
 0x1e9   : > { %v3741_v37 = vpop.f32.mrf.mxu0  ;;  %v3764_v18 = vpop.f32.mrf.mxu1 }
 0x1eb   : > { %v2199_v30 = vpop.f32.mrf.mxu0  ;;  %v2361_v53 = vpop.f32.mrf.mxu1 }
 0x1ec   : > { %v2214_v6 = vadd.f32 %v2199_v30, %v2081_v2  ;;  %v5193_v51 = vadd.f32 %v2361_v53, %v2213_v57 }
 0x1ed   : > { %v3744_v32 = vpop.f32.mrf.mxu0  ;;  %v3765_v17 = vpop.f32.mrf.mxu1 }
 0x1ef   : > { %v2202_v14 = vpop.f32.mrf.mxu0  ;;  %v2366_v13 = vpop.f32.mrf.mxu1 }
 0x1f0   : > { %v2215_v38 = vadd.f32 %v2202_v14, %v2082_v12  ;;  %v5195_v34 = vadd.f32 %v2366_v13, %v2214_v6 }
 0x1f1   : > { %v3745_v9 = vpop.f32.mrf.mxu0  ;;  %v3768_v55 = vpop.f32.mrf.mxu1 }
 0x1f3   : > { %v2459_v8 = vpop.f32.mrf.mxu0  ;;  %v2369_v36 = vpop.f32.mrf.mxu1 }
 0x1f4   : > { %v5197_v60 = vadd.f32 %v2369_v36, %v2215_v38  ;;  %v2498_v37 = vadd.f32 %v2459_v8, %v5179_v35 }
 0x1f5   : > { %v3776_v56 = vpop.f32.mrf.mxu0  ;;  %v3769_v47 = vpop.f32.mrf.mxu1 }
 0x1f7   : > { %v2462_v40 = vpop.f32.mrf.mxu0  ;;  %v2588_v28 = vpop.f32.mrf.mxu1 }
 0x1f8   : > { %v2627_v18 = vadd.f32 %v2588_v28, %v2498_v37  ;;  %v2499_v53 = vadd.f32 %v2462_v40, %v5181_v1 }
 0x1f9   : > { %v3777_v2 = vpop.f32.mrf.mxu0  ;;  %v3800_v52 = vpop.f32.mrf.mxu1 }
 0x1fb   : > { %v2467_v61 = vpop.f32.mrf.mxu0  ;;  %v2591_v4 = vpop.f32.mrf.mxu1 }
 0x1fc   : > { %v2628_v35 = vadd.f32 %v2591_v4, %v2499_v53  ;;  %v2500_v55 = vadd.f32 %v2467_v61, %v5183_v39 }
 0x1fd   : > { %v3780_v25 = vpop.f32.mrf.mxu0  ;;  %v3801_v12 = vpop.f32.mrf.mxu1 }
 0x1ff   : > { %v2470_v41 = vpop.f32.mrf.mxu0  ;;  %v2596_v54 = vpop.f32.mrf.mxu1 }
 0x200   : > { %v2629_v40 = vadd.f32 %v2596_v54, %v2500_v55  ;;  %v2501_v52 = vadd.f32 %v2470_v41, %v5185_v21 }
 0x201   : > { %v3781_v23 = vpop.f32.mrf.mxu0  ;;  %v3804_v58 = vpop.f32.mrf.mxu1 }
 0x203   : > { %v5199_v45 = vpop.f32.mrf.mxu0  ;;  %v2599_v62 = vpop.f32.mrf.mxu1 }
 0x204   : > { %v2630_v23 = vadd.f32 %v2599_v62, %v2501_v52  ;;  %v2502_v61 = vadd.f32 %v5199_v45, %v5187_v16 }
 0x205   : > { %v3784_v3 = vpop.f32.mrf.mxu0  ;;  %v3805_v0 = vpop.f32.mrf.mxu1 }
 0x207   : > { %v5201_v50 = vpop.f32.mrf.mxu0  ;;  %v2604_v44 = vpop.f32.mrf.mxu1 }
 0x209   : > { %v3785_v22 = vpop.f32.mrf.mxu0  ;;  %v3808_v20 = vpop.f32.mrf.mxu1 }
 0x20a   : > { %v2631_v20 = vadd.f32 %v2604_v44, %v2502_v61 }
 0x20b   : > { %v5203_v63 = vpop.f32.mrf.mxu0  ;;  %v5205_v19 = vpop.f32.mrf.mxu1 }
 0x20d   : > { %v3788_v7 = vpop.f32.mrf.mxu0  ;;  %v3809_v46 = vpop.f32.mrf.mxu1 }
 0x20e   : > { %v2503_v46 = vadd.f32 %v5201_v50, %v5189_v43 }
 0x20f   : > { %v5207_v31 = vpop.f32.mrf.mxu0  ;;  %v5209_v59 = vpop.f32.mrf.mxu1 }
 0x211   : > { %v3789_v11 = vpop.f32.mrf.mxu0  ;;  %v3812_v42 = vpop.f32.mrf.mxu1 }
 0x213   : > { %v5211_v49 = vpop.f32.mrf.mxu0  ;;  %v5213_v27 = vpop.f32.mrf.mxu1 }
 0x215   : > { %v3792_v48 = vpop.f32.mrf.mxu0  ;;  %v3813_v26 = vpop.f32.mrf.mxu1 }
 0x216   : > { %v2632_v48 = vadd.f32 %v5205_v19, %v2503_v46 }
 0x217   : > { %v5215_v33 = vpop.f32.mrf.mxu0  ;;  %v5219_v5 = vpop.f32.mrf.mxu1 }
 0x219   : > { %v3793_v15 = vpop.f32.mrf.mxu0  ;;  %v3816_v57 = vpop.f32.mrf.mxu1 }
 0x21a   : > { %v2504_v15 = vadd.f32 %v5203_v63, %v5191_v29 }
 0x21b   : > { %v2735_v10 = vpop.f32.mrf.mxu0  ;;  %v5222_v30 = vpop.f32.mrf.mxu1 }
 0x21c   : > { %v2774_v14 = vadd.f32 %v2735_v10, %v2627_v18  ;;  %v2633_v43 = vadd.f32 %v5209_v59, %v2504_v15  ;;  %v2505_v18 = vadd.f32 %v5207_v31, %v5193_v51 }
 0x21d   : > { %v3824_v24 = vpop.f32.mrf.mxu0  ;;  %v3817_v32 = vpop.f32.mrf.mxu1 }
 0x21e   : > { %v2634_v29 = vadd.f32 %v5213_v27, %v2505_v18  ;;  %v2507_v27 = vadd.f32 %v5215_v33, %v5197_v60 }
 0x21f   : > { %v2738_v6 = vpop.f32.mrf.mxu0  ;;  %v2860_v38 = vpop.f32.mrf.mxu1 }
 0x220   : > { %v2899_v9 = vadd.f32 %v2860_v38, %v2774_v14  ;;  %v2775_v56 = vadd.f32 %v2738_v6, %v2628_v35 }
 0x221   : > { %v3825_v17 = vpop.f32.mrf.mxu0  ;;  %v3848_v8 = vpop.f32.mrf.mxu1 }
 0x222   : > { %2909 = vst [vmem:[%s5228_s28] sm:$0xff] %v2899_v9  ;;  %v2506_v17 = vadd.f32 %v5211_v49, %v5195_v34  ;;  %v2636_v34 = vadd.f32 %v5222_v30, %v2507_v27 }
 0x223   : > { %v2743_v13 = vpop.f32.mrf.mxu0  ;;  %v2863_v1 = vpop.f32.mrf.mxu1 }
 0x224   : > { %v2900_v47 = vadd.f32 %v2863_v1, %v2775_v56  ;;  %v2776_v25 = vadd.f32 %v2743_v13, %v2629_v40  ;;  %v2635_v51 = vadd.f32 %v5219_v5, %v2506_v17 }
 0x225   : > { %v3828_v36 = vpop.f32.mrf.mxu0  ;;  %v3849_v28 = vpop.f32.mrf.mxu1 }
 0x226   : > { %2910 = vst [vmem:[%s5228_s28 + $0x8] sm:$0xff] %v2900_v47 }
 0x227   : > { %v2746_v2 = vpop.f32.mrf.mxu0  ;;  %v2868_v4 = vpop.f32.mrf.mxu1 }
 0x228   : > { %v2901_v58 = vadd.f32 %v2868_v4, %v2776_v25  ;;  %v2777_v0 = vadd.f32 %v2746_v2, %v2630_v23 }
 0x229   : > { %v3829_v12 = vpop.f32.mrf.mxu0  ;;  %v3852_v39 = vpop.f32.mrf.mxu1 }
 0x22a   : > { %2911 = vst [vmem:[%s5228_s28 + $0x10] sm:$0xff] %v2901_v58 }
 0x22b   : > { %v2751_v3 = vpop.f32.mrf.mxu0  ;;  %v2871_v22 = vpop.f32.mrf.mxu1 }
 0x22c   : > { %v2902_v7 = vadd.f32 %v2871_v22, %v2777_v0  ;;  %v2778_v11 = vadd.f32 %v2751_v3, %v2631_v20 }
 0x22d   : > { %v3832_v54 = vpop.f32.mrf.mxu0  ;;  %v3853_v41 = vpop.f32.mrf.mxu1 }
 0x22e   : > { %2912 = vst [vmem:[%s5228_s28 + $0x18] sm:$0xff] %v2902_v7 }
 0x22f   : > { %v2754_v21 = vpop.f32.mrf.mxu0  ;;  %v2876_v42 = vpop.f32.mrf.mxu1 }
 0x230   : > { %v2903_v16 = vadd.f32 %v2876_v42, %v2778_v11  ;;  %v2779_v44 = vadd.f32 %v2754_v21, %v2632_v48 }
 0x231   : > { %v3833_v62 = vpop.f32.mrf.mxu0  ;;  %v3856_v26 = vpop.f32.mrf.mxu1 }
 0x232   : > { %2913 = vst [vmem:[%s5228_s28 + $0x20] sm:$0xff] %v2903_v16 }
 0x233   : > { %v2759_v45 = vpop.f32.mrf.mxu0  ;;  %v2879_v57 = vpop.f32.mrf.mxu1 }
 0x234   : > { %v2904_v50 = vadd.f32 %v2879_v57, %v2779_v44  ;;  %v2780_v19 = vadd.f32 %v2759_v45, %v2633_v43 }
 0x235   : > { %v3836_v10 = vpop.f32.mrf.mxu0  ;;  %v3857_v24 = vpop.f32.mrf.mxu1 }
 0x236   : > { %2914 = vst [vmem:[%s5228_s28 + $0x28] sm:$0xff] %v2904_v50 }
 0x237   : > { %v2762_v37 = vpop.f32.mrf.mxu0  ;;  %v2884_v32 = vpop.f32.mrf.mxu1 }
 0x238   : > { %v2905_v63 = vadd.f32 %v2884_v32, %v2780_v19  ;;  %v2781_v59 = vadd.f32 %v2762_v37, %v2634_v29 }
 0x239   : > { %v3837_v6 = vpop.f32.mrf.mxu0  ;;  %v3860_v14 = vpop.f32.mrf.mxu1 }
 0x23a   : > { %2915 = vst [vmem:[%s5228_s28 + $0x30] sm:$0xff] %v2905_v63 }
 0x23b   : > { %v2767_v53 = vpop.f32.mrf.mxu0  ;;  %v2887_v35 = vpop.f32.mrf.mxu1 }
 0x23c   : > { %v2906_v31 = vadd.f32 %v2887_v35, %v2781_v59  ;;  %v2782_v8 = vadd.f32 %v2767_v53, %v2635_v51 }
 0x23d   : > { %v3840_v38 = vpop.f32.mrf.mxu0  ;;  %v3861_v13 = vpop.f32.mrf.mxu1 }
 0x23e   : > { %2916 = vst [vmem:[%s5228_s28 + $0x38] sm:$0xff] %v2906_v31 }
 0x23f   : > { %v2770_v9 = vpop.f32.mrf.mxu0  ;;  %v2892_v56 = vpop.f32.mrf.mxu1 }
 0x240   : > { %v2907_v49 = vadd.f32 %v2892_v56, %v2782_v8  ;;  %v2783_v1 = vadd.f32 %v2770_v9, %v2636_v34 }
 0x241   : > { %v3841_v55 = vpop.f32.mrf.mxu0  ;;  %v3864_v36 = vpop.f32.mrf.mxu1 }
 0x242   : > { %2917 = vst [vmem:[%s5228_s28 + $0x40] sm:$0xff] %v2907_v49 }
 0x243   : > { %v2895_v40 = vpop.f32.mrf.mxu1 }
 0x244   : > { %v2908_v47 = vadd.f32 %v2895_v40, %v2783_v1 }
 0x245   : > { %v3865_v5 = vpop.f32.mrf.mxu1 }
 0x246   : > { %2918 = vst [vmem:[%s5228_s28 + $0x48] sm:$0xff] %v2908_v47 }
 0x247 PF: > { %s15_s22 = sadd.s32 1, %s4023_s22   ;;  %s5280_s18 = smov %s4015_s20 }
 0x248   : > { %p12_p7 = scmp.ge.s32.totalorder %s15_s22, 18   ;;  %s5281_s19 = smov %s4019_s21 }
 0x249   : > { %s5282_s20 = smov %s5285_s23  ;;  %s5283_s21 = smov %s5289_s24 }
 0x24a   :  { %14 = sbr.rel (!%p12_p7) target bundleno = 3 (0x3), region = 89 }

</bundles_post_ra>
